<compile_context>
chip_gen: v7x
topology: tpu7x:2x2x1
jax: 0.10.0
libtpu: 0.0.40
codegen_flags: <defaults>
</compile_context>

<pallas_src>
import jax
import jax.numpy as jnp
from jax.experimental import pallas as pl
from jax.experimental.pallas import tpu as pltpu

NUM_FEATURES = 41
H1, H2, H3, H4 = 128, 64, 32, 16
NUM_CLASSES = 2
LANE = 128                 # padded width of every layer output (lane-dense)
DEFAULT_BLOCK_B = 512      # batch tile (>= 512 amortizes per-step overhead)
MIN_PALLAS_BATCH = 256     # below this, plain XLA wins


def _round_up(n, m):
    return ((n + m - 1) // m) * m


def _pad_to(a, shape):
    return jnp.pad(a, [(0, t - s) for s, t in zip(a.shape, shape)])


def _mlp_kernel(x_ref,
                w1_ref, b1_ref,
                w2_ref, b2_ref,
                w3_ref, b3_ref,
                w4_ref, b4_ref,
                w5_ref, b5_ref,
                o_ref):
    # One (TB, 41) bf16 tile of the batch; all (padded) weights resident in
    # VMEM. Hot path: 5 bf16 MXU matmuls with f32 accumulation + VPU/EUP
    # activations in f32, then one lane-dense (TB, 128) f32 store.
    h = jnp.dot(x_ref[...], w1_ref[...],
                preferred_element_type=jnp.float32) + b1_ref[...]
    h = jnp.tanh(h)

    h = jnp.dot(h.astype(jnp.bfloat16), w2_ref[...],
                preferred_element_type=jnp.float32) + b2_ref[...]
    h = jnp.tanh(h)

    h = jnp.dot(h.astype(jnp.bfloat16), w3_ref[...],
                preferred_element_type=jnp.float32) + b3_ref[...]
    h = jax.nn.sigmoid(h)

    h = jnp.dot(h.astype(jnp.bfloat16), w4_ref[...],
                preferred_element_type=jnp.float32) + b4_ref[...]
    h = jax.nn.sigmoid(h)

    h = jnp.dot(h.astype(jnp.bfloat16), w5_ref[...],
                preferred_element_type=jnp.float32) + b5_ref[...]

    o_ref[...] = h


def prepare_params(params):
    """Pad every layer to 128 output lanes, cast W to bf16, keep b in f32."""
    padded = []
    in_dim = NUM_FEATURES
    for (w, b) in params:
        w_p = _pad_to(w, (in_dim, LANE)).astype(jnp.bfloat16)
        b_p = _pad_to(b, (1, LANE)).astype(jnp.float32)
        padded.append((w_p, b_p))
        in_dim = LANE
    return padded


def reference_forward(x, params):
    """Pure f32 reference matching the PyTorch module semantics."""
    h = x
    acts = [jnp.tanh, jnp.tanh, jax.nn.sigmoid, jax.nn.sigmoid, None]
    for (w, b), act in zip(params, acts):
        h = h @ w + b
        if act is not None:
            h = act(h)
    return h


def reference_forward_bf16(x, params):
    """Mirror of the kernel's bf16-matmul / f32-accumulate numerics."""
    padded = prepare_params(params)
    h = x.astype(jnp.bfloat16)
    acts = [jnp.tanh, jnp.tanh, jax.nn.sigmoid, jax.nn.sigmoid, None]
    for (w, b), act in zip(padded, acts):
        h = jnp.dot(h.astype(jnp.bfloat16), w,
                    preferred_element_type=jnp.float32) + b
        if act is not None:
            h = act(h)
    return h[:, :NUM_CLASSES]


def model_label_forward(x, params, *, block_b=DEFAULT_BLOCK_B,
                        min_pallas_batch=MIN_PALLAS_BATCH):
    """x: (B, 41) float32. params: list of (W, b) with W = (in, out), b = (1, out)."""
    B = x.shape[0]
    if B < min_pallas_batch:
        # Tiny batch: kernel launch + DMA descriptors dominate; use fused XLA.
        return jax.jit(reference_forward)(x, params)

    tb = min(block_b, _round_up(B, 8))
    B_pad = _round_up(B, tb)

    x_p = x
    if B_pad != B:
        x_p = jnp.pad(x, ((0, B_pad - B), (0, 0)))
    x_p = x_p.astype(jnp.bfloat16)

    padded_params = prepare_params(params)

    flat = []
    # x tile streams over the batch; weights/biases are grid-invariant blocks
    # (same block index every step -> DMA'd once, stay resident).
    in_specs = [pl.BlockSpec((tb, NUM_FEATURES), lambda i: (i, 0))]
    for (w, b) in padded_params:
        flat.append(w)
        flat.append(b)
        in_specs.append(pl.BlockSpec(w.shape, lambda i: (0, 0)))
        in_specs.append(pl.BlockSpec(b.shape, lambda i: (0, 0)))

    fn = pl.pallas_call(
        _mlp_kernel,
        out_shape=jax.ShapeDtypeStruct((B_pad, LANE), jnp.float32),
        grid=(B_pad // tb,),
        in_specs=in_specs,
        out_specs=pl.BlockSpec((tb, LANE), lambda i: (i, 0)),
        compiler_params=pltpu.CompilerParams(
            dimension_semantics=("parallel",),   # shards batch tiles on v7x
            vmem_limit_bytes=32 * 1024 * 1024,
        ),
    )
    out = fn(x_p, *flat)
    return out[:B, :NUM_CLASSES]


def init_params(key):
    """Deterministic init mimicking PyTorch nn.Linear default (U[-1/sqrt(fan_in), +])."""
    dims = [NUM_FEATURES, H1, H2, H3, H4, NUM_CLASSES]
    params = []
    for i in range(len(dims) - 1):
        fan_in, fan_out = dims[i], dims[i + 1]
        key, kw, kb = jax.random.split(key, 3)
        bound = 1.0 / jnp.sqrt(float(fan_in))
        # Stored directly as (in, out) = transpose of PyTorch's (out, in).
        w_t = jax.random.uniform(kw, (fan_in, fan_out), jnp.float32, -bound, bound)
        b = jax.random.uniform(kb, (1, fan_out), jnp.float32, -bound, bound)
        params.append((w_t, b))
    return params


if __name__ == "__main__":
    key = jax.random.PRNGKey(0)
    key, kx = jax.random.split(key)

    # Big enough to exercise the batch-tiled grid (2 steps of TB=512) while
    # still being a tiny amount of data (~170 KB of input).
    B = 1024
    x = jax.random.normal(kx, (B, NUM_FEATURES), jnp.float32)
    params = init_params(jax.random.PRNGKey(0))

    out = model_label_forward(x, params)
    out = jax.block_until_ready(out)
    assert out.shape == (B, NUM_CLASSES)

    # Strict check against a reference mirroring the kernel's mixed precision.
    ref_bf16 = reference_forward_bf16(x, params)
    assert jnp.allclose(out, ref_bf16, atol=1e-3, rtol=1e-3), \
        float(jnp.max(jnp.abs(out - ref_bf16)))

    # Loose semantic check against the pure-f32 reference (bf16 quantization only).
    ref_f32 = reference_forward(x, params)
    assert jnp.allclose(out, ref_f32, atol=1e-1, rtol=1e-1), \
        float(jnp.max(jnp.abs(out - ref_f32)))

    print("KERNEL_OK")
</pallas_src>

<mosaic_0001>
module attributes {stable_mosaic.version = 11 : i64} {
  func.func @_mlp_kernel(%arg0: i32, %arg1: memref<512x41xbf16, #tpu.memory_space<vmem>>, %arg2: memref<41x128xbf16, #tpu.memory_space<vmem>>, %arg3: memref<1x128xf32, #tpu.memory_space<vmem>>, %arg4: memref<128x128xbf16, #tpu.memory_space<vmem>>, %arg5: memref<1x128xf32, #tpu.memory_space<vmem>>, %arg6: memref<128x128xbf16, #tpu.memory_space<vmem>>, %arg7: memref<1x128xf32, #tpu.memory_space<vmem>>, %arg8: memref<128x128xbf16, #tpu.memory_space<vmem>>, %arg9: memref<1x128xf32, #tpu.memory_space<vmem>>, %arg10: memref<128x128xbf16, #tpu.memory_space<vmem>>, %arg11: memref<1x128xf32, #tpu.memory_space<vmem>>, %arg12: memref<512x128xf32, #tpu.memory_space<vmem>>) attributes {dimension_semantics = [#tpu.dimension_semantics<parallel>], iteration_bounds = array<i64: 2>, scalar_prefetch = 0 : i64, scratch_operands = 0 : i64, tpu.core_type = #tpu.core_type<tc>, window_params = [{transform_indices = @transform_0, window_bounds = array<i64: 512, 41>}, {pipeline_mode = #tpu.pipeline_mode<synchronous>, transform_indices = @transform_1, window_bounds = array<i64: 41, 128>}, {pipeline_mode = #tpu.pipeline_mode<synchronous>, transform_indices = @transform_2, window_bounds = array<i64: 1, 128>}, {pipeline_mode = #tpu.pipeline_mode<synchronous>, transform_indices = @transform_3, window_bounds = array<i64: 128, 128>}, {pipeline_mode = #tpu.pipeline_mode<synchronous>, transform_indices = @transform_4, window_bounds = array<i64: 1, 128>}, {pipeline_mode = #tpu.pipeline_mode<synchronous>, transform_indices = @transform_5, window_bounds = array<i64: 128, 128>}, {pipeline_mode = #tpu.pipeline_mode<synchronous>, transform_indices = @transform_6, window_bounds = array<i64: 1, 128>}, {pipeline_mode = #tpu.pipeline_mode<synchronous>, transform_indices = @transform_7, window_bounds = array<i64: 128, 128>}, {pipeline_mode = #tpu.pipeline_mode<synchronous>, transform_indices = @transform_8, window_bounds = array<i64: 1, 128>}, {pipeline_mode = #tpu.pipeline_mode<synchronous>, transform_indices = @transform_9, window_bounds = array<i64: 128, 128>}, {pipeline_mode = #tpu.pipeline_mode<synchronous>, transform_indices = @transform_10, window_bounds = array<i64: 1, 128>}, {transform_indices = @transform_11, window_bounds = array<i64: 512, 128>}]} {
    %c0 = arith.constant 0 : index
    %c0_0 = arith.constant 0 : index
    %0 = vector.load %arg1[%c0, %c0_0] : memref<512x41xbf16, #tpu.memory_space<vmem>>, vector<512x41xbf16>
    %c0_1 = arith.constant 0 : index
    %c0_2 = arith.constant 0 : index
    %1 = vector.load %arg2[%c0_1, %c0_2] : memref<41x128xbf16, #tpu.memory_space<vmem>>, vector<41x128xbf16>
    %cst = arith.constant dense<0.000000e+00> : vector<512x128xf32>
    %2 = tpu.matmul %0, %1, %cst {dimension_numbers = #tpu.dot_dimension_numbers<[1], [0], [0], [1], [0, 0, 1, 1], [], []>} : vector<512x41xbf16>, vector<41x128xbf16>, vector<512x128xf32> -> vector<512x128xf32>
    %c0_3 = arith.constant 0 : index
    %c0_4 = arith.constant 0 : index
    %3 = vector.load %arg3[%c0_3, %c0_4] : memref<1x128xf32, #tpu.memory_space<vmem>>, vector<1x128xf32>
    %4 = vector.broadcast %3 : vector<1x128xf32> to vector<512x128xf32>
    %5 = arith.addf %2, %4 : vector<512x128xf32>
    %6 = math.tanh %5 : vector<512x128xf32>
    %7 = arith.truncf %6 : vector<512x128xf32> to vector<512x128xbf16>
    %c0_5 = arith.constant 0 : index
    %c0_6 = arith.constant 0 : index
    %8 = vector.load %arg4[%c0_5, %c0_6] : memref<128x128xbf16, #tpu.memory_space<vmem>>, vector<128x128xbf16>
    %cst_7 = arith.constant dense<0.000000e+00> : vector<512x128xf32>
    %9 = tpu.matmul %7, %8, %cst_7 {dimension_numbers = #tpu.dot_dimension_numbers<[1], [0], [0], [1], [0, 0, 1, 1], [], []>} : vector<512x128xbf16>, vector<128x128xbf16>, vector<512x128xf32> -> vector<512x128xf32>
    %c0_8 = arith.constant 0 : index
    %c0_9 = arith.constant 0 : index
    %10 = vector.load %arg5[%c0_8, %c0_9] : memref<1x128xf32, #tpu.memory_space<vmem>>, vector<1x128xf32>
    %11 = vector.broadcast %10 : vector<1x128xf32> to vector<512x128xf32>
    %12 = arith.addf %9, %11 : vector<512x128xf32>
    %13 = math.tanh %12 : vector<512x128xf32>
    %14 = arith.truncf %13 : vector<512x128xf32> to vector<512x128xbf16>
    %c0_10 = arith.constant 0 : index
    %c0_11 = arith.constant 0 : index
    %15 = vector.load %arg6[%c0_10, %c0_11] : memref<128x128xbf16, #tpu.memory_space<vmem>>, vector<128x128xbf16>
    %cst_12 = arith.constant dense<0.000000e+00> : vector<512x128xf32>
    %16 = tpu.matmul %14, %15, %cst_12 {dimension_numbers = #tpu.dot_dimension_numbers<[1], [0], [0], [1], [0, 0, 1, 1], [], []>} : vector<512x128xbf16>, vector<128x128xbf16>, vector<512x128xf32> -> vector<512x128xf32>
    %c0_13 = arith.constant 0 : index
    %c0_14 = arith.constant 0 : index
    %17 = vector.load %arg7[%c0_13, %c0_14] : memref<1x128xf32, #tpu.memory_space<vmem>>, vector<1x128xf32>
    %18 = vector.broadcast %17 : vector<1x128xf32> to vector<512x128xf32>
    %19 = arith.addf %16, %18 : vector<512x128xf32>
    %20 = arith.negf %19 : vector<512x128xf32>
    %21 = math.exp %20 : vector<512x128xf32>
    %cst_15 = arith.constant 1.000000e+00 : f32
    %22 = vector.broadcast %cst_15 : f32 to vector<512x128xf32>
    %23 = arith.addf %22, %21 : vector<512x128xf32>
    %24 = arith.divf %22, %23 : vector<512x128xf32>
    %25 = arith.truncf %24 : vector<512x128xf32> to vector<512x128xbf16>
    %c0_16 = arith.constant 0 : index
    %c0_17 = arith.constant 0 : index
    %26 = vector.load %arg8[%c0_16, %c0_17] : memref<128x128xbf16, #tpu.memory_space<vmem>>, vector<128x128xbf16>
    %cst_18 = arith.constant dense<0.000000e+00> : vector<512x128xf32>
    %27 = tpu.matmul %25, %26, %cst_18 {dimension_numbers = #tpu.dot_dimension_numbers<[1], [0], [0], [1], [0, 0, 1, 1], [], []>} : vector<512x128xbf16>, vector<128x128xbf16>, vector<512x128xf32> -> vector<512x128xf32>
    %c0_19 = arith.constant 0 : index
    %c0_20 = arith.constant 0 : index
    %28 = vector.load %arg9[%c0_19, %c0_20] : memref<1x128xf32, #tpu.memory_space<vmem>>, vector<1x128xf32>
    %29 = vector.broadcast %28 : vector<1x128xf32> to vector<512x128xf32>
    %30 = arith.addf %27, %29 : vector<512x128xf32>
    %31 = arith.negf %30 : vector<512x128xf32>
    %32 = math.exp %31 : vector<512x128xf32>
    %cst_21 = arith.constant 1.000000e+00 : f32
    %33 = vector.broadcast %cst_21 : f32 to vector<512x128xf32>
    %34 = arith.addf %33, %32 : vector<512x128xf32>
    %35 = arith.divf %33, %34 : vector<512x128xf32>
    %36 = arith.truncf %35 : vector<512x128xf32> to vector<512x128xbf16>
    %c0_22 = arith.constant 0 : index
    %c0_23 = arith.constant 0 : index
    %37 = vector.load %arg10[%c0_22, %c0_23] : memref<128x128xbf16, #tpu.memory_space<vmem>>, vector<128x128xbf16>
    %cst_24 = arith.constant dense<0.000000e+00> : vector<512x128xf32>
    %38 = tpu.matmul %36, %37, %cst_24 {dimension_numbers = #tpu.dot_dimension_numbers<[1], [0], [0], [1], [0, 0, 1, 1], [], []>} : vector<512x128xbf16>, vector<128x128xbf16>, vector<512x128xf32> -> vector<512x128xf32>
    %c0_25 = arith.constant 0 : index
    %c0_26 = arith.constant 0 : index
    %39 = vector.load %arg11[%c0_25, %c0_26] : memref<1x128xf32, #tpu.memory_space<vmem>>, vector<1x128xf32>
    %40 = vector.broadcast %39 : vector<1x128xf32> to vector<512x128xf32>
    %41 = arith.addf %38, %40 : vector<512x128xf32>
    %c0_27 = arith.constant 0 : index
    %c0_28 = arith.constant 0 : index
    %42 = vector.load %arg12[%c0_27, %c0_28] : memref<512x128xf32, #tpu.memory_space<vmem>>, vector<512x128xf32>
    tpu.vector_store %arg12[%c0_27, %c0_28], %41 {strides = array<i32>} : memref<512x128xf32, #tpu.memory_space<vmem>>, vector<512x128xf32>,
    return
  }
  func.func @transform_0(%arg0: i32) -> (i32, i32) {
    %c0_i32 = arith.constant 0 : i32
    %c0_i32_0 = arith.constant 0 : i32
    return %arg0, %c0_i32 : i32, i32
  }
  func.func @transform_1(%arg0: i32) -> (i32, i32) {
    %c0_i32 = arith.constant 0 : i32
    %c0_i32_0 = arith.constant 0 : i32
    %c0_i32_1 = arith.constant 0 : i32
    return %c0_i32, %c0_i32_0 : i32, i32
  }
  func.func @transform_2(%arg0: i32) -> (i32, i32) {
    %c0_i32 = arith.constant 0 : i32
    %c0_i32_0 = arith.constant 0 : i32
    %c0_i32_1 = arith.constant 0 : i32
    return %c0_i32, %c0_i32_0 : i32, i32
  }
  func.func @transform_3(%arg0: i32) -> (i32, i32) {
    %c0_i32 = arith.constant 0 : i32
    %c0_i32_0 = arith.constant 0 : i32
    %c0_i32_1 = arith.constant 0 : i32
    return %c0_i32, %c0_i32_0 : i32, i32
  }
  func.func @transform_4(%arg0: i32) -> (i32, i32) {
    %c0_i32 = arith.constant 0 : i32
    %c0_i32_0 = arith.constant 0 : i32
    %c0_i32_1 = arith.constant 0 : i32
    return %c0_i32, %c0_i32_0 : i32, i32
  }
  func.func @transform_5(%arg0: i32) -> (i32, i32) {
    %c0_i32 = arith.constant 0 : i32
    %c0_i32_0 = arith.constant 0 : i32
    %c0_i32_1 = arith.constant 0 : i32
    return %c0_i32, %c0_i32_0 : i32, i32
  }
  func.func @transform_6(%arg0: i32) -> (i32, i32) {
    %c0_i32 = arith.constant 0 : i32
    %c0_i32_0 = arith.constant 0 : i32
    %c0_i32_1 = arith.constant 0 : i32
    return %c0_i32, %c0_i32_0 : i32, i32
  }
  func.func @transform_7(%arg0: i32) -> (i32, i32) {
    %c0_i32 = arith.constant 0 : i32
    %c0_i32_0 = arith.constant 0 : i32
    %c0_i32_1 = arith.constant 0 : i32
    return %c0_i32, %c0_i32_0 : i32, i32
  }
  func.func @transform_8(%arg0: i32) -> (i32, i32) {
    %c0_i32 = arith.constant 0 : i32
    %c0_i32_0 = arith.constant 0 : i32
    %c0_i32_1 = arith.constant 0 : i32
    return %c0_i32, %c0_i32_0 : i32, i32
  }
  func.func @transform_9(%arg0: i32) -> (i32, i32) {
    %c0_i32 = arith.constant 0 : i32
    %c0_i32_0 = arith.constant 0 : i32
    %c0_i32_1 = arith.constant 0 : i32
    return %c0_i32, %c0_i32_0 : i32, i32
  }
  func.func @transform_10(%arg0: i32) -> (i32, i32) {
    %c0_i32 = arith.constant 0 : i32
    %c0_i32_0 = arith.constant 0 : i32
    %c0_i32_1 = arith.constant 0 : i32
    return %c0_i32, %c0_i32_0 : i32, i32
  }
  func.func @transform_11(%arg0: i32) -> (i32, i32) {
    %c0_i32 = arith.constant 0 : i32
    %c0_i32_0 = arith.constant 0 : i32
    return %arg0, %c0_i32 : i32, i32
  }
}

</mosaic_0001>

<bundles_post_ra>
// kernel: tpu_custom_call.1
= control target key start
LH: loop header
LB: loop body
LE: loop exit
PB: predicated region body
PF: predicated region fallthrough
CT: control target
= control target key end

     0   :  { %16 = vsyncpa [#allocation3], 0  ;;  %s6256_s0 = inlined_call_operand.vmem [shape: bf16[1024,41], index: 0, kind: input, shape index: {}]   ;;  %s6257_s1 = inlined_call_operand.vmem [shape: bf16[41,128], index: 1, kind: input, shape index: {}]   ;;  %s6258_s2 = inlined_call_operand.vmem [shape: f32[1,128], index: 2, kind: input, shape index: {}]   ;;  %s6259_s3 = inlined_call_operand.vmem [shape: bf16[128,128], index: 3, kind: input, shape index: {}]   ;;  %s6260_s4 = inlined_call_operand.vmem [shape: f32[1,128], index: 4, kind: input, shape index: {}]   ;;  %s6261_s5 = inlined_call_operand.vmem [shape: bf16[128,128], index: 5, kind: input, shape index: {}]   ;;  %s6262_s6 = inlined_call_operand.vmem [shape: f32[1,128], index: 6, kind: input, shape index: {}]   ;;  %s6263_s7 = inlined_call_operand.vmem [shape: bf16[128,128], index: 7, kind: input, shape index: {}]   ;;  %s6264_s8 = inlined_call_operand.vmem [shape: f32[1,128], index: 8, kind: input, shape index: {}]   ;;  %s6265_s9 = inlined_call_operand.vmem [shape: bf16[128,128], index: 9, kind: input, shape index: {}]   ;;  %s6266_s10 = inlined_call_operand.vmem [shape: f32[1,128], index: 10, kind: input, shape index: {}]   ;;  %s6267_s11 = inlined_call_operand.hbm [shape: f32[1024,128], index: 11, kind: output, shape index: {}]  }
   0x1   :  { %18 = vsyncpa [#allocation3 + $0x1], 0  ;;  %s5483_s17 = smov 0   ;;  %s5485_s18 = smov 0  }
   0x2   :  { %s5487_s19 = smov 0   ;;  %s5489_s20 = smov 0  }
   0x3 LB: > { %s5504_s21 = sadd.s32 4294967295, %s5417_s20   ;;  %s3640_s22 = sadd.s32 4294967294, %s5417_s20   ;;  %s5417_s20 = sphi %s5489_s20, %s6273_s20   ;;  %s5413_s19 = sphi %s5487_s19, %s6272_s19   ;;  %s5409_s18 = sphi %s5485_s18, %s6271_s18   ;;  %s5405_s17 = sphi %s5483_s17, %s6270_s17  }
   0x4   : > { %s5508_s23 = sadd.s32 1, %s5417_s20   ;;  %s267_s24 = sadd.s32 1, %s5413_s19 }
   0x5   : > { %s264_s25 = ssub.s32 %s5417_s20, %s5508_s23  ;;  %p277_p0 = scmp.ne.s32.totalorder %s5413_s19, %s5409_s18 }
   0x6   : > { %p265_p1 = scmp.eq.s32.totalorder %s264_s25, 0  ;;  %p278_p2 = scmp.eq.s32.totalorder %s5504_s21, 1 }
   0x7   : > { %p283_p3 = scmp.ne.s32.totalorder %s5409_s18, %s5405_s17  ;;  %p284_p4 = scmp.eq.s32.totalorder %s3640_s22, 1 }
   0x8   : > { %s5519_s26 = scalar_select %p265_p1, %s5413_s19, %s267_s24  }
   0x9   : > { %p5521_p5 = por %p278_p2, %p277_p0  ;;  %p5525_p6 = por %p284_p4, %p283_p3 }
   0xa   : > { %p3643_p7 = scmp.ge.s32.totalorder %s5417_s20, 1  ;;  %p341_p8 = scmp.lt.s32.totalorder %s5417_s20, 3 }
   0xc   : > { %p342_p9 = pnand %p3643_p7, %p341_p8 }
   0xd   : > { %v4518_v0 = vld [vmem:[%s6257_s1] sm:$0xff] (!%p342_p9)   ;;  %vm740_vm0 = vcmask (!%p342_p9), 1043456   ;;  %v4519_v1 = vld [vmem:[%s6257_s1 + $0x8] sm:$0xff] (!%p342_p9)   ;;  %vm741_vm1 = vcmask (!%p342_p9), 1044480   ;;  %v4520_v2 = vld [vmem:[%s6257_s1 + $0x10] sm:$0x1f] (!%p342_p9)  }
   0xe   : > { %345 = sbr.rel (%p342_p9) target bundleno = 1339 (0x53b), region = 64  ;;  %4080 = vmatprep.subr.bf16.mxu0 (!%p342_p9), %v4518_v0  ;;  %4470 = vmatprep.subr.bf16.mxu1 (!%p342_p9), %v4518_v0  ;;  %s3645_s16 = sshll.u32 (!%p342_p9), %s5504_s21, 6  ;;  %v5419_v3 = vmov (!%p342_p9), 65535   ;;  %v4553_v7 = vld [vmem:[%s6259_s3] sm:$0xff] (!%p342_p9)   ;;  %vm643_vm2 = vcmask (!%p342_p9), 334848   ;;  %v4554_v16 = vld [vmem:[%s6259_s3 + $0x8] sm:$0xff] (!%p342_p9)  }
   0xf   : > { %4081 = vmatpush3.bf16.msra.mxu0 (!%p342_p9), %v4518_v0  ;;  %4473 = vmatpush3.bf16.msra.mxu1 (!%p342_p9), %v4518_v0  ;;  %v742_v4 = vsel (!%p342_p9), %vm740_vm0, 4294967295, %v5419_v3  ;;  %p382_p10 = scmp.lt.s32.totalorder (!%p342_p9), %s3645_s16, 127  ;;  %v4555_v19 = vld [vmem:[%s6259_s3 + $0x10] sm:$0xff] (!%p342_p9)   ;;  %v4556_v24 = vld [vmem:[%s6259_s3 + $0x18] sm:$0xff] (!%p342_p9)   ;;  %v4557_v25 = vld [vmem:[%s6259_s3 + $0x20] sm:$0xff] (!%p342_p9)   ;;  %s378_s24 = sand.u32 (!%p342_p9), 1, %s5409_s18  }
  0x10   : > { %4082 = vmatprep.subr.bf16.mxu0 (!%p342_p9), %v4519_v1  ;;  %4471 = vmatprep.subr.bf16.mxu1 (!%p342_p9), %v4519_v1  ;;  %v743_v5 = vsel (!%p342_p9), %vm741_vm1, %v742_v4, 0  ;;  %v4558_v30 = vld [vmem:[%s6259_s3 + $0x28] sm:$0xff] (!%p342_p9)   ;;  %v4559_v45 = vld [vmem:[%s6259_s3 + $0x30] sm:$0xff] (!%p342_p9)   ;;  %v4560_v46 = vld [vmem:[%s6259_s3 + $0x38] sm:$0xff] (!%p342_p9)   ;;  %s3644_s25 = sshll.u32 (!%p342_p9), %s378_s24, 9  ;;  %s3884_s13 = sshll.u32 (!%p342_p9), %s5504_s21, 13 }
  0x11   : > { %v745_v6 = vand.u32 (!%p342_p9), %v4520_v2, %v743_v5  ;;  %v5637_v47 = vld [vmem:[%s6258_s2] ss:$0 sm:$0xff] (!%p342_p9)  ;;  %s6076_s30 = scalar_lea.vmem (!%p342_p9), [#allocation2], %s3644_s25  ;;  %s6215_s21 = scalar_lea.sflag (!%p342_p9), [#allocation3], %s378_s24 }
  0x12   : > { %v4561_v0 = vld [vmem:[%s6261_s5] sm:$0xff] (!%p342_p9)   ;;  %s3578_s14 = sshll.u32 (!%p342_p9), %s6076_s30, 4  ;;  %s6207_s14 = int_to_ptr.vmem [resolvable:$true] %s3578_s14 }
  0x13   : > { %4083 = vmatpush3.bf16.msra.mxu0 (!%p342_p9), %v4519_v1  ;;  %4474 = vmatpush3.bf16.msra.mxu1 (!%p342_p9), %v4519_v1  ;;  %v4562_v1 = vld [vmem:[%s6261_s5 + $0x8] sm:$0xff] (!%p342_p9)   ;;  %s5355_s25 = scalar_lea.vmem (!%p342_p9), %s6207_s14, 8192 }
  0x14   : > { %4084 = vmatprep.subr.bf16.mxu0 (!%p342_p9), %v745_v6  ;;  %4472 = vmatprep.subr.bf16.mxu1 (!%p342_p9), %v745_v6  ;;  %p5356_p11 = scmp.ne.s32.totalorder (!%p342_p9), %s6207_s14, %s5355_s25 }
  0x15   : > { %s6275_s16 = smov (!%p382_p10, %s3645_s16), 127 }
  0x16   : > { %s3646_s22 = sshll.u32 %s6275_s16, 2  ;;  %p5357_p12 = pnand %p5356_p11, %p5521_p5 }
  0x17   : > { %s5547_s12 = scalar_lea.vmem %s6256_s0, %s3646_s22  ;;  %4085 = vmatpush3.bf16.msra.mxu0 %v745_v6  ;;  %4475 = vmatpush3.bf16.msra.mxu1 %v745_v6  ;;  %s6205_s22 = scalar_lea.hbm %s6267_s11, %s3884_s13 }
  0x18   : > { %v4521_v8 = vld [vmem:[%s5547_s12] sm:$0xff]   ;;  %v4522_v9 = vld [vmem:[%s5547_s12 + $0x8] sm:$0xff]   ;;  %v4523_v10 = vld [vmem:[%s5547_s12 + $0x10] sm:$0xff]   ;;  %4150 = vmatprep.subr.bf16.mxu1 %v4553_v7  ;;  %4230 = vmatprep.subr.bf16.mxu0 %v4561_v0  ;;  %p5358_p13 = pneg %p5357_p12 }
  0x19   : > { %4086 = vmatprep.mubr.msk.bf16.mxu0 %vm643_vm2, %v4521_v8  ;;  %v4524_v11 = vld [vmem:[%s5547_s12 + $0x18] sm:$0xff]   ;;  %v4525_v12 = vld [vmem:[%s5547_s12 + $0x20] sm:$0xff]   ;;  %v4526_v13 = vld [vmem:[%s5547_s12 + $0x28] sm:$0xff]  }
  0x1a   : > { %4087 = vmatmul.mubr.msk.bf16.vlgmr.msra.gmra.mrb[0].mxu0 %vm643_vm2, %v4522_v9  ;;  %v4527_v14 = vld [vmem:[%s5547_s12 + $0x30] sm:$0xff]   ;;  %v4537_v15 = vld [vmem:[%s5547_s12 + $0x80] sm:$0xff]   ;;  %v4538_v17 = vld [vmem:[%s5547_s12 + $0x88] sm:$0xff]  }
  0x1b   : > { %4090 = vmatprep.mubr.msk.bf16.mxu0 %vm643_vm2, %v4523_v10  ;;  %4118 = vmatprep.mubr.msk.bf16.mxu1 %vm643_vm2, %v4537_v15  ;;  %v4539_v18 = vld [vmem:[%s5547_s12 + $0x90] sm:$0xff]   ;;  %v4528_v20 = vld [vmem:[%s5547_s12 + $0x38] sm:$0xff]   ;;  %v4541_v22 = vld [vmem:[%s5547_s12 + $0xa0] sm:$0xff]  }
  0x1c   : > { %4119 = vmatmul.mubr.msk.bf16.vlgmr.msra.gmra.mrb[0].mxu1 %vm643_vm2, %v4538_v17  ;;  %v4540_v21 = vld [vmem:[%s5547_s12 + $0x98] sm:$0xff]   ;;  %v4529_v23 = vld [vmem:[%s5547_s12 + $0x40] sm:$0xff]   ;;  %v4530_v26 = vld [vmem:[%s5547_s12 + $0x48] sm:$0xff]   ;;  %4231 = vmatpush3.bf16.msra.mxu0 %v4561_v0 }
  0x1d   : > { %4122 = vmatprep.mubr.msk.bf16.mxu1 %vm643_vm2, %v4539_v18  ;;  %4151 = vmatpush3.bf16.msra.mxu1 %v4553_v7  ;;  %v4542_v27 = vld [vmem:[%s5547_s12 + $0xa8] sm:$0xff]   ;;  %v4531_v28 = vld [vmem:[%s5547_s12 + $0x50] sm:$0xff]   ;;  %v4544_v31 = vld [vmem:[%s5547_s12 + $0xb8] sm:$0xff]  }
  0x1e   : > { %4152 = vmatprep.subr.bf16.mxu1 %v4554_v16  ;;  %v4543_v29 = vld [vmem:[%s5547_s12 + $0xb0] sm:$0xff]   ;;  %v4532_v32 = vld [vmem:[%s5547_s12 + $0x58] sm:$0xff]   ;;  %v4545_v33 = vld [vmem:[%s5547_s12 + $0xc0] sm:$0xff]   ;;  %4232 = vmatprep.subr.bf16.mxu0 %v4562_v1 }
  0x1f   : > { %v4533_v34 = vld [vmem:[%s5547_s12 + $0x60] sm:$0xff]   ;;  %v4546_v35 = vld [vmem:[%s5547_s12 + $0xc8] sm:$0xff]   ;;  %v4547_v37 = vld [vmem:[%s5547_s12 + $0xd0] sm:$0xff]  }
  0x20   : > { %v4534_v36 = vld [vmem:[%s5547_s12 + $0x68] sm:$0xff]   ;;  %v4535_v38 = vld [vmem:[%s5547_s12 + $0x70] sm:$0xff]   ;;  %v4548_v39 = vld [vmem:[%s5547_s12 + $0xd8] sm:$0xff]   ;;  %4233 = vmatpush3.bf16.msra.mxu0 %v4562_v1 }
  0x21   : > { %4153 = vmatpush3.bf16.msra.mxu1 %v4554_v16  ;;  %v4536_v40 = vld [vmem:[%s5547_s12 + $0x78] sm:$0xff]   ;;  %v4549_v41 = vld [vmem:[%s5547_s12 + $0xe0] sm:$0xff]   ;;  %v4550_v42 = vld [vmem:[%s5547_s12 + $0xe8] sm:$0xff]  }
  0x22   : > { %4091 = vmatmul.mubr.msk.bf16.gmra.mrb[4].mxu0 %vm643_vm2, %v4524_v11  ;;  %4154 = vmatprep.subr.bf16.mxu1 %v4555_v19  ;;  %v4551_v43 = vld [vmem:[%s5547_s12 + $0xf0] sm:$0xff]   ;;  %v4552_v44 = vld [vmem:[%s5547_s12 + $0xf8] sm:$0xff]   ;;  %s5420_s12 = smov [#allocation2]  }
  0x23   : > { %4094 = vmatprep.mubr.msk.bf16.mxu0 %vm643_vm2, %v4525_v12  ;;  %v4563_v11 = vld [vmem:[%s6261_s5 + $0x10] sm:$0xff]   ;;  %s5359_s29 = sshll.u32 %s5420_s12, 4  ;;  %s5360_s29 = int_to_ptr.vmem [resolvable:$false] %s5359_s29 }
  0x24   : > { %4123 = vmatmul.mubr.msk.bf16.gmra.mrb[4].mxu1 %vm643_vm2, %v4540_v21  ;;  %4234 = vmatprep.subr.bf16.mxu0 %v4563_v11  ;;  %s5361_s13 = scalar_lea.vmem %s5360_s29, 16384  ;;  %p5362_p0 = scmp.lt.s32.totalorder %s6207_s14, %s5360_s29 }
  0x25   : > { %4126 = vmatprep.mubr.msk.bf16.mxu1 %vm643_vm2, %v4541_v22  ;;  %4155 = vmatpush3.bf16.msra.mxu1 %v4555_v19  ;;  %p5363_p1 = scmp.lt.s32.totalorder %s5361_s13, %s5355_s25 }
  0x26   : > { %4156 = vmatprep.subr.bf16.mxu1 %v4556_v24  ;;  %4235 = vmatpush3.bf16.msra.mxu0 %v4563_v11 }
  0x27   : > { %p5364_p2 = por %p5363_p1, %p5362_p0 }
  0x29   : > { %4157 = vmatpush3.bf16.msra.mxu1 %v4556_v24  ;;  %v4564_v24 = vld [vmem:[%s6261_s5 + $0x18] sm:$0xff]   ;;  %p5365_p3 = pnand %p5364_p2, %p5358_p13 }
  0x2a   : > { %4095 = vmatmul.mubr.msk.bf16.gmra.mrb[8].mxu0 %vm643_vm2, %v4526_v13  ;;  %4158 = vmatprep.subr.bf16.mxu1 %v4557_v25 }
  0x2b   : > { %4098 = vmatprep.mubr.msk.bf16.mxu0 %vm643_vm2, %v4527_v14  ;;  %4236 = vmatprep.subr.bf16.mxu0 %v4564_v24 }
  0x2c   : > { %4127 = vmatmul.mubr.msk.bf16.gmra.mrb[8].mxu1 %vm643_vm2, %v4542_v27  ;;  %4237 = vmatpush3.bf16.msra.mxu0 %v4564_v24 }
  0x2d   : > { %4130 = vmatprep.mubr.msk.bf16.mxu1 %vm643_vm2, %v4543_v29  ;;  %4159 = vmatpush3.bf16.msra.mxu1 %v4557_v25 }
  0x2e   : > { %4160 = vmatprep.subr.bf16.mxu1 %v4558_v30 }
  0x31   : > { %4161 = vmatpush3.bf16.msra.mxu1 %v4558_v30 }
  0x32   : > { %4099 = vmatmul.mubr.msk.bf16.gmra.mrb[12].mxu0 %vm643_vm2, %v4528_v20  ;;  %4162 = vmatprep.subr.bf16.mxu1 %v4559_v45 }
  0x33   : > { %4102 = vmatprep.mubr.msk.bf16.mxu0 %vm643_vm2, %v4529_v23 }
  0x34   : > { %4131 = vmatmul.mubr.msk.bf16.gmra.mrb[12].mxu1 %vm643_vm2, %v4544_v31 }
  0x35   : > { %4134 = vmatprep.mubr.msk.bf16.mxu1 %vm643_vm2, %v4545_v33  ;;  %4163 = vmatpush3.bf16.msra.mxu1 %v4559_v45 }
  0x36   : > { %4164 = vmatprep.subr.bf16.mxu1 %v4560_v46 }
  0x39   : > { %4165 = vmatpush3.bf16.msra.mxu1 %v4560_v46 }
  0x3a   : > { %4103 = vmatmul.mubr.msk.bf16.gmra.mrb[16].mxu0 %vm643_vm2, %v4530_v26 }
  0x3b   : > { %4106 = vmatprep.mubr.msk.bf16.mxu0 %vm643_vm2, %v4531_v28 }
  0x3c   : > { %4135 = vmatmul.mubr.msk.bf16.gmra.mrb[16].mxu1 %vm643_vm2, %v4546_v35  ;;  %v4565_v35 = vld [vmem:[%s6261_s5 + $0x20] sm:$0xff]  }
  0x3d   : > { %4138 = vmatprep.mubr.msk.bf16.mxu1 %vm643_vm2, %v4547_v37  ;;  %4238 = vmatprep.subr.bf16.mxu0 %v4565_v35 }
  0x3e   : > { %4239 = vmatpush3.bf16.msra.mxu0 %v4565_v35 }
  0x42   : > { %4107 = vmatmul.mubr.msk.bf16.gmra.mrb[20].mxu0 %vm643_vm2, %v4532_v32 }
  0x43   : > { %4110 = vmatprep.mubr.msk.bf16.mxu0 %vm643_vm2, %v4533_v34 }
  0x44   : > { %4139 = vmatmul.mubr.msk.bf16.gmra.mrb[20].mxu1 %vm643_vm2, %v4548_v39 }
  0x45   : > { %4142 = vmatprep.mubr.msk.bf16.mxu1 %vm643_vm2, %v4549_v41 }
  0x4a   : > { %4111 = vmatmul.mubr.msk.bf16.gmra.mrb[24].mxu0 %vm643_vm2, %v4534_v36 }
  0x4b   : > { %4114 = vmatprep.mubr.msk.bf16.mxu0 %vm643_vm2, %v4535_v38 }
  0x4c   : > { %4143 = vmatmul.mubr.msk.bf16.gmra.mrb[24].mxu1 %vm643_vm2, %v4550_v42 }
  0x4d   : > { %4146 = vmatprep.mubr.msk.bf16.mxu1 %vm643_vm2, %v4551_v43 }
  0x52   : > { %4115 = vmatmul.mubr.msk.bf16.gmra.mrb[28].mxu0 %vm643_vm2, %v4536_v40 }
  0x54   : > { %4147 = vmatmul.mubr.msk.bf16.gmra.mrb[28].mxu1 %vm643_vm2, %v4552_v44 }
  0xed   : > { %v4088_v48 = vpop.f32.mrb[0].mxu0 }
  0xee   : > { %v790_v49 = vadd.f32 %v4088_v48, %v5637_v47  ;;  %v781_v50 = vpop.f32.mrb[1].mxu0 }
  0xef   : > { %v782_v51 = vadd.f32 %v5637_v47, %v781_v50  ;;  %v4089_v52 = vpop.f32.mrb[2].mxu0  ;;  %v4120_v5 = vpop.f32.mrb[0].mxu1  ;;  %v4566_v50 = vld [vmem:[%s6261_s5 + $0x28] sm:$0xff]  }
  0xf0   : > { %4585 = vtanh.f32 %v790_v49  ;;  %v793_v53 = vadd.f32 %v4089_v52, %v5637_v47  ;;  %v784_v54 = vpop.f32.mrb[3].mxu0  ;;  %v918_v9 = vadd.f32 %v4120_v5, %v5637_v47  ;;  %v909_v10 = vpop.f32.mrb[1].mxu1  ;;  %4240 = vmatprep.subr.bf16.mxu0 %v4566_v50 }
  0xf1   : > { %4587 = vtanh.f32 %v782_v51  ;;  %v785_v55 = vadd.f32 %v5637_v47, %v784_v54  ;;  %v4121_v15 = vpop.f32.mrb[2].mxu1  ;;  %v910_v21 = vadd.f32 %v5637_v47, %v909_v10  ;;  %4241 = vmatpush3.bf16.msra.mxu0 %v4566_v50 }
  0xf2   : > { %4589 = vtanh.f32 %v793_v53  ;;  %v912_v18 = vpop.f32.mrb[3].mxu1  ;;  %v921_v23 = vadd.f32 %v4121_v15, %v5637_v47 }
  0xf3   : > { %4591 = vtanh.f32 %v785_v55  ;;  %v913_v26 = vadd.f32 %v5637_v47, %v912_v18 }
  0xf5   : > { %v4092_v56 = vpop.f32.mrb[4].mxu0 }
  0xf6   : > { %v806_v57 = vadd.f32 %v4092_v56, %v5637_v47  ;;  %v797_v58 = vpop.f32.mrb[5].mxu0 }
  0xf7   : > { %v798_v59 = vadd.f32 %v5637_v47, %v797_v58  ;;  %v4093_v60 = vpop.f32.mrb[6].mxu0  ;;  %v4124_v29 = vpop.f32.mrb[4].mxu1 }
  0xf8   : > { %4593 = vtanh.f32 %v806_v57  ;;  %v809_v61 = vadd.f32 %v4093_v60, %v5637_v47  ;;  %v800_v62 = vpop.f32.mrb[7].mxu0  ;;  %v934_v33 = vadd.f32 %v4124_v29, %v5637_v47  ;;  %v925_v34 = vpop.f32.mrb[5].mxu1 }
  0xf9   : > { %4595 = vtanh.f32 %v798_v59  ;;  %v801_v63 = vadd.f32 %v5637_v47, %v800_v62  ;;  %v4125_v39 = vpop.f32.mrb[6].mxu1  ;;  %v926_v45 = vadd.f32 %v5637_v47, %v925_v34 }
  0xfa   : > { %v4586_v2 = vpop.eup %4585  ;;  %4597 = vtanh.f32 %v809_v61  ;;  %v928_v42 = vpop.f32.mrb[7].mxu1  ;;  %v937_v49 = vadd.f32 %v4125_v39, %v5637_v47 }
  0xfb   : > { %v4588_v3 = vpop.eup %4587  ;;  %4599 = vtanh.f32 %v801_v63  ;;  %v929_v52 = vadd.f32 %v5637_v47, %v928_v42 }
  0xfc   : > { %v4590_v4 = vpop.eup %4589  ;;  %4601 = vtanh.f32 %v918_v9 }
  0xfd   : > { %v4592_v6 = vpop.eup %4591  ;;  %v4096_v7 = vpop.f32.mrb[8].mxu0  ;;  %v1101_v8 = vpack.c.bf16 %v4590_v4, %v4586_v2 }
  0xfe   : > { %v822_v12 = vadd.f32 %v4096_v7, %v5637_v47  ;;  %v813_v13 = vpop.f32.mrb[9].mxu0  ;;  %v1100_v14 = vpack.c.bf16 %v4592_v6, %v4588_v3 }
  0xff   : > { %v814_v16 = vadd.f32 %v5637_v47, %v813_v13  ;;  %v4097_v17 = vpop.f32.mrb[10].mxu0  ;;  %v4128_v55 = vpop.f32.mrb[8].mxu1 }
 0x100   : > { %4603 = vtanh.f32 %v822_v12  ;;  %v825_v19 = vadd.f32 %v4097_v17, %v5637_v47  ;;  %v816_v20 = vpop.f32.mrb[11].mxu0  ;;  %4166 = vmatprep.mubr.bf16.mxu1 %v1100_v14  ;;  %v950_v59 = vadd.f32 %v4128_v55, %v5637_v47  ;;  %v941_v60 = vpop.f32.mrb[9].mxu1 }
 0x101   : > { %4605 = vtanh.f32 %v814_v16  ;;  %v817_v22 = vadd.f32 %v5637_v47, %v816_v20  ;;  %4167 = vmatmul.mubr.bf16.vlgmr.msra.gmra.mrb[32].mxu1 %v1101_v8  ;;  %v4129_v1 = vpop.f32.mrb[10].mxu1  ;;  %v942_v9 = vadd.f32 %v5637_v47, %v941_v60 }
 0x102   : > { %v4594_v25 = vpop.eup %4593  ;;  %4607 = vtanh.f32 %v825_v19  ;;  %v944_v5 = vpop.f32.mrb[11].mxu1  ;;  %v953_v13 = vadd.f32 %v4129_v1, %v5637_v47 }
 0x103   : > { %v4596_v27 = vpop.eup %4595  ;;  %4609 = vtanh.f32 %v817_v22  ;;  %v945_v16 = vadd.f32 %v5637_v47, %v944_v5 }
 0x104   : > { %v4598_v28 = vpop.eup %4597  ;;  %4611 = vtanh.f32 %v910_v21 }
 0x105   : > { %v4600_v30 = vpop.eup %4599  ;;  %v4100_v31 = vpop.f32.mrb[12].mxu0  ;;  %v1103_v32 = vpack.c.bf16 %v4598_v28, %v4594_v25  ;;  %4613 = vtanh.f32 %v921_v23 }
 0x106   : > { %v838_v36 = vadd.f32 %v4100_v31, %v5637_v47  ;;  %v829_v37 = vpop.f32.mrb[13].mxu0  ;;  %v1102_v38 = vpack.c.bf16 %v4600_v30, %v4596_v27  ;;  %4615 = vtanh.f32 %v913_v26  ;;  %v5675_v46 = vpop.eup %4601 }
 0x107   : > { %v830_v40 = vadd.f32 %v5637_v47, %v829_v37  ;;  %v4101_v41 = vpop.f32.mrb[14].mxu0  ;;  %4617 = vtanh.f32 %v934_v33  ;;  %v4132_v19 = vpop.f32.mrb[12].mxu1 }
 0x108   : > { %4619 = vtanh.f32 %v838_v36  ;;  %v841_v43 = vadd.f32 %v4101_v41, %v5637_v47  ;;  %v832_v44 = vpop.f32.mrb[15].mxu0  ;;  %4170 = vmatprep.mubr.bf16.mxu1 %v1102_v38  ;;  %v966_v23 = vadd.f32 %v4132_v19, %v5637_v47  ;;  %v957_v24 = vpop.f32.mrb[13].mxu1 }
 0x109   : > { %4621 = vtanh.f32 %v830_v40  ;;  %v833_v48 = vadd.f32 %v5637_v47, %v832_v44  ;;  %4171 = vmatmul.mubr.bf16.gmra.mrb[36].mxu1 %v1103_v32  ;;  %v4133_v29 = vpop.f32.mrb[14].mxu1  ;;  %v958_v37 = vadd.f32 %v5637_v47, %v957_v24 }
 0x10a   : > { %v4604_v51 = vpop.eup %4603  ;;  %4623 = vtanh.f32 %v841_v43  ;;  %v960_v33 = vpop.f32.mrb[15].mxu1  ;;  %v969_v41 = vadd.f32 %v4133_v29, %v5637_v47 }
 0x10b   : > { %v4606_v53 = vpop.eup %4605  ;;  %4625 = vtanh.f32 %v833_v48  ;;  %v961_v44 = vadd.f32 %v5637_v47, %v960_v33 }
 0x10c   : > { %v4608_v54 = vpop.eup %4607  ;;  %4627 = vtanh.f32 %v926_v45 }
 0x10d   : > { %v4610_v56 = vpop.eup %4609  ;;  %v4104_v57 = vpop.f32.mrb[16].mxu0  ;;  %v1105_v58 = vpack.c.bf16 %v4608_v54, %v4604_v51  ;;  %4629 = vtanh.f32 %v937_v49 }
 0x10e   : > { %v5684_v61 = vpop.eup %4611  ;;  %v854_v62 = vadd.f32 %v4104_v57, %v5637_v47  ;;  %v845_v63 = vpop.f32.mrb[17].mxu0  ;;  %v1104_v0 = vpack.c.bf16 %v4610_v56, %v4606_v53  ;;  %4631 = vtanh.f32 %v929_v52 }
 0x10f   : > { %v5687_v2 = vpop.eup %4613  ;;  %v846_v3 = vadd.f32 %v5637_v47, %v845_v63  ;;  %v4105_v4 = vpop.f32.mrb[18].mxu0  ;;  %4633 = vtanh.f32 %v950_v59 }
 0x110   : > { %v5690_v6 = vpop.eup %4615  ;;  %4635 = vtanh.f32 %v854_v62  ;;  %v857_v7 = vadd.f32 %v4105_v4, %v5637_v47  ;;  %v848_v8 = vpop.f32.mrb[19].mxu0  ;;  %4174 = vmatprep.mubr.bf16.mxu1 %v1104_v0  ;;  %v1117_v10 = vpack.c.bf16 %v5687_v2, %v5675_v46  ;;  %v4567_v46 = vld [vmem:[%s6261_s5 + $0x30] sm:$0xff]   ;;  %v4568_v2 = vld [vmem:[%s6261_s5 + $0x38] sm:$0xff]  }
 0x111   : > { %v5696_v11 = vpop.eup %4617  ;;  %4637 = vtanh.f32 %v846_v3  ;;  %v849_v12 = vadd.f32 %v5637_v47, %v848_v8  ;;  %4175 = vmatmul.mubr.bf16.gmra.mrb[40].mxu1 %v1105_v58  ;;  %v1116_v14 = vpack.c.bf16 %v5690_v6, %v5684_v61  ;;  %v4136_v49 = vpop.f32.mrb[16].mxu1  ;;  %4242 = vmatprep.subr.bf16.mxu0 %v4567_v46  ;;  %v5811_v6 = vld [vmem:[%s6260_s4] ss:$0 sm:$0xff] }
 0x112   : > { %v4620_v15 = vpop.eup %4619  ;;  %4639 = vtanh.f32 %v857_v7  ;;  %v982_v53 = vadd.f32 %v4136_v49, %v5637_v47  ;;  %v973_v54 = vpop.f32.mrb[17].mxu1  ;;  %4243 = vmatpush3.bf16.msra.mxu0 %v4567_v46 }
 0x113   : > { %v4622_v17 = vpop.eup %4621  ;;  %4641 = vtanh.f32 %v849_v12  ;;  %v4137_v59 = vpop.f32.mrb[18].mxu1  ;;  %v974_v5 = vadd.f32 %v5637_v47, %v973_v54  ;;  %4244 = vmatprep.subr.bf16.mxu0 %v4568_v2 }
 0x114   : > { %v4624_v18 = vpop.eup %4623  ;;  %4643 = vtanh.f32 %v942_v9  ;;  %v976_v0 = vpop.f32.mrb[19].mxu1  ;;  %v985_v12 = vadd.f32 %v4137_v59, %v5637_v47 }
 0x115   : > { %v4626_v20 = vpop.eup %4625  ;;  %v4108_v21 = vpop.f32.mrb[20].mxu0  ;;  %v1107_v22 = vpack.c.bf16 %v4624_v18, %v4620_v15  ;;  %4645 = vtanh.f32 %v953_v13 }
 0x116   : > { %v5704_v25 = vpop.eup %4627  ;;  %v870_v26 = vadd.f32 %v4108_v21, %v5637_v47  ;;  %v861_v27 = vpop.f32.mrb[21].mxu0  ;;  %v1106_v28 = vpack.c.bf16 %v4626_v20, %v4622_v17  ;;  %4647 = vtanh.f32 %v945_v16  ;;  %v977_v16 = vadd.f32 %v5637_v47, %v976_v0  ;;  %4245 = vmatpush3.bf16.msra.mxu0 %v4568_v2 }
 0x117   : > { %v5707_v30 = vpop.eup %4629  ;;  %v862_v31 = vadd.f32 %v5637_v47, %v861_v27  ;;  %v4109_v32 = vpop.f32.mrb[22].mxu0  ;;  %4649 = vtanh.f32 %v966_v23 }
 0x118   : > { %v5710_v34 = vpop.eup %4631  ;;  %4651 = vtanh.f32 %v870_v26  ;;  %v873_v35 = vadd.f32 %v4109_v32, %v5637_v47  ;;  %v864_v36 = vpop.f32.mrb[23].mxu0  ;;  %4178 = vmatprep.mubr.bf16.mxu1 %v1106_v28  ;;  %v1119_v38 = vpack.c.bf16 %v5707_v30, %v5696_v11 }
 0x119   : > { %v5716_v39 = vpop.eup %4633  ;;  %4653 = vtanh.f32 %v862_v31  ;;  %v865_v40 = vadd.f32 %v5637_v47, %v864_v36  ;;  %4179 = vmatmul.mubr.bf16.gmra.mrb[44].mxu1 %v1107_v22  ;;  %v1118_v42 = vpack.c.bf16 %v5710_v34, %v5704_v25  ;;  %v4140_v19 = vpop.f32.mrb[20].mxu1 }
 0x11a   : > { %v4636_v43 = vpop.eup %4635  ;;  %4655 = vtanh.f32 %v873_v35  ;;  %v998_v23 = vadd.f32 %v4140_v19, %v5637_v47  ;;  %v989_v24 = vpop.f32.mrb[21].mxu1 }
 0x11b   : > { %v4638_v45 = vpop.eup %4637  ;;  %4657 = vtanh.f32 %v865_v40  ;;  %v4141_v31 = vpop.f32.mrb[22].mxu1 }
 0x11c   : > { %v4640_v48 = vpop.eup %4639  ;;  %4659 = vtanh.f32 %v958_v37  ;;  %v992_v36 = vpop.f32.mrb[23].mxu1  ;;  %v1001_v49 = vadd.f32 %v4141_v31, %v5637_v47 }
 0x11d   : > { %v4642_v50 = vpop.eup %4641  ;;  %v4112_v51 = vpop.f32.mrb[24].mxu0  ;;  %v1109_v52 = vpack.c.bf16 %v4640_v48, %v4636_v43  ;;  %4661 = vtanh.f32 %v969_v41  ;;  %v990_v43 = vadd.f32 %v5637_v47, %v989_v24 }
 0x11e   : > { %v5724_v55 = vpop.eup %4643  ;;  %v886_v56 = vadd.f32 %v4112_v51, %v5637_v47  ;;  %v877_v57 = vpop.f32.mrb[25].mxu0  ;;  %v1108_v58 = vpack.c.bf16 %v4642_v50, %v4638_v45  ;;  %4663 = vtanh.f32 %v961_v44 }
 0x11f   : > { %v5727_v60 = vpop.eup %4645  ;;  %v878_v62 = vadd.f32 %v5637_v47, %v877_v57  ;;  %v4113_v63 = vpop.f32.mrb[26].mxu0  ;;  %4665 = vtanh.f32 %v982_v53 }
 0x120   : > { %v5730_v1 = vpop.eup %4647  ;;  %4667 = vtanh.f32 %v886_v56  ;;  %v889_v3 = vadd.f32 %v4113_v63, %v5637_v47  ;;  %v880_v4 = vpop.f32.mrb[27].mxu0  ;;  %4182 = vmatprep.mubr.bf16.mxu1 %v1108_v58  ;;  %v1121_v7 = vpack.c.bf16 %v5727_v60, %v5716_v39 }
 0x121   : > { %v5736_v8 = vpop.eup %4649  ;;  %4669 = vtanh.f32 %v878_v62  ;;  %v881_v9 = vadd.f32 %v5637_v47, %v880_v4  ;;  %4183 = vmatmul.mubr.bf16.gmra.mrb[48].mxu1 %v1109_v52  ;;  %v1120_v13 = vpack.c.bf16 %v5730_v1, %v5724_v55  ;;  %v993_v52 = vadd.f32 %v5637_v47, %v992_v36  ;;  %v4144_v56 = vpop.f32.mrb[24].mxu1 }
 0x122   : > { %v4652_v15 = vpop.eup %4651  ;;  %4671 = vtanh.f32 %v889_v3  ;;  %v1014_v59 = vadd.f32 %v4144_v56, %v5637_v47  ;;  %v1005_v62 = vpop.f32.mrb[25].mxu1 }
 0x123   : > { %v4654_v17 = vpop.eup %4653  ;;  %4673 = vtanh.f32 %v881_v9  ;;  %v1006_v3 = vadd.f32 %v5637_v47, %v1005_v62  ;;  %v4145_v4 = vpop.f32.mrb[26].mxu1 }
 0x124   : > { %v4656_v18 = vpop.eup %4655  ;;  %4675 = vtanh.f32 %v974_v5  ;;  %v1017_v9 = vadd.f32 %v4145_v4, %v5637_v47 }
 0x125   : > { %v4658_v20 = vpop.eup %4657  ;;  %v4116_v21 = vpop.f32.mrb[28].mxu0  ;;  %v1111_v22 = vpack.c.bf16 %v4656_v18, %v4652_v15  ;;  %4677 = vtanh.f32 %v985_v12 }
 0x126   : > { %v5744_v26 = vpop.eup %4659  ;;  %v902_v27 = vadd.f32 %v4116_v21, %v5637_v47  ;;  %v893_v28 = vpop.f32.mrb[29].mxu0  ;;  %v1110_v29 = vpack.c.bf16 %v4658_v20, %v4654_v17  ;;  %4679 = vtanh.f32 %v977_v16 }
 0x127   : > { %v5747_v32 = vpop.eup %4661  ;;  %v894_v33 = vadd.f32 %v5637_v47, %v893_v28  ;;  %v4117_v35 = vpop.f32.mrb[30].mxu0  ;;  %4681 = vtanh.f32 %v998_v23 }
 0x128   : > { %v5750_v37 = vpop.eup %4663  ;;  %4683 = vtanh.f32 %v902_v27  ;;  %v905_v40 = vadd.f32 %v4117_v35, %v5637_v47  ;;  %v896_v41 = vpop.f32.mrb[31].mxu0  ;;  %4186 = vmatprep.mubr.bf16.mxu1 %v1110_v29  ;;  %v1123_v44 = vpack.c.bf16 %v5747_v32, %v5736_v8 }
 0x129   : > { %v5756_v45 = vpop.eup %4665  ;;  %4685 = vtanh.f32 %v894_v33  ;;  %v897_v48 = vadd.f32 %v5637_v47, %v896_v41  ;;  %4187 = vmatmul.mubr.bf16.gmra.mrb[52].mxu1 %v1111_v22  ;;  %v1122_v50 = vpack.c.bf16 %v5750_v37, %v5744_v26  ;;  %v1008_v12 = vpop.f32.mrb[27].mxu1  ;;  %v4570_v37 = vld [vmem:[%s6263_s7 + $0x8] sm:$0xff]  }
 0x12a   : > { %v4668_v51 = vpop.eup %4667  ;;  %4687 = vtanh.f32 %v905_v40  ;;  %v1009_v16 = vadd.f32 %v5637_v47, %v1008_v12  ;;  %v4148_v23 = vpop.f32.mrb[28].mxu1 }
 0x12b   : > { %v4670_v53 = vpop.eup %4669  ;;  %4689 = vtanh.f32 %v897_v48  ;;  %v1030_v28 = vadd.f32 %v4148_v23, %v5637_v47  ;;  %v1021_v29 = vpop.f32.mrb[29].mxu1 }
 0x12c   : > { %v4672_v54 = vpop.eup %4671  ;;  %4691 = vtanh.f32 %v990_v43  ;;  %v1022_v35 = vadd.f32 %v5637_v47, %v1021_v29  ;;  %v4149_v36 = vpop.f32.mrb[30].mxu1 }
 0x12d   : > { %v4674_v57 = vpop.eup %4673  ;;  %v1113_v58 = vpack.c.bf16 %v4672_v54, %v4668_v51  ;;  %4693 = vtanh.f32 %v1001_v49  ;;  %v1033_v41 = vadd.f32 %v4149_v36, %v5637_v47  ;;  %v1024_v43 = vpop.f32.mrb[31].mxu1  ;;  %v4574_v36 = vld [vmem:[%s6263_s7 + $0x28] sm:$0xff]  }
 0x12e   : > { %v5764_v63 = vpop.eup %4675  ;;  %v1112_v0 = vpack.c.bf16 %v4674_v57, %v4670_v53  ;;  %4695 = vtanh.f32 %v993_v52  ;;  %v1025_v48 = vadd.f32 %v5637_v47, %v1024_v43 }
 0x12f   : > { %v5767_v5 = vpop.eup %4677  ;;  %4697 = vtanh.f32 %v1014_v59 }
 0x130   : > { %v4680_v15 = vpop.eup %4679  ;;  %4190 = vmatprep.mubr.bf16.mxu1 %v1112_v0  ;;  %4699 = vtanh.f32 %v1006_v3  ;;  %v1125_v17 = vpack.c.bf16 %v5767_v5, %v5756_v45 }
 0x131   : > { %v4682_v18 = vpop.eup %4681  ;;  %4191 = vmatmul.mubr.bf16.gmra.mrb[56].mxu1 %v1113_v58  ;;  %4701 = vtanh.f32 %v1017_v9  ;;  %v1124_v19 = vpack.c.bf16 %v4680_v15, %v5764_v63  ;;  %v4572_v15 = vld [vmem:[%s6263_s7 + $0x18] sm:$0xff]  }
 0x132   : > { %v4684_v20 = vpop.eup %4683  ;;  %4703 = vtanh.f32 %v1009_v16 }
 0x133   : > { %v4686_v21 = vpop.eup %4685  ;;  %4705 = vtanh.f32 %v1030_v28 }
 0x134   : > { %v4688_v22 = vpop.eup %4687  ;;  %4707 = vtanh.f32 %v1022_v35 }
 0x135   : > { %v4690_v24 = vpop.eup %4689  ;;  %v1115_v27 = vpack.c.bf16 %v4688_v22, %v4684_v20  ;;  %4709 = vtanh.f32 %v1033_v41 }
 0x136   : > { %v4692_v31 = vpop.eup %4691  ;;  %v1114_v33 = vpack.c.bf16 %v4690_v24, %v4686_v21  ;;  %4711 = vtanh.f32 %v1025_v48  ;;  %v4573_v24 = vld [vmem:[%s6263_s7 + $0x20] sm:$0xff]  }
 0x137   : > { %v4694_v40 = vpop.eup %4693 }
 0x138   : > { %v4696_v45 = vpop.eup %4695  ;;  %4194 = vmatprep.mubr.bf16.mxu1 %v1114_v33  ;;  %v1127_v49 = vpack.c.bf16 %v4694_v40, %v4682_v18 }
 0x139   : > { %v4698_v51 = vpop.eup %4697  ;;  %4195 = vmatmul.mubr.bf16.gmra.mrb[60].mxu1 %v1115_v27  ;;  %v1126_v52 = vpack.c.bf16 %v4696_v45, %v4692_v31 }
 0x13a   : > { %v4700_v53 = vpop.eup %4699  ;;  %4198 = vmatprep.mubr.bf16.mxu1 %v1116_v14 }
 0x13b   : > { %v4702_v54 = vpop.eup %4701 }
 0x13c   : > { %v4704_v56 = vpop.eup %4703  ;;  %v1129_v57 = vpack.c.bf16 %v4702_v54, %v4698_v51 }
 0x13d   : > { %v1128_v58 = vpack.c.bf16 %v4704_v56, %v4700_v53  ;;  %v4706_v59 = vpop.eup %4705 }
 0x13e   : > { %v4708_v47 = vpop.eup %4707 }
 0x13f   : > { %v4710_v62 = vpop.eup %4709 }
 0x140   : > { %v4712_v63 = vpop.eup %4711  ;;  %v1131_v0 = vpack.c.bf16 %v4710_v62, %v4706_v59 }
 0x141   : > { %4199 = vmatmul.mubr.bf16.gmra.mrb[64].mxu1 %v1117_v10  ;;  %v1130_v61 = vpack.c.bf16 %v4712_v63, %v4708_v47 }
 0x142   : > { %4202 = vmatprep.mubr.bf16.mxu1 %v1118_v42  ;;  %v4569_v42 = vld [vmem:[%s6263_s7] sm:$0xff]  }
 0x143   : > { %4310 = vmatprep.subr.bf16.mxu1 %v4569_v42 }
 0x144   : > { %4311 = vmatpush3.bf16.msra.mxu1 %v4569_v42 }
 0x145   : > { %4312 = vmatprep.subr.bf16.mxu1 %v4570_v37 }
 0x148   : > { %4313 = vmatpush3.bf16.msra.mxu1 %v4570_v37 }
 0x149   : > { %4203 = vmatmul.mubr.bf16.gmra.mrb[68].mxu1 %v1119_v38 }
 0x14a   : > { %4206 = vmatprep.mubr.bf16.mxu1 %v1120_v13 }
 0x151   : > { %4207 = vmatmul.mubr.bf16.gmra.mrb[72].mxu1 %v1121_v7 }
 0x152   : > { %4210 = vmatprep.mubr.bf16.mxu1 %v1122_v50 }
 0x159   : > { %4211 = vmatmul.mubr.bf16.gmra.mrb[76].mxu1 %v1123_v44  ;;  %v4571_v44 = vld [vmem:[%s6263_s7 + $0x10] sm:$0xff]  }
 0x15a   : > { %4214 = vmatprep.mubr.bf16.mxu1 %v1124_v19  ;;  %4314 = vmatprep.subr.bf16.mxu1 %v4571_v44 }
 0x15b   : > { %4315 = vmatpush3.bf16.msra.mxu1 %v4571_v44 }
 0x15c   : > { %4316 = vmatprep.subr.bf16.mxu1 %v4572_v15 }
 0x15f   : > { %4317 = vmatpush3.bf16.msra.mxu1 %v4572_v15 }
 0x160   : > { %4318 = vmatprep.subr.bf16.mxu1 %v4573_v24 }
 0x161   : > { %4215 = vmatmul.mubr.bf16.gmra.mrb[80].mxu1 %v1125_v17 }
 0x162   : > { %4218 = vmatprep.mubr.bf16.mxu1 %v1126_v52 }
 0x163   : > { %4319 = vmatpush3.bf16.msra.mxu1 %v4573_v24 }
 0x164   : > { %4320 = vmatprep.subr.bf16.mxu1 %v4574_v36 }
 0x167   : > { %4321 = vmatpush3.bf16.msra.mxu1 %v4574_v36 }
 0x169   : > { %4219 = vmatmul.mubr.bf16.gmra.mrb[84].mxu1 %v1127_v49 }
 0x16a   : > { %4222 = vmatprep.mubr.bf16.mxu1 %v1128_v58 }
 0x171   : > { %4223 = vmatmul.mubr.bf16.gmra.mrb[88].mxu1 %v1129_v57 }
 0x172   : > { %4226 = vmatprep.mubr.bf16.mxu1 %v1130_v61 }
 0x179   : > { %4227 = vmatmul.mubr.bf16.gmra.mrb[92].mxu1 %v1131_v0 }
 0x1d4   : > { %v4168_v10 = vpop.f32.mrb[32].mxu1 }
 0x1d5   : > { %v1246_v11 = vadd.f32 %v4168_v10, %v5811_v6  ;;  %v1237_v14 = vpop.f32.mrb[33].mxu1 }
 0x1d6   : > { %v1238_v25 = vadd.f32 %v5811_v6, %v1237_v14  ;;  %v4169_v30 = vpop.f32.mrb[34].mxu1 }
 0x1d7   : > { %4713 = vtanh.f32 %v1246_v11  ;;  %v1249_v34 = vadd.f32 %v4169_v30, %v5811_v6  ;;  %v1240_v38 = vpop.f32.mrb[35].mxu1 }
 0x1d8   : > { %4715 = vtanh.f32 %v1238_v25  ;;  %v1241_v39 = vadd.f32 %v5811_v6, %v1240_v38 }
 0x1d9   : > { %4717 = vtanh.f32 %v1249_v34 }
 0x1da   : > { %4719 = vtanh.f32 %v1241_v39 }
 0x1dc   : > { %v4172_v55 = vpop.f32.mrb[36].mxu1 }
 0x1dd   : > { %v1262_v60 = vadd.f32 %v4172_v55, %v5811_v6  ;;  %v1253_v1 = vpop.f32.mrb[37].mxu1 }
 0x1de   : > { %v1254_v7 = vadd.f32 %v5811_v6, %v1253_v1  ;;  %v4173_v8 = vpop.f32.mrb[38].mxu1 }
 0x1df   : > { %4721 = vtanh.f32 %v1262_v60  ;;  %v1265_v13 = vadd.f32 %v4173_v8, %v5811_v6  ;;  %v1256_v26 = vpop.f32.mrb[39].mxu1 }
 0x1e0   : > { %4723 = vtanh.f32 %v1254_v7  ;;  %v1257_v32 = vadd.f32 %v5811_v6, %v1256_v26 }
 0x1e1   : > { %v4714_v50 = vpop.eup %4713  ;;  %4725 = vtanh.f32 %v1265_v13 }
 0x1e2   : > { %v4716_v3 = vpop.eup %4715  ;;  %4727 = vtanh.f32 %v1257_v32 }
 0x1e3   : > { %v4718_v4 = vpop.eup %4717 }
 0x1e4   : > { %v4720_v5 = vpop.eup %4719  ;;  %v4176_v9 = vpop.f32.mrb[40].mxu1  ;;  %v1557_v12 = vpack.c.bf16 %v4718_v4, %v4714_v50 }
 0x1e5   : > { %v1278_v16 = vadd.f32 %v4176_v9, %v5811_v6  ;;  %v1269_v17 = vpop.f32.mrb[41].mxu1  ;;  %v1556_v18 = vpack.c.bf16 %v4720_v5, %v4716_v3 }
 0x1e6   : > { %v1270_v19 = vadd.f32 %v5811_v6, %v1269_v17  ;;  %v4177_v20 = vpop.f32.mrb[42].mxu1 }
 0x1e7   : > { %4729 = vtanh.f32 %v1278_v16  ;;  %v1281_v21 = vadd.f32 %v4177_v20, %v5811_v6  ;;  %v1272_v22 = vpop.f32.mrb[43].mxu1  ;;  %4246 = vmatprep.mubr.bf16.mxu0 %v1556_v18 }
 0x1e8   : > { %4731 = vtanh.f32 %v1270_v19  ;;  %v1273_v23 = vadd.f32 %v5811_v6, %v1272_v22  ;;  %4247 = vmatmul.mubr.bf16.vlgmr.msra.gmra.mrb[32].mxu0 %v1557_v12 }
 0x1e9   : > { %v4722_v27 = vpop.eup %4721  ;;  %4733 = vtanh.f32 %v1281_v21 }
 0x1ea   : > { %v4724_v28 = vpop.eup %4723  ;;  %4735 = vtanh.f32 %v1273_v23 }
 0x1eb   : > { %v4726_v29 = vpop.eup %4725 }
 0x1ec   : > { %v4728_v31 = vpop.eup %4727  ;;  %v4180_v33 = vpop.f32.mrb[44].mxu1  ;;  %v1559_v35 = vpack.c.bf16 %v4726_v29, %v4722_v27 }
 0x1ed   : > { %v1294_v40 = vadd.f32 %v4180_v33, %v5811_v6  ;;  %v1285_v41 = vpop.f32.mrb[45].mxu1  ;;  %v1558_v43 = vpack.c.bf16 %v4728_v31, %v4724_v28 }
 0x1ee   : > { %v1286_v45 = vadd.f32 %v5811_v6, %v1285_v41  ;;  %v4181_v48 = vpop.f32.mrb[46].mxu1 }
 0x1ef   : > { %4737 = vtanh.f32 %v1294_v40  ;;  %v1297_v49 = vadd.f32 %v4181_v48, %v5811_v6  ;;  %v1288_v51 = vpop.f32.mrb[47].mxu1  ;;  %4250 = vmatprep.mubr.bf16.mxu0 %v1558_v43 }
 0x1f0   : > { %4739 = vtanh.f32 %v1286_v45  ;;  %v1289_v52 = vadd.f32 %v5811_v6, %v1288_v51  ;;  %4251 = vmatmul.mubr.bf16.gmra.mrb[36].mxu0 %v1559_v35 }
 0x1f1   : > { %v4730_v53 = vpop.eup %4729  ;;  %4741 = vtanh.f32 %v1297_v49 }
 0x1f2   : > { %v4732_v54 = vpop.eup %4731  ;;  %4743 = vtanh.f32 %v1289_v52 }
 0x1f3   : > { %v4734_v56 = vpop.eup %4733 }
 0x1f4   : > { %v4736_v57 = vpop.eup %4735  ;;  %v4184_v58 = vpop.f32.mrb[48].mxu1  ;;  %v1561_v59 = vpack.c.bf16 %v4734_v56, %v4730_v53 }
 0x1f5   : > { %v1310_v47 = vadd.f32 %v4184_v58, %v5811_v6  ;;  %v1301_v62 = vpop.f32.mrb[49].mxu1  ;;  %v1560_v63 = vpack.c.bf16 %v4736_v57, %v4732_v54 }
 0x1f6   : > { %v1302_v0 = vadd.f32 %v5811_v6, %v1301_v62  ;;  %v4185_v61 = vpop.f32.mrb[50].mxu1 }
 0x1f7   : > { %4745 = vtanh.f32 %v1310_v47  ;;  %v1313_v46 = vadd.f32 %v4185_v61, %v5811_v6  ;;  %v1304_v2 = vpop.f32.mrb[51].mxu1  ;;  %4254 = vmatprep.mubr.bf16.mxu0 %v1560_v63 }
 0x1f8   : > { %4747 = vtanh.f32 %v1302_v0  ;;  %v1305_v10 = vadd.f32 %v5811_v6, %v1304_v2  ;;  %4255 = vmatmul.mubr.bf16.gmra.mrb[40].mxu0 %v1561_v59 }
 0x1f9   : > { %v4738_v11 = vpop.eup %4737  ;;  %4749 = vtanh.f32 %v1313_v46 }
 0x1fa   : > { %v4740_v14 = vpop.eup %4739  ;;  %4751 = vtanh.f32 %v1305_v10 }
 0x1fb   : > { %v4742_v25 = vpop.eup %4741 }
 0x1fc   : > { %v4744_v30 = vpop.eup %4743  ;;  %v4188_v34 = vpop.f32.mrb[52].mxu1  ;;  %v1563_v38 = vpack.c.bf16 %v4742_v25, %v4738_v11 }
 0x1fd   : > { %v1326_v39 = vadd.f32 %v4188_v34, %v5811_v6  ;;  %v1317_v42 = vpop.f32.mrb[53].mxu1  ;;  %v1562_v55 = vpack.c.bf16 %v4744_v30, %v4740_v14 }
 0x1fe   : > { %v1318_v60 = vadd.f32 %v5811_v6, %v1317_v42  ;;  %v4189_v1 = vpop.f32.mrb[54].mxu1 }
 0x1ff   : > { %4753 = vtanh.f32 %v1326_v39  ;;  %v1329_v7 = vadd.f32 %v4189_v1, %v5811_v6  ;;  %v1320_v8 = vpop.f32.mrb[55].mxu1  ;;  %4258 = vmatprep.mubr.bf16.mxu0 %v1562_v55 }
 0x200   : > { %4755 = vtanh.f32 %v1318_v60  ;;  %v1321_v13 = vadd.f32 %v5811_v6, %v1320_v8  ;;  %4259 = vmatmul.mubr.bf16.gmra.mrb[44].mxu0 %v1563_v38 }
 0x201   : > { %v4746_v26 = vpop.eup %4745  ;;  %4757 = vtanh.f32 %v1329_v7 }
 0x202   : > { %v4748_v32 = vpop.eup %4747  ;;  %4759 = vtanh.f32 %v1321_v13 }
 0x203   : > { %v4750_v37 = vpop.eup %4749 }
 0x204   : > { %v4752_v44 = vpop.eup %4751  ;;  %v4192_v50 = vpop.f32.mrb[56].mxu1  ;;  %v1565_v3 = vpack.c.bf16 %v4750_v37, %v4746_v26 }
 0x205   : > { %v1342_v4 = vadd.f32 %v4192_v50, %v5811_v6  ;;  %v1333_v5 = vpop.f32.mrb[57].mxu1  ;;  %v1564_v9 = vpack.c.bf16 %v4752_v44, %v4748_v32 }
 0x206   : > { %v1334_v12 = vadd.f32 %v5811_v6, %v1333_v5  ;;  %v4193_v15 = vpop.f32.mrb[58].mxu1 }
 0x207   : > { %4761 = vtanh.f32 %v1342_v4  ;;  %v1345_v16 = vadd.f32 %v4193_v15, %v5811_v6  ;;  %v1336_v17 = vpop.f32.mrb[59].mxu1  ;;  %4262 = vmatprep.mubr.bf16.mxu0 %v1564_v9 }
 0x208   : > { %4763 = vtanh.f32 %v1334_v12  ;;  %v1337_v18 = vadd.f32 %v5811_v6, %v1336_v17  ;;  %4263 = vmatmul.mubr.bf16.gmra.mrb[48].mxu0 %v1565_v3 }
 0x209   : > { %v4754_v19 = vpop.eup %4753  ;;  %4765 = vtanh.f32 %v1345_v16 }
 0x20a   : > { %v4756_v20 = vpop.eup %4755  ;;  %4767 = vtanh.f32 %v1337_v18 }
 0x20b   : > { %v4758_v21 = vpop.eup %4757 }
 0x20c   : > { %v4760_v22 = vpop.eup %4759  ;;  %v4196_v23 = vpop.f32.mrb[60].mxu1  ;;  %v1567_v24 = vpack.c.bf16 %v4758_v21, %v4754_v19 }
 0x20d   : > { %v1358_v27 = vadd.f32 %v4196_v23, %v5811_v6  ;;  %v1349_v28 = vpop.f32.mrb[61].mxu1  ;;  %v1566_v29 = vpack.c.bf16 %v4760_v22, %v4756_v20 }
 0x20e   : > { %v1350_v31 = vadd.f32 %v5811_v6, %v1349_v28  ;;  %v4197_v33 = vpop.f32.mrb[62].mxu1 }
 0x20f   : > { %4769 = vtanh.f32 %v1358_v27  ;;  %v1361_v35 = vadd.f32 %v4197_v33, %v5811_v6  ;;  %v1352_v36 = vpop.f32.mrb[63].mxu1  ;;  %4266 = vmatprep.mubr.bf16.mxu0 %v1566_v29 }
 0x210   : > { %4771 = vtanh.f32 %v1350_v31  ;;  %v1353_v40 = vadd.f32 %v5811_v6, %v1352_v36  ;;  %4267 = vmatmul.mubr.bf16.gmra.mrb[52].mxu0 %v1567_v24 }
 0x211   : > { %v4762_v41 = vpop.eup %4761  ;;  %4773 = vtanh.f32 %v1361_v35 }
 0x212   : > { %v4764_v43 = vpop.eup %4763  ;;  %4775 = vtanh.f32 %v1353_v40 }
 0x213   : > { %v4766_v45 = vpop.eup %4765 }
 0x214   : > { %v4768_v48 = vpop.eup %4767  ;;  %v4200_v49 = vpop.f32.mrb[64].mxu1  ;;  %v1569_v51 = vpack.c.bf16 %v4766_v45, %v4762_v41 }
 0x215   : > { %v1374_v52 = vadd.f32 %v4200_v49, %v5811_v6  ;;  %v1365_v53 = vpop.f32.mrb[65].mxu1  ;;  %v1568_v54 = vpack.c.bf16 %v4768_v48, %v4764_v43 }
 0x216   : > { %v1366_v56 = vadd.f32 %v5811_v6, %v1365_v53  ;;  %v4201_v57 = vpop.f32.mrb[66].mxu1 }
 0x217   : > { %4777 = vtanh.f32 %v1374_v52  ;;  %v1377_v58 = vadd.f32 %v4201_v57, %v5811_v6  ;;  %v1368_v59 = vpop.f32.mrb[67].mxu1  ;;  %4270 = vmatprep.mubr.bf16.mxu0 %v1568_v54 }
 0x218   : > { %4779 = vtanh.f32 %v1366_v56  ;;  %v1369_v47 = vadd.f32 %v5811_v6, %v1368_v59  ;;  %4271 = vmatmul.mubr.bf16.gmra.mrb[56].mxu0 %v1569_v51 }
 0x219   : > { %v4770_v62 = vpop.eup %4769  ;;  %4781 = vtanh.f32 %v1377_v58 }
 0x21a   : > { %v4772_v63 = vpop.eup %4771  ;;  %4783 = vtanh.f32 %v1369_v47 }
 0x21b   : > { %v4774_v0 = vpop.eup %4773 }
 0x21c   : > { %v4776_v61 = vpop.eup %4775  ;;  %v4204_v46 = vpop.f32.mrb[68].mxu1  ;;  %v1571_v2 = vpack.c.bf16 %v4774_v0, %v4770_v62 }
 0x21d   : > { %v1390_v10 = vadd.f32 %v4204_v46, %v5811_v6  ;;  %v1381_v11 = vpop.f32.mrb[69].mxu1  ;;  %v1570_v14 = vpack.c.bf16 %v4776_v61, %v4772_v63 }
 0x21e   : > { %v1382_v25 = vadd.f32 %v5811_v6, %v1381_v11  ;;  %v4205_v30 = vpop.f32.mrb[70].mxu1 }
 0x21f   : > { %4785 = vtanh.f32 %v1390_v10  ;;  %v1393_v34 = vadd.f32 %v4205_v30, %v5811_v6  ;;  %v1384_v38 = vpop.f32.mrb[71].mxu1  ;;  %4274 = vmatprep.mubr.bf16.mxu0 %v1570_v14 }
 0x220   : > { %4787 = vtanh.f32 %v1382_v25  ;;  %v1385_v39 = vadd.f32 %v5811_v6, %v1384_v38  ;;  %4275 = vmatmul.mubr.bf16.gmra.mrb[60].mxu0 %v1571_v2 }
 0x221   : > { %v4778_v42 = vpop.eup %4777  ;;  %4789 = vtanh.f32 %v1393_v34 }
 0x222   : > { %v4780_v55 = vpop.eup %4779  ;;  %4791 = vtanh.f32 %v1385_v39 }
 0x223   : > { %v4782_v60 = vpop.eup %4781 }
 0x224   : > { %v4784_v1 = vpop.eup %4783  ;;  %v4208_v7 = vpop.f32.mrb[72].mxu1  ;;  %v1573_v8 = vpack.c.bf16 %v4782_v60, %v4778_v42 }
 0x225   : > { %v1406_v13 = vadd.f32 %v4208_v7, %v5811_v6  ;;  %v1397_v26 = vpop.f32.mrb[73].mxu1  ;;  %v1572_v32 = vpack.c.bf16 %v4784_v1, %v4780_v55 }
 0x226   : > { %v1398_v37 = vadd.f32 %v5811_v6, %v1397_v26  ;;  %v4209_v44 = vpop.f32.mrb[74].mxu1 }
 0x227   : > { %4793 = vtanh.f32 %v1406_v13  ;;  %v1409_v50 = vadd.f32 %v4209_v44, %v5811_v6  ;;  %v1400_v3 = vpop.f32.mrb[75].mxu1  ;;  %4278 = vmatprep.mubr.bf16.mxu0 %v1572_v32 }
 0x228   : > { %4795 = vtanh.f32 %v1398_v37  ;;  %v1401_v4 = vadd.f32 %v5811_v6, %v1400_v3  ;;  %4279 = vmatmul.mubr.bf16.gmra.mrb[64].mxu0 %v1573_v8 }
 0x229   : > { %v4786_v5 = vpop.eup %4785  ;;  %4797 = vtanh.f32 %v1409_v50 }
 0x22a   : > { %v4788_v9 = vpop.eup %4787  ;;  %4799 = vtanh.f32 %v1401_v4 }
 0x22b   : > { %v4790_v12 = vpop.eup %4789 }
 0x22c   : > { %v4792_v15 = vpop.eup %4791  ;;  %v4212_v16 = vpop.f32.mrb[76].mxu1  ;;  %v1575_v17 = vpack.c.bf16 %v4790_v12, %v4786_v5 }
 0x22d   : > { %v1422_v18 = vadd.f32 %v4212_v16, %v5811_v6  ;;  %v1413_v19 = vpop.f32.mrb[77].mxu1  ;;  %v1574_v20 = vpack.c.bf16 %v4792_v15, %v4788_v9 }
 0x22e   : > { %v1414_v21 = vadd.f32 %v5811_v6, %v1413_v19  ;;  %v4213_v22 = vpop.f32.mrb[78].mxu1 }
 0x22f   : > { %4801 = vtanh.f32 %v1422_v18  ;;  %v1425_v23 = vadd.f32 %v4213_v22, %v5811_v6  ;;  %v1416_v24 = vpop.f32.mrb[79].mxu1  ;;  %4282 = vmatprep.mubr.bf16.mxu0 %v1574_v20  ;;  %v4575_v18 = vld [vmem:[%s6263_s7 + $0x30] sm:$0xff]  }
 0x230   : > { %4803 = vtanh.f32 %v1414_v21  ;;  %v1417_v27 = vadd.f32 %v5811_v6, %v1416_v24  ;;  %4283 = vmatmul.mubr.bf16.gmra.mrb[68].mxu0 %v1575_v17  ;;  %4322 = vmatprep.subr.bf16.mxu1 %v4575_v18 }
 0x231   : > { %v4794_v28 = vpop.eup %4793  ;;  %4805 = vtanh.f32 %v1425_v23  ;;  %4323 = vmatpush3.bf16.msra.mxu1 %v4575_v18 }
 0x232   : > { %v4796_v29 = vpop.eup %4795  ;;  %4807 = vtanh.f32 %v1417_v27 }
 0x233   : > { %v4798_v31 = vpop.eup %4797 }
 0x234   : > { %v4800_v33 = vpop.eup %4799  ;;  %v4216_v35 = vpop.f32.mrb[80].mxu1  ;;  %v1577_v36 = vpack.c.bf16 %v4798_v31, %v4794_v28 }
 0x235   : > { %v1438_v40 = vadd.f32 %v4216_v35, %v5811_v6  ;;  %v1429_v41 = vpop.f32.mrb[81].mxu1  ;;  %v1576_v43 = vpack.c.bf16 %v4800_v33, %v4796_v29  ;;  %v4576_v29 = vld [vmem:[%s6263_s7 + $0x38] sm:$0xff]  }
 0x236   : > { %v1430_v45 = vadd.f32 %v5811_v6, %v1429_v41  ;;  %v4217_v48 = vpop.f32.mrb[82].mxu1  ;;  %4324 = vmatprep.subr.bf16.mxu1 %v4576_v29 }
 0x237   : > { %4809 = vtanh.f32 %v1438_v40  ;;  %v1441_v49 = vadd.f32 %v4217_v48, %v5811_v6  ;;  %v1432_v51 = vpop.f32.mrb[83].mxu1  ;;  %4286 = vmatprep.mubr.bf16.mxu0 %v1576_v43  ;;  %4325 = vmatpush3.bf16.msra.mxu1 %v4576_v29  ;;  %v5904_v40 = vld [vmem:[%s6262_s6] ss:$0 sm:$0xff] }
 0x238   : > { %4811 = vtanh.f32 %v1430_v45  ;;  %v1433_v52 = vadd.f32 %v5811_v6, %v1432_v51  ;;  %4287 = vmatmul.mubr.bf16.gmra.mrb[72].mxu0 %v1577_v36 }
 0x239   : > { %v4802_v53 = vpop.eup %4801  ;;  %4813 = vtanh.f32 %v1441_v49 }
 0x23a   : > { %v4804_v54 = vpop.eup %4803  ;;  %4815 = vtanh.f32 %v1433_v52 }
 0x23b   : > { %v4806_v56 = vpop.eup %4805 }
 0x23c   : > { %v4808_v57 = vpop.eup %4807  ;;  %v4220_v58 = vpop.f32.mrb[84].mxu1  ;;  %v1579_v59 = vpack.c.bf16 %v4806_v56, %v4802_v53 }
 0x23d   : > { %v1454_v47 = vadd.f32 %v4220_v58, %v5811_v6  ;;  %v1445_v62 = vpop.f32.mrb[85].mxu1  ;;  %v1578_v63 = vpack.c.bf16 %v4808_v57, %v4804_v54 }
 0x23e   : > { %v1446_v0 = vadd.f32 %v5811_v6, %v1445_v62  ;;  %v4221_v61 = vpop.f32.mrb[86].mxu1 }
 0x23f   : > { %4817 = vtanh.f32 %v1454_v47  ;;  %v1457_v46 = vadd.f32 %v4221_v61, %v5811_v6  ;;  %v1448_v2 = vpop.f32.mrb[87].mxu1  ;;  %4290 = vmatprep.mubr.bf16.mxu0 %v1578_v63 }
 0x240   : > { %4819 = vtanh.f32 %v1446_v0  ;;  %v1449_v10 = vadd.f32 %v5811_v6, %v1448_v2  ;;  %4291 = vmatmul.mubr.bf16.gmra.mrb[76].mxu0 %v1579_v59 }
 0x241   : > { %v4810_v11 = vpop.eup %4809  ;;  %4821 = vtanh.f32 %v1457_v46 }
 0x242   : > { %v4812_v14 = vpop.eup %4811  ;;  %4823 = vtanh.f32 %v1449_v10 }
 0x243   : > { %v4814_v25 = vpop.eup %4813 }
 0x244   : > { %v4816_v30 = vpop.eup %4815  ;;  %v4224_v34 = vpop.f32.mrb[88].mxu1  ;;  %v1581_v38 = vpack.c.bf16 %v4814_v25, %v4810_v11 }
 0x245   : > { %v1470_v39 = vadd.f32 %v4224_v34, %v5811_v6  ;;  %v1461_v42 = vpop.f32.mrb[89].mxu1  ;;  %v1580_v55 = vpack.c.bf16 %v4816_v30, %v4812_v14 }
 0x246   : > { %v1462_v60 = vadd.f32 %v5811_v6, %v1461_v42  ;;  %v4225_v1 = vpop.f32.mrb[90].mxu1 }
 0x247   : > { %4825 = vtanh.f32 %v1470_v39  ;;  %v1473_v7 = vadd.f32 %v4225_v1, %v5811_v6  ;;  %v1464_v8 = vpop.f32.mrb[91].mxu1  ;;  %4294 = vmatprep.mubr.bf16.mxu0 %v1580_v55 }
 0x248   : > { %4827 = vtanh.f32 %v1462_v60  ;;  %v1465_v13 = vadd.f32 %v5811_v6, %v1464_v8  ;;  %4295 = vmatmul.mubr.bf16.gmra.mrb[80].mxu0 %v1581_v38 }
 0x249   : > { %v4818_v26 = vpop.eup %4817  ;;  %4829 = vtanh.f32 %v1473_v7 }
 0x24a   : > { %v4820_v32 = vpop.eup %4819  ;;  %4831 = vtanh.f32 %v1465_v13 }
 0x24b   : > { %v4822_v37 = vpop.eup %4821 }
 0x24c   : > { %v4824_v44 = vpop.eup %4823  ;;  %v4228_v50 = vpop.f32.mrb[92].mxu1  ;;  %v1583_v3 = vpack.c.bf16 %v4822_v37, %v4818_v26 }
 0x24d   : > { %v1486_v4 = vadd.f32 %v4228_v50, %v5811_v6  ;;  %v1477_v5 = vpop.f32.mrb[93].mxu1  ;;  %v1582_v9 = vpack.c.bf16 %v4824_v44, %v4820_v32 }
 0x24e   : > { %v1478_v12 = vadd.f32 %v5811_v6, %v1477_v5  ;;  %v4229_v15 = vpop.f32.mrb[94].mxu1 }
 0x24f   : > { %4833 = vtanh.f32 %v1486_v4  ;;  %v1489_v16 = vadd.f32 %v4229_v15, %v5811_v6  ;;  %v1480_v17 = vpop.f32.mrb[95].mxu1  ;;  %4298 = vmatprep.mubr.bf16.mxu0 %v1582_v9 }
 0x250   : > { %4835 = vtanh.f32 %v1478_v12  ;;  %v1481_v19 = vadd.f32 %v5811_v6, %v1480_v17  ;;  %4299 = vmatmul.mubr.bf16.gmra.mrb[84].mxu0 %v1583_v3 }
 0x251   : > { %v4826_v20 = vpop.eup %4825  ;;  %4837 = vtanh.f32 %v1489_v16 }
 0x252   : > { %v4828_v21 = vpop.eup %4827  ;;  %4839 = vtanh.f32 %v1481_v19 }
 0x253   : > { %v4830_v22 = vpop.eup %4829 }
 0x254   : > { %v4832_v23 = vpop.eup %4831  ;;  %v1585_v24 = vpack.c.bf16 %v4830_v22, %v4826_v20  ;;  %v4577_v22 = vld [vmem:[%s6265_s9] sm:$0xff]  }
 0x255   : > { %v1584_v27 = vpack.c.bf16 %v4832_v23, %v4828_v21  ;;  %4390 = vmatprep.subr.bf16.mxu0 %v4577_v22 }
 0x256   : > { %4391 = vmatpush3.bf16.msra.mxu0 %v4577_v22 }
 0x257   : > { %4302 = vmatprep.mubr.bf16.mxu0 %v1584_v27 }
 0x258   : > { %4303 = vmatmul.mubr.bf16.gmra.mrb[88].mxu0 %v1585_v24 }
 0x259   : > { %v4834_v28 = vpop.eup %4833 }
 0x25a   : > { %v4836_v31 = vpop.eup %4835 }
 0x25b   : > { %v4838_v6 = vpop.eup %4837 }
 0x25c   : > { %v4840_v33 = vpop.eup %4839  ;;  %v1587_v35 = vpack.c.bf16 %v4838_v6, %v4834_v28 }
 0x25d   : > { %v1586_v36 = vpack.c.bf16 %v4840_v33, %v4836_v31 }
 0x25f   : > { %4306 = vmatprep.mubr.bf16.mxu0 %v1586_v36 }
 0x260   : > { %4307 = vmatmul.mubr.bf16.gmra.mrb[92].mxu0 %v1587_v35 }
 0x2bb   : > { %v4248_v41 = vpop.f32.mrb[32].mxu0 }
 0x2bc   : > { %v1702_v43 = vadd.f32 %v4248_v41, %v5904_v40  ;;  %v1693_v45 = vpop.f32.mrb[33].mxu0 }
 0x2bd   : > { %v1694_v48 = vadd.f32 %v5904_v40, %v1693_v45  ;;  %v4249_v49 = vpop.f32.mrb[34].mxu0 }
 0x2be   : > { %v3735_v51 = vmul.f32 -1.442695, %v1702_v43  ;;  %v1705_v52 = vadd.f32 %v4249_v49, %v5904_v40  ;;  %v1696_v53 = vpop.f32.mrb[35].mxu0 }
 0x2bf   : > { %v3733_v54 = vmul.f32 -1.442695, %v1694_v48  ;;  %v1697_v56 = vadd.f32 %v5904_v40, %v1696_v53 }
 0x2c0   : > { %4841 = vpow2.f32 %v3735_v51  ;;  %v3736_v57 = vmul.f32 -1.442695, %v1705_v52 }
 0x2c1   : > { %4843 = vpow2.f32 %v3733_v54  ;;  %v3734_v58 = vmul.f32 -1.442695, %v1697_v56 }
 0x2c2   : > { %4845 = vpow2.f32 %v3736_v57 }
 0x2c3   : > { %4847 = vpow2.f32 %v3734_v58  ;;  %v4252_v59 = vpop.f32.mrb[36].mxu0 }
 0x2c4   : > { %v1718_v47 = vadd.f32 %v4252_v59, %v5904_v40  ;;  %v1709_v62 = vpop.f32.mrb[37].mxu0 }
 0x2c5   : > { %v1710_v63 = vadd.f32 %v5904_v40, %v1709_v62  ;;  %v4253_v0 = vpop.f32.mrb[38].mxu0  ;;  %v4578_v62 = vld [vmem:[%s6265_s9 + $0x8] sm:$0xff]  }
 0x2c6   : > { %v3739_v61 = vmul.f32 -1.442695, %v1718_v47  ;;  %v1721_v46 = vadd.f32 %v4253_v0, %v5904_v40  ;;  %v1712_v2 = vpop.f32.mrb[39].mxu0  ;;  %4392 = vmatprep.subr.bf16.mxu0 %v4578_v62 }
 0x2c7   : > { %v3737_v10 = vmul.f32 -1.442695, %v1710_v63  ;;  %v1713_v11 = vadd.f32 %v5904_v40, %v1712_v2  ;;  %v4579_v63 = vld [vmem:[%s6265_s9 + $0x10] sm:$0xff]   ;;  %4393 = vmatpush3.bf16.msra.mxu0 %v4578_v62 }
 0x2c8   : > { %4849 = vpow2.f32 %v3739_v61  ;;  %v3740_v14 = vmul.f32 -1.442695, %v1721_v46  ;;  %4394 = vmatprep.subr.bf16.mxu0 %v4579_v63 }
 0x2c9   : > { %4851 = vpow2.f32 %v3737_v10  ;;  %v3738_v25 = vmul.f32 -1.442695, %v1713_v11 }
 0x2ca   : > { %v4842_v30 = vpop.eup %4841  ;;  %4853 = vpow2.f32 %v3740_v14 }
 0x2cb   : > { %v4844_v34 = vpop.eup %4843  ;;  %v2142_v38 = vadd.f32 1.0, %v4842_v30  ;;  %4855 = vpow2.f32 %v3738_v25  ;;  %v4256_v39 = vpop.f32.mrb[40].mxu0  ;;  %4395 = vmatpush3.bf16.msra.mxu0 %v4579_v63 }
 0x2cc   : > { %v4846_v42 = vpop.eup %4845  ;;  %v2140_v55 = vadd.f32 1.0, %v4844_v34  ;;  %v1734_v60 = vadd.f32 %v4256_v39, %v5904_v40  ;;  %v1725_v1 = vpop.f32.mrb[41].mxu0 }
 0x2cd   : > { %v4848_v7 = vpop.eup %4847  ;;  %4857 = vrcp.f32 %v2142_v38  ;;  %v2143_v8 = vadd.f32 1.0, %v4846_v42  ;;  %v1726_v13 = vadd.f32 %v5904_v40, %v1725_v1  ;;  %v4257_v26 = vpop.f32.mrb[42].mxu0  ;;  %v4580_v1 = vld [vmem:[%s6265_s9 + $0x18] sm:$0xff]  }
 0x2ce   : > { %4859 = vrcp.f32 %v2140_v55  ;;  %v2141_v32 = vadd.f32 1.0, %v4848_v7  ;;  %v3743_v37 = vmul.f32 -1.442695, %v1734_v60  ;;  %v1737_v44 = vadd.f32 %v4257_v26, %v5904_v40  ;;  %v1728_v50 = vpop.f32.mrb[43].mxu0  ;;  %4396 = vmatprep.subr.bf16.mxu0 %v4580_v1 }
 0x2cf   : > { %4861 = vrcp.f32 %v2143_v8  ;;  %v3741_v3 = vmul.f32 -1.442695, %v1726_v13  ;;  %v1729_v4 = vadd.f32 %v5904_v40, %v1728_v50  ;;  %4397 = vmatpush3.bf16.msra.mxu0 %v4580_v1 }
 0x2d0   : > { %4863 = vrcp.f32 %v2141_v32  ;;  %v3744_v5 = vmul.f32 -1.442695, %v1737_v44 }
 0x2d1   : > { %4865 = vpow2.f32 %v3743_v37  ;;  %v3742_v9 = vmul.f32 -1.442695, %v1729_v4 }
 0x2d2   : > { %v4850_v12 = vpop.eup %4849  ;;  %4867 = vpow2.f32 %v3741_v3 }
 0x2d3   : > { %v4852_v15 = vpop.eup %4851  ;;  %v2146_v16 = vadd.f32 1.0, %v4850_v12  ;;  %4869 = vpow2.f32 %v3744_v5  ;;  %v4260_v17 = vpop.f32.mrb[44].mxu0 }
 0x2d4   : > { %v4854_v18 = vpop.eup %4853  ;;  %v2144_v19 = vadd.f32 1.0, %v4852_v15  ;;  %4871 = vpow2.f32 %v3742_v9  ;;  %v1750_v20 = vadd.f32 %v4260_v17, %v5904_v40  ;;  %v1741_v21 = vpop.f32.mrb[45].mxu0  ;;  %v4581_v9 = vld [vmem:[%s6265_s9 + $0x20] sm:$0xff]  }
 0x2d5   : > { %v4856_v23 = vpop.eup %4855  ;;  %4873 = vrcp.f32 %v2146_v16  ;;  %v2147_v24 = vadd.f32 1.0, %v4854_v18  ;;  %v1742_v27 = vadd.f32 %v5904_v40, %v1741_v21  ;;  %v4261_v28 = vpop.f32.mrb[46].mxu0  ;;  %4398 = vmatprep.subr.bf16.mxu0 %v4581_v9 }
 0x2d6   : > { %4875 = vrcp.f32 %v2144_v19  ;;  %v2145_v29 = vadd.f32 1.0, %v4856_v23  ;;  %v3747_v31 = vmul.f32 -1.442695, %v1750_v20  ;;  %v1753_v6 = vadd.f32 %v4261_v28, %v5904_v40  ;;  %v1744_v33 = vpop.f32.mrb[47].mxu0  ;;  %4399 = vmatpush3.bf16.msra.mxu0 %v4581_v9 }
 0x2d7   : > { %v4858_v35 = vpop.eup %4857  ;;  %4877 = vrcp.f32 %v2147_v24  ;;  %v3745_v36 = vmul.f32 -1.442695, %v1742_v27  ;;  %v1745_v41 = vadd.f32 %v5904_v40, %v1744_v33 }
 0x2d8   : > { %v4860_v43 = vpop.eup %4859  ;;  %4879 = vrcp.f32 %v2145_v29  ;;  %v3748_v45 = vmul.f32 -1.442695, %v1753_v6 }
 0x2d9   : > { %v4862_v48 = vpop.eup %4861  ;;  %4881 = vpow2.f32 %v3747_v31  ;;  %v3746_v49 = vmul.f32 -1.442695, %v1745_v41  ;;  %v4582_v31 = vld [vmem:[%s6265_s9 + $0x28] sm:$0xff]  }
 0x2da   : > { %v4864_v51 = vpop.eup %4863  ;;  %4883 = vpow2.f32 %v3745_v36  ;;  %v2333_v52 = vpack.c.bf16 %v4862_v48, %v4858_v35  ;;  %4400 = vmatprep.subr.bf16.mxu0 %v4582_v31 }
 0x2db   : > { %v4866_v53 = vpop.eup %4865  ;;  %4885 = vpow2.f32 %v3748_v45  ;;  %v4264_v54 = vpop.f32.mrb[48].mxu0  ;;  %v2332_v56 = vpack.c.bf16 %v4864_v51, %v4860_v43  ;;  %4401 = vmatpush3.bf16.msra.mxu0 %v4582_v31 }
 0x2dc   : > { %v4868_v57 = vpop.eup %4867  ;;  %v2150_v58 = vadd.f32 1.0, %v4866_v53  ;;  %4887 = vpow2.f32 %v3746_v49  ;;  %v1766_v59 = vadd.f32 %v4264_v54, %v5904_v40  ;;  %v1757_v47 = vpop.f32.mrb[49].mxu0 }
 0x2dd   : > { %v4870_v0 = vpop.eup %4869  ;;  %v2148_v61 = vadd.f32 1.0, %v4868_v57  ;;  %v1758_v46 = vadd.f32 %v5904_v40, %v1757_v47  ;;  %v4265_v2 = vpop.f32.mrb[50].mxu0  ;;  %4326 = vmatprep.mubr.bf16.mxu1 %v2332_v56 }
 0x2de   : > { %v4872_v10 = vpop.eup %4871  ;;  %4889 = vrcp.f32 %v2150_v58  ;;  %v2151_v11 = vadd.f32 1.0, %v4870_v0  ;;  %v3751_v14 = vmul.f32 -1.442695, %v1766_v59  ;;  %v1769_v25 = vadd.f32 %v4265_v2, %v5904_v40  ;;  %v1760_v30 = vpop.f32.mrb[51].mxu0  ;;  %4327 = vmatmul.mubr.bf16.vlgmr.msra.gmra.mrb[96].mxu1 %v2333_v52 }
 0x2df   : > { %v4874_v34 = vpop.eup %4873  ;;  %4891 = vrcp.f32 %v2148_v61  ;;  %v2149_v38 = vadd.f32 1.0, %v4872_v10  ;;  %v3749_v39 = vmul.f32 -1.442695, %v1758_v46  ;;  %v1761_v42 = vadd.f32 %v5904_v40, %v1760_v30 }
 0x2e0   : > { %v4876_v55 = vpop.eup %4875  ;;  %4893 = vrcp.f32 %v2151_v11  ;;  %v3752_v60 = vmul.f32 -1.442695, %v1769_v25 }
 0x2e1   : > { %v4878_v7 = vpop.eup %4877  ;;  %4895 = vrcp.f32 %v2149_v38  ;;  %v3750_v8 = vmul.f32 -1.442695, %v1761_v42 }
 0x2e2   : > { %v4880_v13 = vpop.eup %4879  ;;  %4897 = vpow2.f32 %v3751_v14  ;;  %v2335_v26 = vpack.c.bf16 %v4878_v7, %v4874_v34 }
 0x2e3   : > { %v4882_v32 = vpop.eup %4881  ;;  %4899 = vpow2.f32 %v3749_v39  ;;  %v4268_v37 = vpop.f32.mrb[52].mxu0  ;;  %v2334_v44 = vpack.c.bf16 %v4880_v13, %v4876_v55 }
 0x2e4   : > { %v4884_v50 = vpop.eup %4883  ;;  %v2154_v3 = vadd.f32 1.0, %v4882_v32  ;;  %4901 = vpow2.f32 %v3752_v60  ;;  %v1782_v4 = vadd.f32 %v4268_v37, %v5904_v40  ;;  %v1773_v5 = vpop.f32.mrb[53].mxu0 }
 0x2e5   : > { %v4886_v12 = vpop.eup %4885  ;;  %v2152_v15 = vadd.f32 1.0, %v4884_v50  ;;  %4903 = vpow2.f32 %v3750_v8  ;;  %v1774_v16 = vadd.f32 %v5904_v40, %v1773_v5  ;;  %v4269_v17 = vpop.f32.mrb[54].mxu0  ;;  %4330 = vmatprep.mubr.bf16.mxu1 %v2334_v44 }
 0x2e6   : > { %v4888_v18 = vpop.eup %4887  ;;  %4905 = vrcp.f32 %v2154_v3  ;;  %v2155_v19 = vadd.f32 1.0, %v4886_v12  ;;  %v3755_v20 = vmul.f32 -1.442695, %v1782_v4  ;;  %v1785_v21 = vadd.f32 %v4269_v17, %v5904_v40  ;;  %v1776_v22 = vpop.f32.mrb[55].mxu0  ;;  %4331 = vmatmul.mubr.bf16.gmra.mrb[100].mxu1 %v2335_v26 }
 0x2e7   : > { %4907 = vrcp.f32 %v2152_v15  ;;  %v2153_v23 = vadd.f32 1.0, %v4888_v18  ;;  %v3753_v24 = vmul.f32 -1.442695, %v1774_v16  ;;  %v1777_v27 = vadd.f32 %v5904_v40, %v1776_v22 }
 0x2e8   : > { %v4890_v28 = vpop.eup %4889  ;;  %4909 = vrcp.f32 %v2155_v19  ;;  %v3756_v29 = vmul.f32 -1.442695, %v1785_v21 }
 0x2e9   : > { %v4892_v6 = vpop.eup %4891  ;;  %4911 = vrcp.f32 %v2153_v23  ;;  %v3754_v33 = vmul.f32 -1.442695, %v1777_v27 }
 0x2ea   : > { %v4894_v35 = vpop.eup %4893  ;;  %4913 = vpow2.f32 %v3755_v20 }
 0x2eb   : > { %v4896_v36 = vpop.eup %4895  ;;  %4915 = vpow2.f32 %v3753_v24  ;;  %v4272_v41 = vpop.f32.mrb[56].mxu0  ;;  %v2337_v43 = vpack.c.bf16 %v4894_v35, %v4890_v28 }
 0x2ec   : > { %v4898_v45 = vpop.eup %4897  ;;  %4917 = vpow2.f32 %v3756_v29  ;;  %v1798_v48 = vadd.f32 %v4272_v41, %v5904_v40  ;;  %v1789_v49 = vpop.f32.mrb[57].mxu0  ;;  %v2336_v51 = vpack.c.bf16 %v4896_v36, %v4892_v6 }
 0x2ed   : > { %v4900_v52 = vpop.eup %4899  ;;  %v2158_v53 = vadd.f32 1.0, %v4898_v45  ;;  %4919 = vpow2.f32 %v3754_v33  ;;  %v1790_v54 = vadd.f32 %v5904_v40, %v1789_v49  ;;  %v4273_v56 = vpop.f32.mrb[58].mxu0 }
 0x2ee   : > { %v4902_v57 = vpop.eup %4901  ;;  %v2156_v58 = vadd.f32 1.0, %v4900_v52  ;;  %v1801_v59 = vadd.f32 %v4273_v56, %v5904_v40  ;;  %4334 = vmatprep.mubr.bf16.mxu1 %v2336_v51  ;;  %v1792_v47 = vpop.f32.mrb[59].mxu0  ;;  %v3759_v0 = vmul.f32 -1.442695, %v1798_v48 }
 0x2ef   : > { %v4904_v62 = vpop.eup %4903  ;;  %4921 = vrcp.f32 %v2158_v53  ;;  %v2159_v63 = vadd.f32 1.0, %v4902_v57  ;;  %v1793_v61 = vadd.f32 %v5904_v40, %v1792_v47  ;;  %4335 = vmatmul.mubr.bf16.gmra.mrb[104].mxu1 %v2337_v43  ;;  %v3757_v10 = vmul.f32 -1.442695, %v1790_v54 }
 0x2f0   : > { %v4906_v46 = vpop.eup %4905  ;;  %4923 = vrcp.f32 %v2156_v58  ;;  %v2157_v2 = vadd.f32 1.0, %v4904_v62  ;;  %v3760_v14 = vmul.f32 -1.442695, %v1801_v59 }
 0x2f1   : > { %v4908_v11 = vpop.eup %4907  ;;  %4925 = vrcp.f32 %v2159_v63  ;;  %v3758_v30 = vmul.f32 -1.442695, %v1793_v61 }
 0x2f2   : > { %v4910_v25 = vpop.eup %4909  ;;  %4927 = vrcp.f32 %v2157_v2 }
 0x2f3   : > { %v4912_v34 = vpop.eup %4911  ;;  %4929 = vpow2.f32 %v3759_v0  ;;  %v4276_v38 = vpop.f32.mrb[60].mxu0  ;;  %v2339_v39 = vpack.c.bf16 %v4910_v25, %v4906_v46 }
 0x2f4   : > { %v4914_v42 = vpop.eup %4913  ;;  %4931 = vpow2.f32 %v3757_v10  ;;  %v1814_v55 = vadd.f32 %v4276_v38, %v5904_v40  ;;  %v1805_v60 = vpop.f32.mrb[61].mxu0  ;;  %v2338_v1 = vpack.c.bf16 %v4912_v34, %v4908_v11 }
 0x2f5   : > { %v4916_v7 = vpop.eup %4915  ;;  %v2162_v8 = vadd.f32 1.0, %v4914_v42  ;;  %4933 = vpow2.f32 %v3760_v14  ;;  %v1806_v13 = vadd.f32 %v5904_v40, %v1805_v60  ;;  %v4277_v26 = vpop.f32.mrb[62].mxu0 }
 0x2f6   : > { %v4918_v32 = vpop.eup %4917  ;;  %v2160_v37 = vadd.f32 1.0, %v4916_v7  ;;  %4935 = vpow2.f32 %v3758_v30  ;;  %v1817_v44 = vadd.f32 %v4277_v26, %v5904_v40  ;;  %4338 = vmatprep.mubr.bf16.mxu1 %v2338_v1  ;;  %v1808_v50 = vpop.f32.mrb[63].mxu0  ;;  %v3763_v5 = vmul.f32 -1.442695, %v1814_v55 }
 0x2f7   : > { %v4920_v3 = vpop.eup %4919  ;;  %4937 = vrcp.f32 %v2162_v8  ;;  %v2163_v4 = vadd.f32 1.0, %v4918_v32  ;;  %v1809_v9 = vadd.f32 %v5904_v40, %v1808_v50  ;;  %4339 = vmatmul.mubr.bf16.gmra.mrb[108].mxu1 %v2339_v39  ;;  %v3761_v15 = vmul.f32 -1.442695, %v1806_v13 }
 0x2f8   : > { %4939 = vrcp.f32 %v2160_v37  ;;  %v2161_v12 = vadd.f32 1.0, %v4920_v3  ;;  %v3764_v17 = vmul.f32 -1.442695, %v1817_v44 }
 0x2f9   : > { %v4922_v16 = vpop.eup %4921  ;;  %4941 = vrcp.f32 %v2163_v4  ;;  %v3762_v19 = vmul.f32 -1.442695, %v1809_v9 }
 0x2fa   : > { %v4924_v18 = vpop.eup %4923  ;;  %4943 = vrcp.f32 %v2161_v12 }
 0x2fb   : > { %v4926_v20 = vpop.eup %4925  ;;  %4945 = vpow2.f32 %v3763_v5  ;;  %v4280_v21 = vpop.f32.mrb[64].mxu0 }
 0x2fc   : > { %v4928_v22 = vpop.eup %4927  ;;  %4947 = vpow2.f32 %v3761_v15  ;;  %v1830_v23 = vadd.f32 %v4280_v21, %v5904_v40  ;;  %v1821_v24 = vpop.f32.mrb[65].mxu0  ;;  %v2341_v27 = vpack.c.bf16 %v4926_v20, %v4922_v16 }
 0x2fd   : > { %v4930_v28 = vpop.eup %4929  ;;  %4949 = vpow2.f32 %v3764_v17  ;;  %v1822_v29 = vadd.f32 %v5904_v40, %v1821_v24  ;;  %v4281_v31 = vpop.f32.mrb[66].mxu0  ;;  %v2340_v6 = vpack.c.bf16 %v4928_v22, %v4924_v18 }
 0x2fe   : > { %v4932_v33 = vpop.eup %4931  ;;  %v2166_v35 = vadd.f32 1.0, %v4930_v28  ;;  %4951 = vpow2.f32 %v3762_v19  ;;  %v1833_v36 = vadd.f32 %v4281_v31, %v5904_v40  ;;  %v1824_v41 = vpop.f32.mrb[67].mxu0  ;;  %v3767_v52 = vmul.f32 -1.442695, %v1830_v23 }
 0x2ff   : > { %v4934_v43 = vpop.eup %4933  ;;  %v2164_v45 = vadd.f32 1.0, %v4932_v33  ;;  %4342 = vmatprep.mubr.bf16.mxu1 %v2340_v6  ;;  %v1825_v48 = vadd.f32 %v5904_v40, %v1824_v41  ;;  %v3765_v56 = vmul.f32 -1.442695, %v1822_v29 }
 0x300   : > { %v4936_v49 = vpop.eup %4935  ;;  %4953 = vrcp.f32 %v2166_v35  ;;  %v2167_v51 = vadd.f32 1.0, %v4934_v43  ;;  %4343 = vmatmul.mubr.bf16.gmra.mrb[112].mxu1 %v2341_v27  ;;  %v3768_v58 = vmul.f32 -1.442695, %v1833_v36 }
 0x301   : > { %v4938_v53 = vpop.eup %4937  ;;  %4955 = vrcp.f32 %v2164_v45  ;;  %v2165_v54 = vadd.f32 1.0, %v4936_v49  ;;  %v3766_v47 = vmul.f32 -1.442695, %v1825_v48 }
 0x302   : > { %v4940_v57 = vpop.eup %4939  ;;  %4957 = vrcp.f32 %v2167_v51 }
 0x303   : > { %v4942_v59 = vpop.eup %4941  ;;  %4959 = vrcp.f32 %v2165_v54  ;;  %v4284_v62 = vpop.f32.mrb[68].mxu0 }
 0x304   : > { %v4944_v63 = vpop.eup %4943  ;;  %4961 = vpow2.f32 %v3767_v52  ;;  %v1846_v0 = vadd.f32 %v4284_v62, %v5904_v40  ;;  %v1837_v61 = vpop.f32.mrb[69].mxu0  ;;  %v2343_v46 = vpack.c.bf16 %v4942_v59, %v4938_v53 }
 0x305   : > { %v4946_v2 = vpop.eup %4945  ;;  %4963 = vpow2.f32 %v3765_v56  ;;  %v1838_v10 = vadd.f32 %v5904_v40, %v1837_v61  ;;  %v4285_v11 = vpop.f32.mrb[70].mxu0  ;;  %v2342_v14 = vpack.c.bf16 %v4944_v63, %v4940_v57 }
 0x306   : > { %v4948_v25 = vpop.eup %4947  ;;  %v2170_v30 = vadd.f32 1.0, %v4946_v2  ;;  %4965 = vpow2.f32 %v3768_v58  ;;  %v1849_v34 = vadd.f32 %v4285_v11, %v5904_v40  ;;  %v1840_v38 = vpop.f32.mrb[71].mxu0  ;;  %v3771_v7 = vmul.f32 -1.442695, %v1846_v0 }
 0x307   : > { %v4950_v39 = vpop.eup %4949  ;;  %v2168_v42 = vadd.f32 1.0, %v4948_v25  ;;  %4967 = vpow2.f32 %v3766_v47  ;;  %4346 = vmatprep.mubr.bf16.mxu1 %v2342_v14  ;;  %v1841_v55 = vadd.f32 %v5904_v40, %v1840_v38  ;;  %v3769_v13 = vmul.f32 -1.442695, %v1838_v10 }
 0x308   : > { %v4952_v60 = vpop.eup %4951  ;;  %4969 = vrcp.f32 %v2170_v30  ;;  %v2171_v1 = vadd.f32 1.0, %v4950_v39  ;;  %4347 = vmatmul.mubr.bf16.gmra.mrb[116].mxu1 %v2343_v46  ;;  %v3772_v32 = vmul.f32 -1.442695, %v1849_v34 }
 0x309   : > { %4971 = vrcp.f32 %v2168_v42  ;;  %v2169_v8 = vadd.f32 1.0, %v4952_v60  ;;  %v3770_v44 = vmul.f32 -1.442695, %v1841_v55 }
 0x30a   : > { %v4954_v26 = vpop.eup %4953  ;;  %4973 = vrcp.f32 %v2171_v1 }
 0x30b   : > { %v4956_v37 = vpop.eup %4955  ;;  %4975 = vrcp.f32 %v2169_v8  ;;  %v4288_v50 = vpop.f32.mrb[72].mxu0 }
 0x30c   : > { %v4958_v3 = vpop.eup %4957  ;;  %4977 = vpow2.f32 %v3771_v7  ;;  %v1862_v4 = vadd.f32 %v4288_v50, %v5904_v40  ;;  %v1853_v5 = vpop.f32.mrb[73].mxu0 }
 0x30d   : > { %v4960_v9 = vpop.eup %4959  ;;  %4979 = vpow2.f32 %v3769_v13  ;;  %v1854_v12 = vadd.f32 %v5904_v40, %v1853_v5  ;;  %v4289_v15 = vpop.f32.mrb[74].mxu0  ;;  %v2345_v16 = vpack.c.bf16 %v4958_v3, %v4954_v26 }
 0x30e   : > { %v4962_v17 = vpop.eup %4961  ;;  %4981 = vpow2.f32 %v3772_v32  ;;  %v3775_v18 = vmul.f32 -1.442695, %v1862_v4  ;;  %v1865_v19 = vadd.f32 %v4289_v15, %v5904_v40  ;;  %v2344_v20 = vpack.c.bf16 %v4960_v9, %v4956_v37  ;;  %v1856_v21 = vpop.f32.mrb[75].mxu0 }
 0x30f   : > { %v4964_v22 = vpop.eup %4963  ;;  %v2174_v23 = vadd.f32 1.0, %v4962_v17  ;;  %4983 = vpow2.f32 %v3770_v44  ;;  %v1857_v24 = vadd.f32 %v5904_v40, %v1856_v21  ;;  %v3773_v6 = vmul.f32 -1.442695, %v1854_v12 }
 0x310   : > { %v4966_v27 = vpop.eup %4965  ;;  %v2172_v28 = vadd.f32 1.0, %v4964_v22  ;;  %4985 = vpow2.f32 %v3775_v18  ;;  %4350 = vmatprep.mubr.bf16.mxu1 %v2344_v20  ;;  %v3776_v36 = vmul.f32 -1.442695, %v1865_v19 }
 0x311   : > { %v4968_v29 = vpop.eup %4967  ;;  %4987 = vrcp.f32 %v2174_v23  ;;  %v2175_v31 = vadd.f32 1.0, %v4966_v27  ;;  %4351 = vmatmul.mubr.bf16.gmra.mrb[120].mxu1 %v2345_v16  ;;  %v3774_v43 = vmul.f32 -1.442695, %v1857_v24 }
 0x312   : > { %v4970_v33 = vpop.eup %4969  ;;  %4989 = vrcp.f32 %v2172_v28  ;;  %v2173_v35 = vadd.f32 1.0, %v4968_v29 }
 0x313   : > { %v4972_v41 = vpop.eup %4971  ;;  %4991 = vrcp.f32 %v2175_v31  ;;  %v4292_v45 = vpop.f32.mrb[76].mxu0 }
 0x314   : > { %v4974_v48 = vpop.eup %4973  ;;  %4993 = vrcp.f32 %v2173_v35  ;;  %v1878_v49 = vadd.f32 %v4292_v45, %v5904_v40  ;;  %v1869_v51 = vpop.f32.mrb[77].mxu0 }
 0x315   : > { %v4976_v52 = vpop.eup %4975  ;;  %4995 = vpow2.f32 %v3773_v6  ;;  %v4293_v53 = vpop.f32.mrb[78].mxu0  ;;  %v2347_v54 = vpack.c.bf16 %v4974_v48, %v4970_v33  ;;  %v1870_v58 = vadd.f32 %v5904_v40, %v1869_v51 }
 0x316   : > { %v4978_v56 = vpop.eup %4977  ;;  %4997 = vpow2.f32 %v3776_v36  ;;  %v3779_v57 = vmul.f32 -1.442695, %v1878_v49  ;;  %v2346_v59 = vpack.c.bf16 %v4976_v52, %v4972_v41  ;;  %v1872_v47 = vpop.f32.mrb[79].mxu0  ;;  %v1881_v0 = vadd.f32 %v4293_v53, %v5904_v40 }
 0x317   : > { %v4980_v62 = vpop.eup %4979  ;;  %v2178_v63 = vadd.f32 1.0, %v4978_v56  ;;  %4999 = vpow2.f32 %v3774_v43  ;;  %v1873_v2 = vadd.f32 %v5904_v40, %v1872_v47  ;;  %v3777_v30 = vmul.f32 -1.442695, %v1870_v58 }
 0x318   : > { %v4982_v61 = vpop.eup %4981  ;;  %v2176_v46 = vadd.f32 1.0, %v4980_v62  ;;  %5001 = vpow2.f32 %v3779_v57  ;;  %4354 = vmatprep.mubr.bf16.mxu1 %v2346_v59  ;;  %v3780_v39 = vmul.f32 -1.442695, %v1881_v0 }
 0x319   : > { %v4984_v10 = vpop.eup %4983  ;;  %5003 = vrcp.f32 %v2178_v63  ;;  %v2179_v11 = vadd.f32 1.0, %v4982_v61  ;;  %4355 = vmatmul.mubr.bf16.gmra.mrb[124].mxu1 %v2347_v54  ;;  %v3778_v60 = vmul.f32 -1.442695, %v1873_v2 }
 0x31a   : > { %v4986_v14 = vpop.eup %4985  ;;  %5005 = vrcp.f32 %v2176_v46  ;;  %v2177_v25 = vadd.f32 1.0, %v4984_v10 }
 0x31b   : > { %v4988_v34 = vpop.eup %4987  ;;  %5007 = vrcp.f32 %v2179_v11  ;;  %v2182_v38 = vadd.f32 1.0, %v4986_v14  ;;  %v4296_v42 = vpop.f32.mrb[80].mxu0 }
 0x31c   : > { %v4990_v55 = vpop.eup %4989  ;;  %5009 = vrcp.f32 %v2177_v25  ;;  %v1894_v1 = vadd.f32 %v4296_v42, %v5904_v40  ;;  %v1885_v7 = vpop.f32.mrb[81].mxu0 }
 0x31d   : > { %v4992_v8 = vpop.eup %4991  ;;  %5011 = vrcp.f32 %v2182_v38  ;;  %v4297_v13 = vpop.f32.mrb[82].mxu0  ;;  %v1886_v37 = vadd.f32 %v5904_v40, %v1885_v7 }
 0x31e   : > { %v4994_v26 = vpop.eup %4993  ;;  %5013 = vpow2.f32 %v3777_v30  ;;  %v3783_v32 = vmul.f32 -1.442695, %v1894_v1  ;;  %v1888_v44 = vpop.f32.mrb[83].mxu0  ;;  %v2349_v50 = vpack.c.bf16 %v4992_v8, %v4988_v34  ;;  %v1897_v4 = vadd.f32 %v4297_v13, %v5904_v40 }
 0x31f   : > { %v4996_v3 = vpop.eup %4995  ;;  %5015 = vpow2.f32 %v3780_v39  ;;  %v2348_v5 = vpack.c.bf16 %v4994_v26, %v4990_v55  ;;  %v1889_v15 = vadd.f32 %v5904_v40, %v1888_v44  ;;  %v3781_v20 = vmul.f32 -1.442695, %v1886_v37 }
 0x320   : > { %v4998_v9 = vpop.eup %4997  ;;  %v2180_v12 = vadd.f32 1.0, %v4996_v3  ;;  %5017 = vpow2.f32 %v3778_v60  ;;  %v3784_v23 = vmul.f32 -1.442695, %v1897_v4 }
 0x321   : > { %v5000_v16 = vpop.eup %4999  ;;  %v2183_v17 = vadd.f32 1.0, %v4998_v9  ;;  %5019 = vpow2.f32 %v3783_v32  ;;  %4358 = vmatprep.mubr.bf16.mxu1 %v2348_v5  ;;  %v3782_v28 = vmul.f32 -1.442695, %v1889_v15 }
 0x322   : > { %v5002_v18 = vpop.eup %5001  ;;  %5021 = vrcp.f32 %v2180_v12  ;;  %v2181_v19 = vadd.f32 1.0, %v5000_v16  ;;  %4359 = vmatmul.mubr.bf16.gmra.mrb[128].mxu1 %v2349_v50 }
 0x323   : > { %v5004_v21 = vpop.eup %5003  ;;  %5023 = vrcp.f32 %v2183_v17  ;;  %v2186_v22 = vadd.f32 1.0, %v5002_v18  ;;  %v4300_v24 = vpop.f32.mrb[84].mxu0 }
 0x324   : > { %v5006_v27 = vpop.eup %5005  ;;  %5025 = vrcp.f32 %v2181_v19  ;;  %v1910_v29 = vadd.f32 %v4300_v24, %v5904_v40  ;;  %v1901_v31 = vpop.f32.mrb[85].mxu0 }
 0x325   : > { %v5008_v6 = vpop.eup %5007  ;;  %5027 = vrcp.f32 %v2186_v22  ;;  %v1902_v33 = vadd.f32 %v5904_v40, %v1901_v31  ;;  %v4301_v35 = vpop.f32.mrb[86].mxu0 }
 0x326   : > { %v5010_v36 = vpop.eup %5009  ;;  %5029 = vpow2.f32 %v3781_v20  ;;  %v3787_v41 = vmul.f32 -1.442695, %v1910_v29  ;;  %v1904_v43 = vpop.f32.mrb[87].mxu0  ;;  %v2351_v45 = vpack.c.bf16 %v5008_v6, %v5004_v21  ;;  %v1913_v51 = vadd.f32 %v4301_v35, %v5904_v40  ;;  %v5353_v6 = vld [vmem:[%s6262_s6] ss:$0 sm:$0xff] }
 0x327   : > { %v5012_v48 = vpop.eup %5011  ;;  %5031 = vpow2.f32 %v3784_v23  ;;  %v3785_v49 = vmul.f32 -1.442695, %v1902_v33  ;;  %v2350_v52 = vpack.c.bf16 %v5010_v36, %v5006_v27  ;;  %v1905_v54 = vadd.f32 %v5904_v40, %v1904_v43 }
 0x328   : > { %v5014_v53 = vpop.eup %5013  ;;  %5033 = vpow2.f32 %v3782_v28  ;;  %v3788_v63 = vmul.f32 -1.442695, %v1913_v51 }
 0x329   : > { %v5016_v56 = vpop.eup %5015  ;;  %v2184_v57 = vadd.f32 1.0, %v5014_v53  ;;  %5035 = vpow2.f32 %v3787_v41  ;;  %4362 = vmatprep.mubr.bf16.mxu1 %v2350_v52  ;;  %v3786_v2 = vmul.f32 -1.442695, %v1905_v54 }
 0x32a   : > { %v5018_v58 = vpop.eup %5017  ;;  %v2187_v59 = vadd.f32 1.0, %v5016_v56  ;;  %5037 = vpow2.f32 %v3785_v49  ;;  %4363 = vmatmul.mubr.bf16.gmra.mrb[132].mxu1 %v2351_v45 }
 0x32b   : > { %v5020_v47 = vpop.eup %5019  ;;  %5039 = vrcp.f32 %v2184_v57  ;;  %v2185_v62 = vadd.f32 1.0, %v5018_v58  ;;  %v4304_v0 = vpop.f32.mrb[88].mxu0 }
 0x32c   : > { %v5022_v61 = vpop.eup %5021  ;;  %5041 = vrcp.f32 %v2187_v59  ;;  %v2190_v46 = vadd.f32 1.0, %v5020_v47  ;;  %v1926_v10 = vadd.f32 %v4304_v0, %v5904_v40  ;;  %v1917_v11 = vpop.f32.mrb[89].mxu0 }
 0x32d   : > { %v5024_v14 = vpop.eup %5023  ;;  %5043 = vrcp.f32 %v2185_v62  ;;  %v1918_v25 = vadd.f32 %v5904_v40, %v1917_v11  ;;  %v4305_v30 = vpop.f32.mrb[90].mxu0 }
 0x32e   : > { %v5026_v34 = vpop.eup %5025  ;;  %5045 = vrcp.f32 %v2190_v46  ;;  %v3791_v38 = vmul.f32 -1.442695, %v1926_v10  ;;  %v1920_v39 = vpop.f32.mrb[91].mxu0  ;;  %v2353_v42 = vpack.c.bf16 %v5024_v14, %v5012_v48  ;;  %v1929_v8 = vadd.f32 %v4305_v30, %v5904_v40  ;;  %v4583_v14 = vld [vmem:[%s6265_s9 + $0x30] sm:$0xff]  }
 0x32f   : > { %v5028_v55 = vpop.eup %5027  ;;  %5047 = vpow2.f32 %v3788_v63  ;;  %v3789_v60 = vmul.f32 -1.442695, %v1918_v25  ;;  %v2352_v1 = vpack.c.bf16 %v5026_v34, %v5022_v61  ;;  %v1921_v32 = vadd.f32 %v5904_v40, %v1920_v39  ;;  %4402 = vmatprep.subr.bf16.mxu0 %v4583_v14 }
 0x330   : > { %v5030_v7 = vpop.eup %5029  ;;  %5049 = vpow2.f32 %v3786_v2  ;;  %v3792_v12 = vmul.f32 -1.442695, %v1929_v8  ;;  %4403 = vmatpush3.bf16.msra.mxu0 %v4583_v14 }
 0x331   : > { %v5032_v13 = vpop.eup %5031  ;;  %v2188_v26 = vadd.f32 1.0, %v5030_v7  ;;  %5051 = vpow2.f32 %v3791_v38  ;;  %4366 = vmatprep.mubr.bf16.mxu1 %v2352_v1  ;;  %v3790_v19 = vmul.f32 -1.442695, %v1921_v32 }
 0x332   : > { %v5034_v37 = vpop.eup %5033  ;;  %v2191_v44 = vadd.f32 1.0, %v5032_v13  ;;  %5053 = vpow2.f32 %v3789_v60  ;;  %4367 = vmatmul.mubr.bf16.gmra.mrb[136].mxu1 %v2353_v42 }
 0x333   : > { %v5036_v50 = vpop.eup %5035  ;;  %5055 = vrcp.f32 %v2188_v26  ;;  %v2189_v3 = vadd.f32 1.0, %v5034_v37  ;;  %v4308_v4 = vpop.f32.mrb[92].mxu0 }
 0x334   : > { %v5038_v5 = vpop.eup %5037  ;;  %5057 = vrcp.f32 %v2191_v44  ;;  %v2194_v9 = vadd.f32 1.0, %v5036_v50  ;;  %v1942_v15 = vadd.f32 %v4308_v4, %v5904_v40  ;;  %v1933_v16 = vpop.f32.mrb[93].mxu0  ;;  %v4584_v50 = vld [vmem:[%s6265_s9 + $0x38] sm:$0xff]  }
 0x335   : > { %v5040_v17 = vpop.eup %5039  ;;  %5059 = vrcp.f32 %v2189_v3  ;;  %v2192_v18 = vadd.f32 1.0, %v5038_v5  ;;  %v1934_v20 = vadd.f32 %v5904_v40, %v1933_v16  ;;  %v4309_v21 = vpop.f32.mrb[94].mxu0  ;;  %4404 = vmatprep.subr.bf16.mxu0 %v4584_v50  ;;  %v5998_v16 = vld [vmem:[%s6264_s8] ss:$0 sm:$0xff] }
 0x336   : > { %v5042_v22 = vpop.eup %5041  ;;  %5061 = vrcp.f32 %v2194_v9  ;;  %v3795_v23 = vmul.f32 -1.442695, %v1942_v15  ;;  %v1936_v24 = vpop.f32.mrb[95].mxu0  ;;  %v1945_v33 = vadd.f32 %v5353_v6, %v4309_v21  ;;  %4405 = vmatpush3.bf16.msra.mxu0 %v4584_v50 }
 0x337   : > { %v5044_v27 = vpop.eup %5043  ;;  %5063 = vrcp.f32 %v2192_v18  ;;  %v3793_v28 = vmul.f32 -1.442695, %v1934_v20  ;;  %v2355_v29 = vpack.c.bf16 %v5042_v22, %v5028_v55  ;;  %v1937_v40 = vadd.f32 %v5353_v6, %v1936_v24 }
 0x338   : > { %v5046_v31 = vpop.eup %5045  ;;  %5065 = vpow2.f32 %v3792_v12  ;;  %v2354_v35 = vpack.c.bf16 %v5044_v27, %v5040_v17  ;;  %v3796_v51 = vmul.f32 -1.442695, %v1945_v33 }
 0x339   : > { %v5048_v36 = vpop.eup %5047  ;;  %5067 = vpow2.f32 %v3790_v19  ;;  %v3794_v53 = vmul.f32 -1.442695, %v1937_v40 }
 0x33a   : > { %v5050_v41 = vpop.eup %5049  ;;  %v2195_v43 = vadd.f32 1.0, %v5048_v36  ;;  %5069 = vpow2.f32 %v3795_v23  ;;  %4370 = vmatprep.mubr.bf16.mxu1 %v2354_v35 }
 0x33b   : > { %v5052_v45 = vpop.eup %5051  ;;  %v2193_v48 = vadd.f32 1.0, %v5050_v41  ;;  %5071 = vpow2.f32 %v3793_v28  ;;  %4371 = vmatmul.mubr.bf16.gmra.mrb[140].mxu1 %v2355_v29 }
 0x33c   : > { %v5054_v49 = vpop.eup %5053  ;;  %5073 = vrcp.f32 %v2195_v43  ;;  %v2198_v57 = vadd.f32 1.0, %v5052_v45 }
 0x33d   : > { %v5056_v52 = vpop.eup %5055  ;;  %5075 = vrcp.f32 %v2193_v48  ;;  %v2196_v47 = vadd.f32 1.0, %v5054_v49 }
 0x33e   : > { %v5058_v54 = vpop.eup %5057  ;;  %5077 = vpow2.f32 %v3796_v51 }
 0x33f   : > { %v5060_v56 = vpop.eup %5059  ;;  %v2357_v58 = vpack.c.bf16 %v5058_v54, %v5046_v31  ;;  %5079 = vpow2.f32 %v3794_v53 }
 0x340   : > { %v5062_v59 = vpop.eup %5061  ;;  %v2356_v62 = vpack.c.bf16 %v5060_v56, %v5056_v52  ;;  %5081 = vrcp.f32 %v2198_v57 }
 0x341   : > { %v5064_v63 = vpop.eup %5063  ;;  %5083 = vrcp.f32 %v2196_v47 }
 0x342   : > { %v5066_v0 = vpop.eup %5065  ;;  %4374 = vmatprep.mubr.bf16.mxu1 %v2356_v62 }
 0x343   : > { %v5068_v61 = vpop.eup %5067  ;;  %v2199_v46 = vadd.f32 1.0, %v5066_v0  ;;  %4375 = vmatmul.mubr.bf16.gmra.mrb[144].mxu1 %v2357_v58 }
 0x344   : > { %v5070_v2 = vpop.eup %5069  ;;  %v2197_v10 = vadd.f32 1.0, %v5068_v61 }
 0x345   : > { %v5072_v11 = vpop.eup %5071  ;;  %5085 = vrcp.f32 %v2199_v46  ;;  %v2202_v34 = vadd.f32 1.0, %v5070_v2 }
 0x346   : > { %v5074_v25 = vpop.eup %5073  ;;  %5087 = vrcp.f32 %v2197_v10  ;;  %v2200_v39 = vadd.f32 1.0, %v5072_v11 }
 0x347   : > { %v5076_v30 = vpop.eup %5075  ;;  %v2359_v38 = vpack.c.bf16 %v5074_v25, %v5062_v59  ;;  %5089 = vrcp.f32 %v2202_v34 }
 0x348   : > { %v2358_v42 = vpack.c.bf16 %v5076_v30, %v5064_v63  ;;  %v5078_v55 = vpop.eup %5077  ;;  %5091 = vrcp.f32 %v2200_v39 }
 0x349   : > { %v5080_v60 = vpop.eup %5079  ;;  %v2203_v1 = vadd.f32 1.0, %v5078_v55 }
 0x34a   : > { %4378 = vmatprep.mubr.bf16.mxu1 %v2358_v42  ;;  %v2201_v7 = vadd.f32 1.0, %v5080_v60  ;;  %v5082_v8 = vpop.eup %5081 }
 0x34b   : > { %4379 = vmatmul.mubr.bf16.gmra.mrb[148].mxu1 %v2359_v38  ;;  %5093 = vrcp.f32 %v2203_v1  ;;  %v5084_v13 = vpop.eup %5083 }
 0x34c   : > { %5095 = vrcp.f32 %v2201_v7 }
 0x34f   : > { %v5086_v26 = vpop.eup %5085 }
 0x350   : > { %v5088_v32 = vpop.eup %5087  ;;  %v2361_v37 = vpack.c.bf16 %v5086_v26, %v5082_v8 }
 0x351   : > { %v2360_v44 = vpack.c.bf16 %v5088_v32, %v5084_v13  ;;  %v5090_v3 = vpop.eup %5089 }
 0x352   : > { %v5092_v4 = vpop.eup %5091 }
 0x353   : > { %4382 = vmatprep.mubr.bf16.mxu1 %v2360_v44 }
 0x354   : > { %4383 = vmatmul.mubr.bf16.gmra.mrb[152].mxu1 %v2361_v37 }
 0x355   : > { %v5094_v5 = vpop.eup %5093 }
 0x356   : > { %v5096_v9 = vpop.eup %5095  ;;  %v2363_v12 = vpack.c.bf16 %v5094_v5, %v5090_v3 }
 0x357   : > { %v2362_v15 = vpack.c.bf16 %v5096_v9, %v5092_v4 }
 0x359   : > { %4386 = vmatprep.mubr.bf16.mxu1 %v2362_v15 }
 0x35c   : > { %4387 = vmatmul.mubr.bf16.gmra.mrb[156].mxu1 %v2363_v12 }
 0x3b1   : > { %v4328_v17 = vpop.f32.mrb[96].mxu1 }
 0x3b2   : > { %v2478_v18 = vadd.f32 %v4328_v17, %v5998_v16  ;;  %v2469_v19 = vpop.f32.mrb[97].mxu1 }
 0x3b3   : > { %v2470_v20 = vadd.f32 %v5998_v16, %v2469_v19  ;;  %v4329_v21 = vpop.f32.mrb[98].mxu1 }
 0x3b4   : > { %v3808_v22 = vmul.f32 -1.442695, %v2478_v18  ;;  %v2481_v23 = vadd.f32 %v4329_v21, %v5998_v16  ;;  %v2472_v24 = vpop.f32.mrb[99].mxu1 }
 0x3b5   : > { %v3806_v27 = vmul.f32 -1.442695, %v2470_v20  ;;  %v2473_v28 = vadd.f32 %v5998_v16, %v2472_v24 }
 0x3b6   : > { %5097 = vpow2.f32 %v3808_v22  ;;  %v3809_v29 = vmul.f32 -1.442695, %v2481_v23 }
 0x3b7   : > { %5099 = vpow2.f32 %v3806_v27  ;;  %v3807_v31 = vmul.f32 -1.442695, %v2473_v28 }
 0x3b8   : > { %5101 = vpow2.f32 %v3809_v29 }
 0x3b9   : > { %5103 = vpow2.f32 %v3807_v31  ;;  %v4332_v6 = vpop.f32.mrb[100].mxu1 }
 0x3ba   : > { %v2494_v33 = vadd.f32 %v4332_v6, %v5998_v16  ;;  %v2485_v35 = vpop.f32.mrb[101].mxu1 }
 0x3bb   : > { %v2486_v36 = vadd.f32 %v5998_v16, %v2485_v35  ;;  %v4333_v40 = vpop.f32.mrb[102].mxu1 }
 0x3bc   : > { %v3812_v41 = vmul.f32 -1.442695, %v2494_v33  ;;  %v2497_v43 = vadd.f32 %v4333_v40, %v5998_v16  ;;  %v2488_v45 = vpop.f32.mrb[103].mxu1 }
 0x3bd   : > { %v3810_v48 = vmul.f32 -1.442695, %v2486_v36  ;;  %v2489_v49 = vadd.f32 %v5998_v16, %v2488_v45 }
 0x3be   : > { %5105 = vpow2.f32 %v3812_v41  ;;  %v3813_v51 = vmul.f32 -1.442695, %v2497_v43 }
 0x3bf   : > { %5107 = vpow2.f32 %v3810_v48  ;;  %v3811_v52 = vmul.f32 -1.442695, %v2489_v49 }
 0x3c0   : > { %v5098_v53 = vpop.eup %5097  ;;  %5109 = vpow2.f32 %v3813_v51 }
 0x3c1   : > { %v5100_v54 = vpop.eup %5099  ;;  %v2918_v56 = vadd.f32 1.0, %v5098_v53  ;;  %5111 = vpow2.f32 %v3811_v52 }
 0x3c2   : > { %v5102_v57 = vpop.eup %5101  ;;  %v2916_v58 = vadd.f32 1.0, %v5100_v54  ;;  %v4336_v59 = vpop.f32.mrb[104].mxu1 }
 0x3c3   : > { %v5104_v47 = vpop.eup %5103  ;;  %5113 = vrcp.f32 %v2918_v56  ;;  %v2919_v62 = vadd.f32 1.0, %v5102_v57  ;;  %v2510_v63 = vadd.f32 %v4336_v59, %v5998_v16  ;;  %v2501_v0 = vpop.f32.mrb[105].mxu1 }
 0x3c4   : > { %5115 = vrcp.f32 %v2916_v58  ;;  %v2917_v61 = vadd.f32 1.0, %v5104_v47  ;;  %v2502_v46 = vadd.f32 %v5998_v16, %v2501_v0  ;;  %v4337_v2 = vpop.f32.mrb[106].mxu1 }
 0x3c5   : > { %5117 = vrcp.f32 %v2919_v62  ;;  %v3816_v10 = vmul.f32 -1.442695, %v2510_v63  ;;  %v2513_v11 = vadd.f32 %v4337_v2, %v5998_v16  ;;  %v2504_v14 = vpop.f32.mrb[107].mxu1 }
 0x3c6   : > { %5119 = vrcp.f32 %v2917_v61  ;;  %v3814_v25 = vmul.f32 -1.442695, %v2502_v46  ;;  %v2505_v30 = vadd.f32 %v5998_v16, %v2504_v14 }
 0x3c7   : > { %5121 = vpow2.f32 %v3816_v10  ;;  %v3817_v34 = vmul.f32 -1.442695, %v2513_v11 }
 0x3c8   : > { %v5106_v38 = vpop.eup %5105  ;;  %5123 = vpow2.f32 %v3814_v25  ;;  %v3815_v39 = vmul.f32 -1.442695, %v2505_v30 }
 0x3c9   : > { %v5108_v42 = vpop.eup %5107  ;;  %v2922_v55 = vadd.f32 1.0, %v5106_v38  ;;  %5125 = vpow2.f32 %v3817_v34 }
 0x3ca   : > { %v5110_v60 = vpop.eup %5109  ;;  %v2920_v1 = vadd.f32 1.0, %v5108_v42  ;;  %5127 = vpow2.f32 %v3815_v39  ;;  %v4340_v7 = vpop.f32.mrb[108].mxu1 }
 0x3cb   : > { %v5112_v8 = vpop.eup %5111  ;;  %5129 = vrcp.f32 %v2922_v55  ;;  %v2923_v13 = vadd.f32 1.0, %v5110_v60  ;;  %v2526_v26 = vadd.f32 %v4340_v7, %v5998_v16  ;;  %v2517_v32 = vpop.f32.mrb[109].mxu1 }
 0x3cc   : > { %5131 = vrcp.f32 %v2920_v1  ;;  %v2921_v37 = vadd.f32 1.0, %v5112_v8  ;;  %v2518_v44 = vadd.f32 %v5998_v16, %v2517_v32  ;;  %v4341_v50 = vpop.f32.mrb[110].mxu1 }
 0x3cd   : > { %v5114_v3 = vpop.eup %5113  ;;  %5133 = vrcp.f32 %v2923_v13  ;;  %v3820_v4 = vmul.f32 -1.442695, %v2526_v26  ;;  %v2529_v5 = vadd.f32 %v4341_v50, %v5998_v16  ;;  %v2520_v9 = vpop.f32.mrb[111].mxu1 }
 0x3ce   : > { %v5116_v12 = vpop.eup %5115  ;;  %5135 = vrcp.f32 %v2921_v37  ;;  %v3818_v15 = vmul.f32 -1.442695, %v2518_v44  ;;  %v2521_v17 = vadd.f32 %v5998_v16, %v2520_v9 }
 0x3cf   : > { %v5118_v18 = vpop.eup %5117  ;;  %5137 = vpow2.f32 %v3820_v4  ;;  %v3821_v19 = vmul.f32 -1.442695, %v2529_v5 }
 0x3d0   : > { %v5120_v20 = vpop.eup %5119  ;;  %5139 = vpow2.f32 %v3818_v15  ;;  %v3819_v21 = vmul.f32 -1.442695, %v2521_v17  ;;  %v3109_v22 = vpack.c.bf16 %v5118_v18, %v5114_v3 }
 0x3d1   : > { %v5122_v23 = vpop.eup %5121  ;;  %5141 = vpow2.f32 %v3821_v19  ;;  %v3108_v24 = vpack.c.bf16 %v5120_v20, %v5116_v12 }
 0x3d2   : > { %v5124_v27 = vpop.eup %5123  ;;  %v2926_v28 = vadd.f32 1.0, %v5122_v23  ;;  %5143 = vpow2.f32 %v3819_v21 }
 0x3d3   : > { %v5126_v29 = vpop.eup %5125  ;;  %v2924_v31 = vadd.f32 1.0, %v5124_v27  ;;  %v4344_v6 = vpop.f32.mrb[112].mxu1  ;;  %4406 = vmatprep.mubr.bf16.mxu0 %v3108_v24 }
 0x3d4   : > { %v5128_v33 = vpop.eup %5127  ;;  %5145 = vrcp.f32 %v2926_v28  ;;  %v2927_v35 = vadd.f32 1.0, %v5126_v29  ;;  %v2542_v36 = vadd.f32 %v4344_v6, %v5998_v16  ;;  %v2533_v40 = vpop.f32.mrb[113].mxu1  ;;  %4407 = vmatmul.mubr.bf16.vlgmr.msra.gmra.mrb[96].mxu0 %v3109_v22 }
 0x3d5   : > { %v5130_v41 = vpop.eup %5129  ;;  %5147 = vrcp.f32 %v2924_v31  ;;  %v2925_v43 = vadd.f32 1.0, %v5128_v33  ;;  %v2534_v45 = vadd.f32 %v5998_v16, %v2533_v40  ;;  %v4345_v48 = vpop.f32.mrb[114].mxu1 }
 0x3d6   : > { %v5132_v49 = vpop.eup %5131  ;;  %5149 = vrcp.f32 %v2927_v35  ;;  %v3824_v51 = vmul.f32 -1.442695, %v2542_v36  ;;  %v2545_v52 = vadd.f32 %v4345_v48, %v5998_v16  ;;  %v2536_v53 = vpop.f32.mrb[115].mxu1 }
 0x3d7   : > { %v5134_v54 = vpop.eup %5133  ;;  %5151 = vrcp.f32 %v2925_v43  ;;  %v3822_v56 = vmul.f32 -1.442695, %v2534_v45  ;;  %v2537_v57 = vadd.f32 %v5998_v16, %v2536_v53 }
 0x3d8   : > { %v5136_v58 = vpop.eup %5135  ;;  %5153 = vpow2.f32 %v3824_v51  ;;  %v3825_v59 = vmul.f32 -1.442695, %v2545_v52  ;;  %v3111_v47 = vpack.c.bf16 %v5134_v54, %v5130_v41 }
 0x3d9   : > { %v5138_v62 = vpop.eup %5137  ;;  %5155 = vpow2.f32 %v3822_v56  ;;  %v3823_v63 = vmul.f32 -1.442695, %v2537_v57  ;;  %v3110_v0 = vpack.c.bf16 %v5136_v58, %v5132_v49 }
 0x3da   : > { %v5140_v61 = vpop.eup %5139  ;;  %v2930_v46 = vadd.f32 1.0, %v5138_v62  ;;  %5157 = vpow2.f32 %v3825_v59 }
 0x3db   : > { %v5142_v2 = vpop.eup %5141  ;;  %v2928_v10 = vadd.f32 1.0, %v5140_v61  ;;  %5159 = vpow2.f32 %v3823_v63  ;;  %v4348_v11 = vpop.f32.mrb[116].mxu1  ;;  %4410 = vmatprep.mubr.bf16.mxu0 %v3110_v0 }
 0x3dc   : > { %v5144_v14 = vpop.eup %5143  ;;  %5161 = vrcp.f32 %v2930_v46  ;;  %v2931_v25 = vadd.f32 1.0, %v5142_v2  ;;  %v2558_v30 = vadd.f32 %v4348_v11, %v5998_v16  ;;  %v2549_v34 = vpop.f32.mrb[117].mxu1  ;;  %4411 = vmatmul.mubr.bf16.gmra.mrb[100].mxu0 %v3111_v47 }
 0x3dd   : > { %5163 = vrcp.f32 %v2928_v10  ;;  %v2929_v38 = vadd.f32 1.0, %v5144_v14  ;;  %v2550_v39 = vadd.f32 %v5998_v16, %v2549_v34  ;;  %v4349_v42 = vpop.f32.mrb[118].mxu1 }
 0x3de   : > { %v5146_v55 = vpop.eup %5145  ;;  %5165 = vrcp.f32 %v2931_v25  ;;  %v3828_v60 = vmul.f32 -1.442695, %v2558_v30  ;;  %v2561_v1 = vadd.f32 %v4349_v42, %v5998_v16  ;;  %v2552_v7 = vpop.f32.mrb[119].mxu1 }
 0x3df   : > { %v5148_v8 = vpop.eup %5147  ;;  %5167 = vrcp.f32 %v2929_v38  ;;  %v3826_v13 = vmul.f32 -1.442695, %v2550_v39  ;;  %v2553_v26 = vadd.f32 %v5998_v16, %v2552_v7 }
 0x3e0   : > { %v5150_v32 = vpop.eup %5149  ;;  %5169 = vpow2.f32 %v3828_v60  ;;  %v3829_v37 = vmul.f32 -1.442695, %v2561_v1 }
 0x3e1   : > { %v5152_v44 = vpop.eup %5151  ;;  %5171 = vpow2.f32 %v3826_v13  ;;  %v3827_v50 = vmul.f32 -1.442695, %v2553_v26  ;;  %v3113_v3 = vpack.c.bf16 %v5150_v32, %v5146_v55 }
 0x3e2   : > { %v5154_v4 = vpop.eup %5153  ;;  %5173 = vpow2.f32 %v3829_v37  ;;  %v3112_v5 = vpack.c.bf16 %v5152_v44, %v5148_v8 }
 0x3e3   : > { %v5156_v9 = vpop.eup %5155  ;;  %v2934_v12 = vadd.f32 1.0, %v5154_v4  ;;  %5175 = vpow2.f32 %v3827_v50 }
 0x3e4   : > { %v5158_v15 = vpop.eup %5157  ;;  %v2932_v17 = vadd.f32 1.0, %v5156_v9  ;;  %v4352_v18 = vpop.f32.mrb[120].mxu1  ;;  %4414 = vmatprep.mubr.bf16.mxu0 %v3112_v5 }
 0x3e5   : > { %v5160_v19 = vpop.eup %5159  ;;  %5177 = vrcp.f32 %v2934_v12  ;;  %v2935_v20 = vadd.f32 1.0, %v5158_v15  ;;  %v2574_v21 = vadd.f32 %v4352_v18, %v5998_v16  ;;  %v2565_v22 = vpop.f32.mrb[121].mxu1  ;;  %4415 = vmatmul.mubr.bf16.gmra.mrb[104].mxu0 %v3113_v3 }
 0x3e6   : > { %v5162_v23 = vpop.eup %5161  ;;  %5179 = vrcp.f32 %v2932_v17  ;;  %v2933_v24 = vadd.f32 1.0, %v5160_v19  ;;  %v2566_v27 = vadd.f32 %v5998_v16, %v2565_v22  ;;  %v4353_v28 = vpop.f32.mrb[122].mxu1 }
 0x3e7   : > { %v5164_v29 = vpop.eup %5163  ;;  %5181 = vrcp.f32 %v2935_v20  ;;  %v3832_v31 = vmul.f32 -1.442695, %v2574_v21  ;;  %v2577_v6 = vadd.f32 %v4353_v28, %v5998_v16  ;;  %v2568_v33 = vpop.f32.mrb[123].mxu1 }
 0x3e8   : > { %v5166_v35 = vpop.eup %5165  ;;  %5183 = vrcp.f32 %v2933_v24  ;;  %v3830_v36 = vmul.f32 -1.442695, %v2566_v27  ;;  %v2569_v40 = vadd.f32 %v5998_v16, %v2568_v33 }
 0x3e9   : > { %v5168_v41 = vpop.eup %5167  ;;  %5185 = vpow2.f32 %v3832_v31  ;;  %v3833_v43 = vmul.f32 -1.442695, %v2577_v6  ;;  %v3115_v45 = vpack.c.bf16 %v5166_v35, %v5162_v23 }
 0x3ea   : > { %v5170_v48 = vpop.eup %5169  ;;  %5187 = vpow2.f32 %v3830_v36  ;;  %v3831_v49 = vmul.f32 -1.442695, %v2569_v40  ;;  %v3114_v51 = vpack.c.bf16 %v5168_v41, %v5164_v29 }
 0x3eb   : > { %v5172_v52 = vpop.eup %5171  ;;  %v2938_v53 = vadd.f32 1.0, %v5170_v48  ;;  %5189 = vpow2.f32 %v3833_v43 }
 0x3ec   : > { %v5174_v54 = vpop.eup %5173  ;;  %v2936_v56 = vadd.f32 1.0, %v5172_v52  ;;  %5191 = vpow2.f32 %v3831_v49  ;;  %v4356_v57 = vpop.f32.mrb[124].mxu1  ;;  %4418 = vmatprep.mubr.bf16.mxu0 %v3114_v51 }
 0x3ed   : > { %v5176_v58 = vpop.eup %5175  ;;  %5193 = vrcp.f32 %v2938_v53  ;;  %v2939_v59 = vadd.f32 1.0, %v5174_v54  ;;  %v2590_v47 = vadd.f32 %v4356_v57, %v5998_v16  ;;  %v2581_v62 = vpop.f32.mrb[125].mxu1  ;;  %4419 = vmatmul.mubr.bf16.gmra.mrb[108].mxu0 %v3115_v45 }
 0x3ee   : > { %5195 = vrcp.f32 %v2936_v56  ;;  %v2937_v63 = vadd.f32 1.0, %v5176_v58  ;;  %v2582_v0 = vadd.f32 %v5998_v16, %v2581_v62  ;;  %v4357_v61 = vpop.f32.mrb[126].mxu1 }
 0x3ef   : > { %v5178_v46 = vpop.eup %5177  ;;  %5197 = vrcp.f32 %v2939_v59  ;;  %v3836_v2 = vmul.f32 -1.442695, %v2590_v47  ;;  %v2593_v10 = vadd.f32 %v4357_v61, %v5998_v16  ;;  %v2584_v11 = vpop.f32.mrb[127].mxu1 }
 0x3f0   : > { %v5180_v14 = vpop.eup %5179  ;;  %5199 = vrcp.f32 %v2937_v63  ;;  %v3834_v25 = vmul.f32 -1.442695, %v2582_v0  ;;  %v2585_v30 = vadd.f32 %v5998_v16, %v2584_v11 }
 0x3f1   : > { %v5182_v34 = vpop.eup %5181  ;;  %5201 = vpow2.f32 %v3836_v2  ;;  %v3837_v38 = vmul.f32 -1.442695, %v2593_v10 }
 0x3f2   : > { %v5184_v39 = vpop.eup %5183  ;;  %5203 = vpow2.f32 %v3834_v25  ;;  %v3835_v42 = vmul.f32 -1.442695, %v2585_v30  ;;  %v3117_v55 = vpack.c.bf16 %v5182_v34, %v5178_v46 }
 0x3f3   : > { %v5186_v60 = vpop.eup %5185  ;;  %5205 = vpow2.f32 %v3837_v38  ;;  %v3116_v1 = vpack.c.bf16 %v5184_v39, %v5180_v14 }
 0x3f4   : > { %v5188_v7 = vpop.eup %5187  ;;  %v2942_v8 = vadd.f32 1.0, %v5186_v60  ;;  %5207 = vpow2.f32 %v3835_v42 }
 0x3f5   : > { %v5190_v13 = vpop.eup %5189  ;;  %v2940_v26 = vadd.f32 1.0, %v5188_v7  ;;  %v4360_v32 = vpop.f32.mrb[128].mxu1  ;;  %4422 = vmatprep.mubr.bf16.mxu0 %v3116_v1 }
 0x3f6   : > { %v5192_v37 = vpop.eup %5191  ;;  %5209 = vrcp.f32 %v2942_v8  ;;  %v2943_v44 = vadd.f32 1.0, %v5190_v13  ;;  %v2606_v50 = vadd.f32 %v4360_v32, %v5998_v16  ;;  %v2597_v3 = vpop.f32.mrb[129].mxu1  ;;  %4423 = vmatmul.mubr.bf16.gmra.mrb[112].mxu0 %v3117_v55 }
 0x3f7   : > { %v5194_v4 = vpop.eup %5193  ;;  %5211 = vrcp.f32 %v2940_v26  ;;  %v2941_v5 = vadd.f32 1.0, %v5192_v37  ;;  %v2598_v9 = vadd.f32 %v5998_v16, %v2597_v3  ;;  %v4361_v12 = vpop.f32.mrb[130].mxu1 }
 0x3f8   : > { %v5196_v15 = vpop.eup %5195  ;;  %5213 = vrcp.f32 %v2943_v44  ;;  %v3840_v17 = vmul.f32 -1.442695, %v2606_v50  ;;  %v2609_v18 = vadd.f32 %v4361_v12, %v5998_v16  ;;  %v2600_v19 = vpop.f32.mrb[131].mxu1 }
 0x3f9   : > { %v5198_v20 = vpop.eup %5197  ;;  %5215 = vrcp.f32 %v2941_v5  ;;  %v3838_v21 = vmul.f32 -1.442695, %v2598_v9  ;;  %v2601_v22 = vadd.f32 %v5998_v16, %v2600_v19 }
 0x3fa   : > { %v5200_v23 = vpop.eup %5199  ;;  %5217 = vpow2.f32 %v3840_v17  ;;  %v3841_v24 = vmul.f32 -1.442695, %v2609_v18  ;;  %v3119_v27 = vpack.c.bf16 %v5198_v20, %v5194_v4 }
 0x3fb   : > { %v5202_v28 = vpop.eup %5201  ;;  %5219 = vpow2.f32 %v3838_v21  ;;  %v3839_v29 = vmul.f32 -1.442695, %v2601_v22  ;;  %v3118_v31 = vpack.c.bf16 %v5200_v23, %v5196_v15 }
 0x3fc   : > { %v5204_v6 = vpop.eup %5203  ;;  %v2946_v33 = vadd.f32 1.0, %v5202_v28  ;;  %5221 = vpow2.f32 %v3841_v24 }
 0x3fd   : > { %v5206_v35 = vpop.eup %5205  ;;  %v2944_v36 = vadd.f32 1.0, %v5204_v6  ;;  %5223 = vpow2.f32 %v3839_v29  ;;  %v4364_v40 = vpop.f32.mrb[132].mxu1  ;;  %4426 = vmatprep.mubr.bf16.mxu0 %v3118_v31 }
 0x3fe   : > { %v5208_v41 = vpop.eup %5207  ;;  %5225 = vrcp.f32 %v2946_v33  ;;  %v2947_v43 = vadd.f32 1.0, %v5206_v35  ;;  %v2622_v45 = vadd.f32 %v4364_v40, %v5998_v16  ;;  %v2613_v48 = vpop.f32.mrb[133].mxu1  ;;  %4427 = vmatmul.mubr.bf16.gmra.mrb[116].mxu0 %v3119_v27 }
 0x3ff   : > { %5227 = vrcp.f32 %v2944_v36  ;;  %v2945_v49 = vadd.f32 1.0, %v5208_v41  ;;  %v2614_v51 = vadd.f32 %v5998_v16, %v2613_v48  ;;  %v4365_v52 = vpop.f32.mrb[134].mxu1 }
 0x400   : > { %v5210_v53 = vpop.eup %5209  ;;  %5229 = vrcp.f32 %v2947_v43  ;;  %v3844_v54 = vmul.f32 -1.442695, %v2622_v45  ;;  %v2625_v56 = vadd.f32 %v4365_v52, %v5998_v16  ;;  %v2616_v57 = vpop.f32.mrb[135].mxu1 }
 0x401   : > { %v5212_v58 = vpop.eup %5211  ;;  %5231 = vrcp.f32 %v2945_v49  ;;  %v3842_v59 = vmul.f32 -1.442695, %v2614_v51  ;;  %v2617_v47 = vadd.f32 %v5998_v16, %v2616_v57 }
 0x402   : > { %v5214_v62 = vpop.eup %5213  ;;  %5233 = vpow2.f32 %v3844_v54  ;;  %v3845_v63 = vmul.f32 -1.442695, %v2625_v56 }
 0x403   : > { %v5216_v0 = vpop.eup %5215  ;;  %5235 = vpow2.f32 %v3842_v59  ;;  %v3843_v61 = vmul.f32 -1.442695, %v2617_v47  ;;  %v3121_v46 = vpack.c.bf16 %v5214_v62, %v5210_v53 }
 0x404   : > { %v5218_v2 = vpop.eup %5217  ;;  %5237 = vpow2.f32 %v3845_v63  ;;  %v3120_v10 = vpack.c.bf16 %v5216_v0, %v5212_v58 }
 0x405   : > { %v5220_v11 = vpop.eup %5219  ;;  %v2950_v14 = vadd.f32 1.0, %v5218_v2  ;;  %5239 = vpow2.f32 %v3843_v61  ;;  %v4368_v25 = vpop.f32.mrb[136].mxu1 }
 0x406   : > { %v5222_v30 = vpop.eup %5221  ;;  %v2948_v34 = vadd.f32 1.0, %v5220_v11  ;;  %v2638_v38 = vadd.f32 %v4368_v25, %v5998_v16  ;;  %v2629_v39 = vpop.f32.mrb[137].mxu1  ;;  %4430 = vmatprep.mubr.bf16.mxu0 %v3120_v10 }
 0x407   : > { %v5224_v42 = vpop.eup %5223  ;;  %5241 = vrcp.f32 %v2950_v14  ;;  %v2951_v55 = vadd.f32 1.0, %v5222_v30  ;;  %v2630_v60 = vadd.f32 %v5998_v16, %v2629_v39  ;;  %v4369_v1 = vpop.f32.mrb[138].mxu1  ;;  %4431 = vmatmul.mubr.bf16.gmra.mrb[120].mxu0 %v3121_v46 }
 0x408   : > { %v5226_v7 = vpop.eup %5225  ;;  %5243 = vrcp.f32 %v2948_v34  ;;  %v2949_v8 = vadd.f32 1.0, %v5224_v42  ;;  %v3848_v13 = vmul.f32 -1.442695, %v2638_v38  ;;  %v2641_v26 = vadd.f32 %v4369_v1, %v5998_v16  ;;  %v2632_v32 = vpop.f32.mrb[139].mxu1 }
 0x409   : > { %v5228_v37 = vpop.eup %5227  ;;  %5245 = vrcp.f32 %v2951_v55  ;;  %v3846_v44 = vmul.f32 -1.442695, %v2630_v60  ;;  %v2633_v50 = vadd.f32 %v5998_v16, %v2632_v32 }
 0x40a   : > { %v5230_v3 = vpop.eup %5229  ;;  %5247 = vrcp.f32 %v2949_v8  ;;  %v3849_v4 = vmul.f32 -1.442695, %v2641_v26 }
 0x40b   : > { %v5232_v5 = vpop.eup %5231  ;;  %5249 = vpow2.f32 %v3848_v13  ;;  %v3847_v9 = vmul.f32 -1.442695, %v2633_v50  ;;  %v3123_v12 = vpack.c.bf16 %v5230_v3, %v5226_v7 }
 0x40c   : > { %v5234_v15 = vpop.eup %5233  ;;  %5251 = vpow2.f32 %v3846_v44  ;;  %v3122_v17 = vpack.c.bf16 %v5232_v5, %v5228_v37 }
 0x40d   : > { %v5236_v18 = vpop.eup %5235  ;;  %v2954_v19 = vadd.f32 1.0, %v5234_v15  ;;  %5253 = vpow2.f32 %v3849_v4 }
 0x40e   : > { %v5238_v20 = vpop.eup %5237  ;;  %v2952_v21 = vadd.f32 1.0, %v5236_v18  ;;  %5255 = vpow2.f32 %v3847_v9  ;;  %v4372_v22 = vpop.f32.mrb[140].mxu1  ;;  %4434 = vmatprep.mubr.bf16.mxu0 %v3122_v17 }
 0x40f   : > { %v5240_v23 = vpop.eup %5239  ;;  %5257 = vrcp.f32 %v2954_v19  ;;  %v2955_v24 = vadd.f32 1.0, %v5238_v20  ;;  %v2654_v27 = vadd.f32 %v4372_v22, %v5998_v16  ;;  %v2645_v28 = vpop.f32.mrb[141].mxu1  ;;  %4435 = vmatmul.mubr.bf16.gmra.mrb[124].mxu0 %v3123_v12 }
 0x410   : > { %5259 = vrcp.f32 %v2952_v21  ;;  %v2953_v29 = vadd.f32 1.0, %v5240_v23  ;;  %v2646_v31 = vadd.f32 %v5998_v16, %v2645_v28  ;;  %v4373_v6 = vpop.f32.mrb[142].mxu1 }
 0x411   : > { %v5242_v33 = vpop.eup %5241  ;;  %5261 = vrcp.f32 %v2955_v24  ;;  %v3852_v35 = vmul.f32 -1.442695, %v2654_v27  ;;  %v2657_v36 = vadd.f32 %v4373_v6, %v5998_v16  ;;  %v2648_v40 = vpop.f32.mrb[143].mxu1 }
 0x412   : > { %v5244_v41 = vpop.eup %5243  ;;  %5263 = vrcp.f32 %v2953_v29  ;;  %v3850_v43 = vmul.f32 -1.442695, %v2646_v31  ;;  %v2649_v45 = vadd.f32 %v5998_v16, %v2648_v40 }
 0x413   : > { %v5246_v48 = vpop.eup %5245  ;;  %5265 = vpow2.f32 %v3852_v35  ;;  %v3853_v49 = vmul.f32 -1.442695, %v2657_v36 }
 0x414   : > { %v5248_v51 = vpop.eup %5247  ;;  %5267 = vpow2.f32 %v3850_v43  ;;  %v3851_v52 = vmul.f32 -1.442695, %v2649_v45  ;;  %v3125_v53 = vpack.c.bf16 %v5246_v48, %v5242_v33 }
 0x415   : > { %v5250_v54 = vpop.eup %5249  ;;  %5269 = vpow2.f32 %v3853_v49  ;;  %v3124_v56 = vpack.c.bf16 %v5248_v51, %v5244_v41 }
 0x416   : > { %v5252_v57 = vpop.eup %5251  ;;  %v2958_v58 = vadd.f32 1.0, %v5250_v54  ;;  %5271 = vpow2.f32 %v3851_v52  ;;  %v4376_v59 = vpop.f32.mrb[144].mxu1 }
 0x417   : > { %v5254_v47 = vpop.eup %5253  ;;  %v2956_v62 = vadd.f32 1.0, %v5252_v57  ;;  %v2670_v63 = vadd.f32 %v4376_v59, %v5998_v16  ;;  %v2661_v0 = vpop.f32.mrb[145].mxu1  ;;  %4438 = vmatprep.mubr.bf16.mxu0 %v3124_v56 }
 0x418   : > { %v5256_v61 = vpop.eup %5255  ;;  %5273 = vrcp.f32 %v2958_v58  ;;  %v2959_v46 = vadd.f32 1.0, %v5254_v47  ;;  %v2662_v2 = vadd.f32 %v5998_v16, %v2661_v0  ;;  %v4377_v10 = vpop.f32.mrb[146].mxu1  ;;  %4439 = vmatmul.mubr.bf16.gmra.mrb[128].mxu0 %v3125_v53 }
 0x419   : > { %v5258_v11 = vpop.eup %5257  ;;  %5275 = vrcp.f32 %v2956_v62  ;;  %v2957_v14 = vadd.f32 1.0, %v5256_v61  ;;  %v3856_v25 = vmul.f32 -1.442695, %v2670_v63  ;;  %v2673_v30 = vadd.f32 %v4377_v10, %v5998_v16  ;;  %v2664_v34 = vpop.f32.mrb[147].mxu1 }
 0x41a   : > { %v5260_v38 = vpop.eup %5259  ;;  %5277 = vrcp.f32 %v2959_v46  ;;  %v3854_v39 = vmul.f32 -1.442695, %v2662_v2  ;;  %v2665_v42 = vadd.f32 %v5998_v16, %v2664_v34 }
 0x41b   : > { %v5262_v55 = vpop.eup %5261  ;;  %5279 = vrcp.f32 %v2957_v14  ;;  %v3857_v60 = vmul.f32 -1.442695, %v2673_v30 }
 0x41c   : > { %v5264_v1 = vpop.eup %5263  ;;  %5281 = vpow2.f32 %v3856_v25  ;;  %v3855_v7 = vmul.f32 -1.442695, %v2665_v42  ;;  %v3127_v8 = vpack.c.bf16 %v5262_v55, %v5258_v11 }
 0x41d   : > { %v5266_v13 = vpop.eup %5265  ;;  %5283 = vpow2.f32 %v3854_v39  ;;  %v3126_v26 = vpack.c.bf16 %v5264_v1, %v5260_v38 }
 0x41e   : > { %v5268_v32 = vpop.eup %5267  ;;  %v2962_v37 = vadd.f32 1.0, %v5266_v13  ;;  %5285 = vpow2.f32 %v3857_v60  ;;  %v4380_v44 = vpop.f32.mrb[148].mxu1 }
 0x41f   : > { %v5270_v50 = vpop.eup %5269  ;;  %v2960_v3 = vadd.f32 1.0, %v5268_v32  ;;  %5287 = vpow2.f32 %v3855_v7  ;;  %v2686_v4 = vadd.f32 %v4380_v44, %v5998_v16  ;;  %v2677_v5 = vpop.f32.mrb[149].mxu1  ;;  %4442 = vmatprep.mubr.bf16.mxu0 %v3126_v26 }
 0x420   : > { %v5272_v9 = vpop.eup %5271  ;;  %5289 = vrcp.f32 %v2962_v37  ;;  %v2963_v12 = vadd.f32 1.0, %v5270_v50  ;;  %v2678_v15 = vadd.f32 %v5998_v16, %v2677_v5  ;;  %v4381_v17 = vpop.f32.mrb[150].mxu1  ;;  %4443 = vmatmul.mubr.bf16.gmra.mrb[132].mxu0 %v3127_v8  ;;  %v5354_v5 = vld [vmem:[%s6264_s8] ss:$0 sm:$0xff] }
 0x421   : > { %5291 = vrcp.f32 %v2960_v3  ;;  %v2961_v18 = vadd.f32 1.0, %v5272_v9  ;;  %v3860_v19 = vmul.f32 -1.442695, %v2686_v4  ;;  %v2689_v20 = vadd.f32 %v4381_v17, %v5998_v16  ;;  %v2680_v21 = vpop.f32.mrb[151].mxu1 }
 0x422   : > { %v5274_v22 = vpop.eup %5273  ;;  %5293 = vrcp.f32 %v2963_v12  ;;  %v3858_v23 = vmul.f32 -1.442695, %v2678_v15  ;;  %v2681_v24 = vadd.f32 %v5998_v16, %v2680_v21 }
 0x423   : > { %v5276_v27 = vpop.eup %5275  ;;  %5295 = vrcp.f32 %v2961_v18  ;;  %v3861_v28 = vmul.f32 -1.442695, %v2689_v20 }
 0x424   : > { %v5278_v29 = vpop.eup %5277  ;;  %5297 = vpow2.f32 %v3860_v19  ;;  %v3859_v31 = vmul.f32 -1.442695, %v2681_v24 }
 0x425   : > { %v5280_v6 = vpop.eup %5279  ;;  %5299 = vpow2.f32 %v3858_v23  ;;  %v3129_v33 = vpack.c.bf16 %v5278_v29, %v5274_v22 }
 0x426   : > { %v5282_v35 = vpop.eup %5281  ;;  %5301 = vpow2.f32 %v3861_v28  ;;  %v3128_v36 = vpack.c.bf16 %v5280_v6, %v5276_v27 }
 0x427   : > { %v5284_v40 = vpop.eup %5283  ;;  %v2966_v41 = vadd.f32 1.0, %v5282_v35  ;;  %5303 = vpow2.f32 %v3859_v31  ;;  %v4384_v43 = vpop.f32.mrb[152].mxu1 }
 0x428   : > { %v5286_v45 = vpop.eup %5285  ;;  %v2964_v48 = vadd.f32 1.0, %v5284_v40  ;;  %v2702_v49 = vadd.f32 %v4384_v43, %v5998_v16  ;;  %v2693_v51 = vpop.f32.mrb[153].mxu1  ;;  %4446 = vmatprep.mubr.bf16.mxu0 %v3128_v36 }
 0x429   : > { %v5288_v52 = vpop.eup %5287  ;;  %5305 = vrcp.f32 %v2966_v41  ;;  %v2967_v53 = vadd.f32 1.0, %v5286_v45  ;;  %v2694_v54 = vadd.f32 %v5998_v16, %v2693_v51  ;;  %v4385_v56 = vpop.f32.mrb[154].mxu1  ;;  %4447 = vmatmul.mubr.bf16.gmra.mrb[136].mxu0 %v3129_v33 }
 0x42a   : > { %v5290_v57 = vpop.eup %5289  ;;  %5307 = vrcp.f32 %v2964_v48  ;;  %v2965_v58 = vadd.f32 1.0, %v5288_v52  ;;  %v3864_v59 = vmul.f32 -1.442695, %v2702_v49  ;;  %v2705_v47 = vadd.f32 %v4385_v56, %v5998_v16  ;;  %v2696_v62 = vpop.f32.mrb[155].mxu1 }
 0x42b   : > { %v5292_v63 = vpop.eup %5291  ;;  %5309 = vrcp.f32 %v2967_v53  ;;  %v3862_v0 = vmul.f32 -1.442695, %v2694_v54  ;;  %v2697_v61 = vadd.f32 %v5998_v16, %v2696_v62 }
 0x42c   : > { %v5294_v46 = vpop.eup %5293  ;;  %5311 = vrcp.f32 %v2965_v58  ;;  %v3865_v2 = vmul.f32 -1.442695, %v2705_v47 }
 0x42d   : > { %v5296_v10 = vpop.eup %5295  ;;  %5313 = vpow2.f32 %v3864_v59  ;;  %v3863_v11 = vmul.f32 -1.442695, %v2697_v61  ;;  %v3131_v14 = vpack.c.bf16 %v5294_v46, %v5290_v57 }
 0x42e   : > { %v5298_v25 = vpop.eup %5297  ;;  %5315 = vpow2.f32 %v3862_v0  ;;  %v3130_v30 = vpack.c.bf16 %v5296_v10, %v5292_v63 }
 0x42f   : > { %v5300_v34 = vpop.eup %5299  ;;  %v2970_v38 = vadd.f32 1.0, %v5298_v25  ;;  %5317 = vpow2.f32 %v3865_v2  ;;  %v4388_v39 = vpop.f32.mrb[156].mxu1 }
 0x430   : > { %v5302_v42 = vpop.eup %5301  ;;  %v2968_v55 = vadd.f32 1.0, %v5300_v34  ;;  %5319 = vpow2.f32 %v3863_v11  ;;  %v2718_v60 = vadd.f32 %v4388_v39, %v5998_v16  ;;  %v2709_v1 = vpop.f32.mrb[157].mxu1  ;;  %4450 = vmatprep.mubr.bf16.mxu0 %v3130_v30  ;;  %v6072_v11 = vld [vmem:[%s6266_s10] ss:$0 sm:$0xff] }
 0x431   : > { %v5304_v7 = vpop.eup %5303  ;;  %5321 = vrcp.f32 %v2970_v38  ;;  %v2971_v8 = vadd.f32 1.0, %v5302_v42  ;;  %v2710_v13 = vadd.f32 %v5998_v16, %v2709_v1  ;;  %v4389_v26 = vpop.f32.mrb[158].mxu1  ;;  %4451 = vmatmul.mubr.bf16.gmra.mrb[140].mxu0 %v3131_v14 }
 0x432   : > { %5323 = vrcp.f32 %v2968_v55  ;;  %v2969_v32 = vadd.f32 1.0, %v5304_v7  ;;  %v3868_v37 = vmul.f32 -1.442695, %v2718_v60  ;;  %v2721_v44 = vadd.f32 %v4389_v26, %v5998_v16  ;;  %v2712_v50 = vpop.f32.mrb[159].mxu1 }
 0x433   : > { %v5306_v3 = vpop.eup %5305  ;;  %5325 = vrcp.f32 %v2971_v8  ;;  %v3866_v4 = vmul.f32 -1.442695, %v2710_v13  ;;  %v2713_v9 = vadd.f32 %v5354_v5, %v2712_v50 }
 0x434   : > { %v5308_v12 = vpop.eup %5307  ;;  %5327 = vrcp.f32 %v2969_v32  ;;  %v3869_v15 = vmul.f32 -1.442695, %v2721_v44 }
 0x435   : > { %v5310_v17 = vpop.eup %5309  ;;  %5329 = vpow2.f32 %v3868_v37  ;;  %v3867_v18 = vmul.f32 -1.442695, %v2713_v9 }
 0x436   : > { %v5312_v19 = vpop.eup %5311  ;;  %5331 = vpow2.f32 %v3866_v4  ;;  %v3133_v20 = vpack.c.bf16 %v5310_v17, %v5306_v3 }
 0x437   : > { %v5314_v21 = vpop.eup %5313  ;;  %5333 = vpow2.f32 %v3869_v15  ;;  %v3132_v16 = vpack.c.bf16 %v5312_v19, %v5308_v12 }
 0x438   : > { %v5316_v22 = vpop.eup %5315  ;;  %v2974_v23 = vadd.f32 1.0, %v5314_v21  ;;  %5335 = vpow2.f32 %v3867_v18 }
 0x439   : > { %v5318_v24 = vpop.eup %5317  ;;  %v2972_v27 = vadd.f32 1.0, %v5316_v22  ;;  %4454 = vmatprep.mubr.bf16.mxu0 %v3132_v16 }
 0x43a   : > { %v5320_v28 = vpop.eup %5319  ;;  %5337 = vrcp.f32 %v2974_v23  ;;  %v2975_v29 = vadd.f32 1.0, %v5318_v24  ;;  %4455 = vmatmul.mubr.bf16.gmra.mrb[144].mxu0 %v3133_v20 }
 0x43b   : > { %v5322_v31 = vpop.eup %5321  ;;  %5339 = vrcp.f32 %v2972_v27  ;;  %v2973_v6 = vadd.f32 1.0, %v5320_v28 }
 0x43c   : > { %v5324_v33 = vpop.eup %5323  ;;  %5341 = vrcp.f32 %v2975_v29 }
 0x43d   : > { %v5326_v35 = vpop.eup %5325  ;;  %5343 = vrcp.f32 %v2973_v6 }
 0x43e   : > { %v5328_v36 = vpop.eup %5327  ;;  %v3135_v40 = vpack.c.bf16 %v5326_v35, %v5322_v31 }
 0x43f   : > { %v5330_v41 = vpop.eup %5329  ;;  %v3134_v43 = vpack.c.bf16 %v5328_v36, %v5324_v33 }
 0x440   : > { %v5332_v45 = vpop.eup %5331  ;;  %v2978_v48 = vadd.f32 1.0, %v5330_v41 }
 0x441   : > { %v5334_v49 = vpop.eup %5333  ;;  %v2976_v51 = vadd.f32 1.0, %v5332_v45  ;;  %4458 = vmatprep.mubr.bf16.mxu0 %v3134_v43 }
 0x442   : > { %v5336_v52 = vpop.eup %5335  ;;  %5345 = vrcp.f32 %v2978_v48  ;;  %v2979_v53 = vadd.f32 1.0, %v5334_v49  ;;  %4459 = vmatmul.mubr.bf16.gmra.mrb[148].mxu0 %v3135_v40 }
 0x443   : > { %5347 = vrcp.f32 %v2976_v51  ;;  %v2977_v54 = vadd.f32 1.0, %v5336_v52 }
 0x444   : > { %v5338_v56 = vpop.eup %5337  ;;  %5349 = vrcp.f32 %v2979_v53 }
 0x445   : > { %v5340_v57 = vpop.eup %5339  ;;  %5351 = vrcp.f32 %v2977_v54 }
 0x446   : > { %v5342_v58 = vpop.eup %5341 }
 0x447   : > { %v5344_v59 = vpop.eup %5343  ;;  %v3137_v47 = vpack.c.bf16 %v5342_v58, %v5338_v56 }
 0x448   : > { %v3136_v62 = vpack.c.bf16 %v5344_v59, %v5340_v57 }
 0x44a   : > { %4462 = vmatprep.mubr.bf16.mxu0 %v3136_v62 }
 0x44b   : > { %4463 = vmatmul.mubr.bf16.gmra.mrb[152].mxu0 %v3137_v47 }
 0x44c   : > { %v5346_v63 = vpop.eup %5345 }
 0x44d   : > { %v5348_v0 = vpop.eup %5347 }
 0x44e   : > { %v5350_v61 = vpop.eup %5349 }
 0x44f   : > { %v5352_v46 = vpop.eup %5351  ;;  %v3139_v2 = vpack.c.bf16 %v5350_v61, %v5346_v63 }
 0x450   : > { %v3138_v10 = vpack.c.bf16 %v5352_v46, %v5348_v0 }
 0x452   : > { %4466 = vmatprep.mubr.bf16.mxu0 %v3138_v10 }
 0x453   : > { %4467 = vmatmul.mubr.bf16.gmra.mrb[156].mxu0 %v3139_v2 }
 0x4a7   : > { %v4408_v14 = vpop.f32.mrb[96].mxu0 }
 0x4a8   : > { %v3254_v25 = vadd.f32 %v4408_v14, %v6072_v11  ;;  %v3245_v30 = vpop.f32.mrb[97].mxu0 }
 0x4a9   : > { %v3246_v34 = vadd.f32 %v6072_v11, %v3245_v30  ;;  %v4409_v38 = vpop.f32.mrb[98].mxu0 }
 0x4aa   : > { %3502 = vst [vmem:[%s6076_s30 + $0x10] sm:$0xff] %v3254_v25  ;;  %v3257_v39 = vadd.f32 %v4409_v38, %v6072_v11  ;;  %v3248_v42 = vpop.f32.mrb[99].mxu0 }
 0x4ab   : > { %3500 = vst [vmem:[%s6076_s30] sm:$0xff] %v3246_v34  ;;  %v3249_v55 = vadd.f32 %v6072_v11, %v3248_v42 }
 0x4ac   : > { %3503 = vst [vmem:[%s6076_s30 + $0x18] sm:$0xff] %v3257_v39 }
 0x4ad   : > { %3501 = vst [vmem:[%s6076_s30 + $0x8] sm:$0xff] %v3249_v55 }
 0x4af   : > { %v4412_v60 = vpop.f32.mrb[100].mxu0 }
 0x4b0   : > { %v3270_v1 = vadd.f32 %v4412_v60, %v6072_v11  ;;  %v3261_v7 = vpop.f32.mrb[101].mxu0 }
 0x4b1   : > { %v3262_v8 = vadd.f32 %v6072_v11, %v3261_v7  ;;  %v4413_v13 = vpop.f32.mrb[102].mxu0 }
 0x4b2   : > { %3506 = vst [vmem:[%s6076_s30 + $0x30] sm:$0xff] %v3270_v1  ;;  %v3273_v26 = vadd.f32 %v4413_v13, %v6072_v11  ;;  %v3264_v32 = vpop.f32.mrb[103].mxu0 }
 0x4b3   : > { %3504 = vst [vmem:[%s6076_s30 + $0x20] sm:$0xff] %v3262_v8  ;;  %v3265_v37 = vadd.f32 %v6072_v11, %v3264_v32 }
 0x4b4   : > { %3507 = vst [vmem:[%s6076_s30 + $0x38] sm:$0xff] %v3273_v26 }
 0x4b5   : > { %3505 = vst [vmem:[%s6076_s30 + $0x28] sm:$0xff] %v3265_v37 }
 0x4b8   : > { %v4416_v44 = vpop.f32.mrb[104].mxu0 }
 0x4b9   : > { %v3286_v50 = vadd.f32 %v4416_v44, %v6072_v11  ;;  %v3277_v3 = vpop.f32.mrb[105].mxu0 }
 0x4ba   : > { %v3278_v4 = vadd.f32 %v6072_v11, %v3277_v3  ;;  %v4417_v5 = vpop.f32.mrb[106].mxu0 }
 0x4bb   : > { %3510 = vst [vmem:[%s6076_s30 + $0x50] sm:$0xff] %v3286_v50  ;;  %v3289_v9 = vadd.f32 %v4417_v5, %v6072_v11  ;;  %v3280_v12 = vpop.f32.mrb[107].mxu0 }
 0x4bc   : > { %3508 = vst [vmem:[%s6076_s30 + $0x40] sm:$0xff] %v3278_v4  ;;  %v3281_v15 = vadd.f32 %v6072_v11, %v3280_v12 }
 0x4bd   : > { %3511 = vst [vmem:[%s6076_s30 + $0x58] sm:$0xff] %v3289_v9 }
 0x4be   : > { %3509 = vst [vmem:[%s6076_s30 + $0x48] sm:$0xff] %v3281_v15 }
 0x4c0   : > { %v4420_v17 = vpop.f32.mrb[108].mxu0 }
 0x4c1   : > { %v3302_v18 = vadd.f32 %v4420_v17, %v6072_v11  ;;  %v3293_v19 = vpop.f32.mrb[109].mxu0 }
 0x4c2   : > { %v3294_v20 = vadd.f32 %v6072_v11, %v3293_v19  ;;  %v4421_v21 = vpop.f32.mrb[110].mxu0 }
 0x4c3   : > { %3514 = vst [vmem:[%s6076_s30 + $0x70] sm:$0xff] %v3302_v18  ;;  %v3305_v16 = vadd.f32 %v4421_v21, %v6072_v11  ;;  %v3296_v22 = vpop.f32.mrb[111].mxu0 }
 0x4c4   : > { %3512 = vst [vmem:[%s6076_s30 + $0x60] sm:$0xff] %v3294_v20  ;;  %v3297_v23 = vadd.f32 %v6072_v11, %v3296_v22 }
 0x4c5   : > { %3515 = vst [vmem:[%s6076_s30 + $0x78] sm:$0xff] %v3305_v16 }
 0x4c6   : > { %3513 = vst [vmem:[%s6076_s30 + $0x68] sm:$0xff] %v3297_v23 }
 0x4c9   : > { %v4424_v24 = vpop.f32.mrb[112].mxu0 }
 0x4ca   : > { %v3318_v27 = vadd.f32 %v4424_v24, %v6072_v11  ;;  %v3309_v28 = vpop.f32.mrb[113].mxu0 }
 0x4cb   : > { %v3310_v29 = vadd.f32 %v6072_v11, %v3309_v28  ;;  %v4425_v31 = vpop.f32.mrb[114].mxu0 }
 0x4cc   : > { %3518 = vst [vmem:[%s6076_s30 + $0x90] sm:$0xff] %v3318_v27  ;;  %v3321_v6 = vadd.f32 %v4425_v31, %v6072_v11  ;;  %v3312_v33 = vpop.f32.mrb[115].mxu0 }
 0x4cd   : > { %3516 = vst [vmem:[%s6076_s30 + $0x80] sm:$0xff] %v3310_v29  ;;  %v3313_v35 = vadd.f32 %v6072_v11, %v3312_v33 }
 0x4ce   : > { %3519 = vst [vmem:[%s6076_s30 + $0x98] sm:$0xff] %v3321_v6 }
 0x4cf   : > { %3517 = vst [vmem:[%s6076_s30 + $0x88] sm:$0xff] %v3313_v35 }
 0x4d1   : > { %v4428_v36 = vpop.f32.mrb[116].mxu0 }
 0x4d2   : > { %v3334_v40 = vadd.f32 %v4428_v36, %v6072_v11  ;;  %v3325_v41 = vpop.f32.mrb[117].mxu0 }
 0x4d3   : > { %v3326_v43 = vadd.f32 %v6072_v11, %v3325_v41  ;;  %v4429_v45 = vpop.f32.mrb[118].mxu0 }
 0x4d4   : > { %3522 = vst [vmem:[%s6076_s30 + $0xb0] sm:$0xff] %v3334_v40  ;;  %v3337_v48 = vadd.f32 %v4429_v45, %v6072_v11  ;;  %v3328_v49 = vpop.f32.mrb[119].mxu0 }
 0x4d5   : > { %3520 = vst [vmem:[%s6076_s30 + $0xa0] sm:$0xff] %v3326_v43  ;;  %v3329_v51 = vadd.f32 %v6072_v11, %v3328_v49 }
 0x4d6   : > { %3523 = vst [vmem:[%s6076_s30 + $0xb8] sm:$0xff] %v3337_v48 }
 0x4d7   : > { %3521 = vst [vmem:[%s6076_s30 + $0xa8] sm:$0xff] %v3329_v51 }
 0x4da   : > { %v4432_v52 = vpop.f32.mrb[120].mxu0 }
 0x4db   : > { %v3350_v53 = vadd.f32 %v4432_v52, %v6072_v11  ;;  %v3341_v54 = vpop.f32.mrb[121].mxu0 }
 0x4dc   : > { %v3342_v56 = vadd.f32 %v6072_v11, %v3341_v54  ;;  %v4433_v57 = vpop.f32.mrb[122].mxu0 }
 0x4dd   : > { %3526 = vst [vmem:[%s6076_s30 + $0xd0] sm:$0xff] %v3350_v53  ;;  %v3353_v58 = vadd.f32 %v4433_v57, %v6072_v11  ;;  %v3344_v59 = vpop.f32.mrb[123].mxu0 }
 0x4de   : > { %3524 = vst [vmem:[%s6076_s30 + $0xc0] sm:$0xff] %v3342_v56  ;;  %v3345_v47 = vadd.f32 %v6072_v11, %v3344_v59 }
 0x4df   : > { %3527 = vst [vmem:[%s6076_s30 + $0xd8] sm:$0xff] %v3353_v58 }
 0x4e0   : > { %3525 = vst [vmem:[%s6076_s30 + $0xc8] sm:$0xff] %v3345_v47 }
 0x4e2   : > { %v4436_v62 = vpop.f32.mrb[124].mxu0 }
 0x4e3   : > { %v3366_v63 = vadd.f32 %v4436_v62, %v6072_v11  ;;  %v3357_v0 = vpop.f32.mrb[125].mxu0 }
 0x4e4   : > { %v3358_v61 = vadd.f32 %v6072_v11, %v3357_v0  ;;  %v4437_v46 = vpop.f32.mrb[126].mxu0 }
 0x4e5   : > { %3530 = vst [vmem:[%s6076_s30 + $0xf0] sm:$0xff] %v3366_v63  ;;  %v3369_v2 = vadd.f32 %v4437_v46, %v6072_v11  ;;  %v3360_v10 = vpop.f32.mrb[127].mxu0 }
 0x4e6   : > { %3528 = vst [vmem:[%s6076_s30 + $0xe0] sm:$0xff] %v3358_v61  ;;  %v3361_v14 = vadd.f32 %v6072_v11, %v3360_v10 }
 0x4e7   : > { %3531 = vst [vmem:[%s6076_s30 + $0xf8] sm:$0xff] %v3369_v2 }
 0x4e8   : > { %3529 = vst [vmem:[%s6076_s30 + $0xe8] sm:$0xff] %v3361_v14 }
 0x4eb   : > { %v4440_v25 = vpop.f32.mrb[128].mxu0 }
 0x4ec   : > { %v3382_v30 = vadd.f32 %v4440_v25, %v6072_v11  ;;  %v3373_v34 = vpop.f32.mrb[129].mxu0 }
 0x4ed   : > { %v3374_v38 = vadd.f32 %v6072_v11, %v3373_v34  ;;  %v4441_v39 = vpop.f32.mrb[130].mxu0 }
 0x4ee   : > { %3534 = vst [vmem:[%s6076_s30 + $0x110] sm:$0xff] %v3382_v30  ;;  %v3385_v42 = vadd.f32 %v4441_v39, %v6072_v11  ;;  %v3376_v55 = vpop.f32.mrb[131].mxu0 }
 0x4ef   : > { %3532 = vst [vmem:[%s6076_s30 + $0x100] sm:$0xff] %v3374_v38  ;;  %v3377_v60 = vadd.f32 %v6072_v11, %v3376_v55 }
 0x4f0   : > { %3535 = vst [vmem:[%s6076_s30 + $0x118] sm:$0xff] %v3385_v42 }
 0x4f1   : > { %3533 = vst [vmem:[%s6076_s30 + $0x108] sm:$0xff] %v3377_v60 }
 0x4f3   : > { %v4444_v1 = vpop.f32.mrb[132].mxu0 }
 0x4f4   : > { %v3398_v7 = vadd.f32 %v4444_v1, %v6072_v11  ;;  %v3389_v8 = vpop.f32.mrb[133].mxu0 }
 0x4f5   : > { %v3390_v13 = vadd.f32 %v6072_v11, %v3389_v8  ;;  %v4445_v26 = vpop.f32.mrb[134].mxu0 }
 0x4f6   : > { %3538 = vst [vmem:[%s6076_s30 + $0x130] sm:$0xff] %v3398_v7  ;;  %v3401_v32 = vadd.f32 %v4445_v26, %v6072_v11  ;;  %v3392_v37 = vpop.f32.mrb[135].mxu0 }
 0x4f7   : > { %3536 = vst [vmem:[%s6076_s30 + $0x120] sm:$0xff] %v3390_v13  ;;  %v3393_v44 = vadd.f32 %v6072_v11, %v3392_v37 }
 0x4f8   : > { %3539 = vst [vmem:[%s6076_s30 + $0x138] sm:$0xff] %v3401_v32 }
 0x4f9   : > { %3537 = vst [vmem:[%s6076_s30 + $0x128] sm:$0xff] %v3393_v44 }
 0x4fc   : > { %v4448_v50 = vpop.f32.mrb[136].mxu0 }
 0x4fd   : > { %v3414_v3 = vadd.f32 %v4448_v50, %v6072_v11  ;;  %v3405_v4 = vpop.f32.mrb[137].mxu0 }
 0x4fe   : > { %v3406_v5 = vadd.f32 %v6072_v11, %v3405_v4  ;;  %v4449_v9 = vpop.f32.mrb[138].mxu0 }
 0x4ff   : > { %3542 = vst [vmem:[%s6076_s30 + $0x150] sm:$0xff] %v3414_v3  ;;  %v3417_v12 = vadd.f32 %v4449_v9, %v6072_v11  ;;  %v3408_v15 = vpop.f32.mrb[139].mxu0 }
 0x500   : > { %3540 = vst [vmem:[%s6076_s30 + $0x140] sm:$0xff] %v3406_v5  ;;  %v3409_v17 = vadd.f32 %v6072_v11, %v3408_v15 }
 0x501   : > { %3543 = vst [vmem:[%s6076_s30 + $0x158] sm:$0xff] %v3417_v12 }
 0x502   : > { %3541 = vst [vmem:[%s6076_s30 + $0x148] sm:$0xff] %v3409_v17 }
 0x504   : > { %v4452_v18 = vpop.f32.mrb[140].mxu0 }
 0x505   : > { %v3430_v19 = vadd.f32 %v4452_v18, %v6072_v11  ;;  %v3421_v20 = vpop.f32.mrb[141].mxu0 }
 0x506   : > { %v3422_v21 = vadd.f32 %v6072_v11, %v3421_v20  ;;  %v4453_v16 = vpop.f32.mrb[142].mxu0 }
 0x507   : > { %3546 = vst [vmem:[%s6076_s30 + $0x170] sm:$0xff] %v3430_v19  ;;  %v3433_v22 = vadd.f32 %v4453_v16, %v6072_v11  ;;  %v3424_v23 = vpop.f32.mrb[143].mxu0 }
 0x508   : > { %3544 = vst [vmem:[%s6076_s30 + $0x160] sm:$0xff] %v3422_v21  ;;  %v3425_v24 = vadd.f32 %v6072_v11, %v3424_v23 }
 0x509   : > { %3547 = vst [vmem:[%s6076_s30 + $0x178] sm:$0xff] %v3433_v22 }
 0x50a   : > { %3545 = vst [vmem:[%s6076_s30 + $0x168] sm:$0xff] %v3425_v24 }
 0x50d   : > { %v4456_v27 = vpop.f32.mrb[144].mxu0 }
 0x50e   : > { %v3446_v28 = vadd.f32 %v4456_v27, %v6072_v11  ;;  %v3437_v29 = vpop.f32.mrb[145].mxu0 }
 0x50f   : > { %v3438_v31 = vadd.f32 %v6072_v11, %v3437_v29  ;;  %v4457_v6 = vpop.f32.mrb[146].mxu0 }
 0x510   : > { %3550 = vst [vmem:[%s6076_s30 + $0x190] sm:$0xff] %v3446_v28  ;;  %v3449_v33 = vadd.f32 %v4457_v6, %v6072_v11  ;;  %v3440_v35 = vpop.f32.mrb[147].mxu0 }
 0x511   : > { %3548 = vst [vmem:[%s6076_s30 + $0x180] sm:$0xff] %v3438_v31  ;;  %v3441_v36 = vadd.f32 %v6072_v11, %v3440_v35 }
 0x512   : > { %3551 = vst [vmem:[%s6076_s30 + $0x198] sm:$0xff] %v3449_v33 }
 0x513   : > { %3549 = vst [vmem:[%s6076_s30 + $0x188] sm:$0xff] %v3441_v36 }
 0x515   : > { %v4460_v40 = vpop.f32.mrb[148].mxu0 }
 0x516   : > { %v3462_v41 = vadd.f32 %v4460_v40, %v6072_v11  ;;  %v3453_v43 = vpop.f32.mrb[149].mxu0 }
 0x517   : > { %v3454_v45 = vadd.f32 %v6072_v11, %v3453_v43  ;;  %v4461_v48 = vpop.f32.mrb[150].mxu0 }
 0x518   : > { %3554 = vst [vmem:[%s6076_s30 + $0x1b0] sm:$0xff] %v3462_v41  ;;  %v3465_v49 = vadd.f32 %v4461_v48, %v6072_v11  ;;  %v3456_v51 = vpop.f32.mrb[151].mxu0 }
 0x519   : > { %3552 = vst [vmem:[%s6076_s30 + $0x1a0] sm:$0xff] %v3454_v45  ;;  %v3457_v52 = vadd.f32 %v6072_v11, %v3456_v51 }
 0x51a   : > { %3555 = vst [vmem:[%s6076_s30 + $0x1b8] sm:$0xff] %v3465_v49 }
 0x51b   : > { %3553 = vst [vmem:[%s6076_s30 + $0x1a8] sm:$0xff] %v3457_v52 }
 0x51e   : > { %v4464_v53 = vpop.f32.mrb[152].mxu0 }
 0x51f   : > { %v3478_v54 = vadd.f32 %v4464_v53, %v6072_v11  ;;  %v3469_v56 = vpop.f32.mrb[153].mxu0 }
 0x520   : > { %v3470_v57 = vadd.f32 %v6072_v11, %v3469_v56  ;;  %v4465_v58 = vpop.f32.mrb[154].mxu0 }
 0x521   : > { %3558 = vst [vmem:[%s6076_s30 + $0x1d0] sm:$0xff] %v3478_v54  ;;  %v3481_v59 = vadd.f32 %v4465_v58, %v6072_v11  ;;  %v3472_v47 = vpop.f32.mrb[155].mxu0 }
 0x522   : > { %3556 = vst [vmem:[%s6076_s30 + $0x1c0] sm:$0xff] %v3470_v57  ;;  %v3473_v62 = vadd.f32 %v6072_v11, %v3472_v47 }
 0x523   : > { %3559 = vst [vmem:[%s6076_s30 + $0x1d8] sm:$0xff] %v3481_v59 }
 0x524   : > { %3557 = vst [vmem:[%s6076_s30 + $0x1c8] sm:$0xff] %v3473_v62 }
 0x526   : > { %v4468_v63 = vpop.f32.mrb[156].mxu0 }
 0x527   : > { %v3494_v0 = vadd.f32 %v4468_v63, %v6072_v11  ;;  %v3485_v61 = vpop.f32.mrb[157].mxu0 }
 0x528   : > { %v3486_v46 = vadd.f32 %v6072_v11, %v3485_v61  ;;  %v4469_v2 = vpop.f32.mrb[158].mxu0 }
 0x529   : > { %3562 = vst [vmem:[%s6076_s30 + $0x1f0] sm:$0xff] %v3494_v0  ;;  %v3497_v10 = vadd.f32 %v4469_v2, %v6072_v11  ;;  %v3488_v14 = vpop.f32.mrb[159].mxu0 }
 0x52a   : > { %3560 = vst [vmem:[%s6076_s30 + $0x1e0] sm:$0xff] %v3486_v46  ;;  %v3489_v25 = vadd.f32 %v6072_v11, %v3488_v14 }
 0x52b   : > { %3563 = vst [vmem:[%s6076_s30 + $0x1f8] sm:$0xff] %v3497_v10 }
 0x52c   : > { %3561 = vst [vmem:[%s6076_s30 + $0x1e8] sm:$0xff] %v3489_v25 }
 0x52d   : > { %5368 = shalt.err (!%p5365_p3)
}
 0x52e   : > { %s5369_s24 = scalar_lea.hbm %s6205_s22, 8192  ;;  %s5373_s16 = scalar_lea.hbm %s6267_s11, 16384 }
 0x52f   : > { %p5370_p4 = scmp.ne.s32.totalorder %s6205_s22, %s5369_s24  ;;  %p5374_p9 = scmp.lt.u32.totalorder %s6205_s22, %s6267_s11 }
 0x530   : > { %p5375_p10 = scmp.lt.u32.totalorder %s5373_s16, %s5369_s24  ;;  %p5377_p12 = scmp.lt.u32.totalorder %s5369_s24, %s6205_s22 }
 0x531   : > { %p5371_p7 = pnand %p5370_p4, %p5521_p5 }
 0x532   : > { %p5376_p11 = por %p5375_p10, %p5374_p9 }
 0x533   : > { %p5372_p8 = pneg %p5371_p7 }
 0x534   : > { %p5378_p13 = por %p5377_p12, %p5376_p11 }
 0x536   : > { %p5379_p0 = pnand %p5378_p13, %p5372_p8 }
 0x538   : > { %5382 = shalt.err (!%p5379_p0)
}
 0x539   : > { %s5421_s25 = smov 128   ;;  %s5422_s13 = smov 8  }
 0x53a   : > { %4476 = dma.vmem_to_hbm [thread:$0]  (%p5521_p5), %s6207_s14, 8192, %s6205_s22, %s6215_s21, %s5421_s25, %s5421_s25, %s5422_s13  }
 0x53b PF: > { %p4482_p1 = scmp.ge.s32.totalorder %s5417_s20, 2  ;;  %s3593_s30 = sand.u32 1, %s5405_s17  }
 0x53c   : > { %s3594_s24 = scalar_lea.sflag [#allocation3], %s3593_s30 }
 0x53d   : > { %p4479_p2 = pnand %p4482_p1, %p5525_p6 }
 0x53f   : > { %5400 = dma.done.wait (!%p4479_p2), %s3594_s24, 8192  }
 0x540   : > { %5402 = vsyncadd (!%p4479_p2), %s3594_s24, 4294959104  ;;  %p21_p3 = scmp.ge.s32.totalorder %s5508_s23, 4   ;;  %s6270_s17 = smov %s5409_s18 }
 0x541   : > { %s6271_s18 = smov %s5413_s19  ;;  %s6272_s19 = smov %s5519_s26 }
 0x542   : > { %s6273_s20 = smov %s5508_s23  ;;  %23 = sbr.rel (!%p21_p3) target bundleno = 3 (0x3), region = 99 }
 0x549   :  { %3599 = vsyncpa [#allocation3], 1 }
 0x54a   :  { %3601 = vsyncpa [#allocation3 + $0x1], 1 }

</bundles_post_ra>
